<compile_context>
chip_gen: v5e
topology: v5e:2x2
jax: 0.10.0
libtpu: 0.0.40
codegen_flags: <defaults>
</compile_context>

<pallas_src>
import jax
import jax.numpy as jnp
from jax import lax
from jax.experimental import pallas as pl
from jax.experimental.pallas import tpu as pltpu


def _masked_hist_update(ids_ref, mask_ref, hist_ref):
    """hist[b, v] += sum_s mask[b, s] * (ids[b, s] == v)   (f32 accumulate)."""
    ids = ids_ref[...]                                        # (TB, TS) int32
    msk = mask_ref[...]                                       # (TB, TS) f32
    vocab = hist_ref.shape[-1]
    iota_v = lax.broadcasted_iota(jnp.int32, ids.shape + (vocab,), 2)
    onehot = ids[:, :, None] == iota_v                        # (TB, TS, V) bool
    weighted = jnp.where(onehot, msk[:, :, None], 0.0)        # (TB, TS, V) f32
    hist_ref[...] += jnp.sum(weighted, axis=1)                # (TB, V)


def _codecontrast_kernel(
    prob_ids_ref, prob_mask_ref,          # (TB,TS) i32, (TB,TS) f32
    code_ids_ref, code_mask_ref,          # (TB,TS) i32, (TB,TS) f32
    prob_invcnt_ref, code_invcnt_ref,     # (TB,1) f32  (precomputed 1/max(cnt,1))
    tc_in_ref, tc_out_ref,                # (TB,Din) f32, (TB,Dout) f32
    prob_tbl_ref, code_tbl_ref,           # (V,E) bf16 -- resident in VMEM
    w_prob_ref, b_prob_ref,               # (E,H), (1,H)
    w_code_ref, b_code_ref,               # (E,H), (1,H)
    w_tci_ref, w_tco_ref, b_tc_ref,       # (Din,H), (Dout,H), (1,H)
    w_proj_p_ref, w_proj_t_ref, w_proj_c_ref, b_proj_ref,   # (H,H)x3, (1,H)
    out_ref,                              # (TB,H)  resident across the S axis
    p_hist, c_hist,                       # (TB,V) f32 scratch accumulators
):
    f32 = jnp.float32
    s = pl.program_id(1)

    # --- init accumulators at the first sequence tile -----------------------
    @pl.when(s == 0)
    def _init():
        p_hist[...] = jnp.zeros_like(p_hist)
        c_hist[...] = jnp.zeros_like(c_hist)

    # --- hot loop: mask-weighted token histograms over this sequence tile ----
    _masked_hist_update(prob_ids_ref, prob_mask_ref, p_hist)
    _masked_hist_update(code_ids_ref, code_mask_ref, c_hist)

    # --- epilogue: gather-as-matmul, encoder heads, projection --------------
    @pl.when(s == pl.num_programs(1) - 1)
    def _epilogue():
        prob_tbl = prob_tbl_ref[...].astype(f32)              # (V,E) one-time cast
        code_tbl = code_tbl_ref[...].astype(f32)

        # masked mean pooling:  (hist @ table) * inv_count
        p_pool = (jnp.dot(p_hist[...], prob_tbl, preferred_element_type=f32)
                  * prob_invcnt_ref[...])                     # (TB,E)
        c_pool = (jnp.dot(c_hist[...], code_tbl, preferred_element_type=f32)
                  * code_invcnt_ref[...])                     # (TB,E)

        problem_repr = jnp.tanh(
            jnp.dot(p_pool, w_prob_ref[...], preferred_element_type=f32)
            + b_prob_ref[...])                                # (TB,H)
        code_repr = jnp.tanh(
            jnp.dot(c_pool, w_code_ref[...], preferred_element_type=f32)
            + b_code_ref[...])                                # (TB,H)
        test_repr = jnp.tanh(
            jnp.dot(tc_in_ref[...], w_tci_ref[...], preferred_element_type=f32)
            + jnp.dot(tc_out_ref[...], w_tco_ref[...], preferred_element_type=f32)
            + b_tc_ref[...])                                  # (TB,H)

        # cat([p, t, c], 1) @ W_proj == p @ Wp + t @ Wt + c @ Wc  (no concat).
        projected = (
            jnp.dot(problem_repr, w_proj_p_ref[...], preferred_element_type=f32)
            + jnp.dot(test_repr, w_proj_t_ref[...], preferred_element_type=f32)
            + jnp.dot(code_repr, w_proj_c_ref[...], preferred_element_type=f32)
            + b_proj_ref[...])                                # (TB,H)
        out_ref[...] = projected.astype(out_ref.dtype)


def codecontrast_forward(problem_input, test_case_input, code_input, params,
                         *, block_b=128, block_s=512):
    """problem_input / code_input: dict(input_ids=(B,S) int32, attention_mask=(B,S))
       test_case_input: dict(input_seq=(B,Din) f32, output_seq=(B,Dout) f32)"""
    prob_ids = problem_input["input_ids"].astype(jnp.int32)
    code_ids = code_input["input_ids"].astype(jnp.int32)
    prob_mask = problem_input["attention_mask"].astype(jnp.float32)
    code_mask = code_input["attention_mask"].astype(jnp.float32)

    B, S = prob_ids.shape
    V, E = params["prob_embed"].shape
    H = params["b_proj"].shape[-1]
    Din = test_case_input["input_seq"].shape[-1]
    Dout = test_case_input["output_seq"].shape[-1]

    # Tile selection: big tiles amortize per-grid-step overhead; clamp to the
    # problem and keep >= 2 batch tiles so v7x can shard the "parallel" axis.
    block_b = min(block_b, B)
    block_s = min(block_s, S)
    if B // block_b < 2 and B >= 16:
        block_b = B // 2
    assert B % block_b == 0 and S % block_s == 0, "demo expects divisible tiles"

    # Precomputed inverse token counts (replaces in-kernel cnt accumulators).
    prob_invcnt = 1.0 / jnp.maximum(prob_mask.sum(axis=1, keepdims=True), 1.0)
    code_invcnt = 1.0 / jnp.maximum(code_mask.sum(axis=1, keepdims=True), 1.0)

    # Split W_proj into its three H-row blocks (problem / test / code).
    w_proj = params["w_proj"]
    w_proj_p, w_proj_t, w_proj_c = w_proj[:H], w_proj[H:2 * H], w_proj[2 * H:]

    grid = (B // block_b, S // block_s)   # sequence (reduction) axis last

    seq_spec = lambda: pl.BlockSpec((block_b, block_s), lambda b, s: (b, s))
    row_spec = lambda d: pl.BlockSpec((block_b, d), lambda b, s: (b, 0))
    const_spec = lambda shape: pl.BlockSpec(shape, lambda b, s: (0, 0))  # resident

    in_specs = [
        seq_spec(), seq_spec(),                        # problem ids / mask
        seq_spec(), seq_spec(),                        # code ids / mask
        row_spec(1), row_spec(1),                      # inv counts
        row_spec(Din), row_spec(Dout),                 # test-case features
        const_spec((V, E)), const_spec((V, E)),        # embedding tables (bf16)
        const_spec((E, H)), const_spec((1, H)),        # problem head
        const_spec((E, H)), const_spec((1, H)),        # code head
        const_spec((Din, H)), const_spec((Dout, H)), const_spec((1, H)),  # tc head
        const_spec((H, H)), const_spec((H, H)), const_spec((H, H)),       # proj
        const_spec((1, H)),
    ]
    # Output block index constant across S -> resident accumulator-style output,
    # written only in the @pl.when(last-S) epilogue.
    out_spec = pl.BlockSpec((block_b, H), lambda b, s: (b, 0))

    grid_spec = pltpu.PrefetchScalarGridSpec(
        num_scalar_prefetch=0,
        grid=grid,
        in_specs=in_specs,
        out_specs=out_spec,
        scratch_shapes=[
            pltpu.VMEM((block_b, V), jnp.float32),     # p_hist
            pltpu.VMEM((block_b, V), jnp.float32),     # c_hist
        ],
    )

    # Advisory cost estimate: memory-bound on the ids/mask streams; matmul
    # FLOPs (gather-as-matmul + heads + projection) and 3*B*H tanh.
    bytes_accessed = int(
        2 * B * S * 4                     # int32 ids (two encoders)
        + 2 * B * S * 4                   # f32 masks
        + B * (Din + Dout) * 4 + 2 * B * 4
        + 2 * V * E * 2                   # bf16 embedding tables
        + (2 * E * H + Din * H + Dout * H + 3 * H * H + 5 * H) * 4
        + B * H * 4)                      # output
    flops = int(2 * B * (2 * V * E + 2 * E * H + (Din + Dout) * H + 3 * H * H))
    cost = pl.CostEstimate(flops=flops, transcendentals=int(3 * B * H),
                           bytes_accessed=bytes_accessed)

    return pl.pallas_call(
        _codecontrast_kernel,
        out_shape=jax.ShapeDtypeStruct((B, H), jnp.float32),
        grid_spec=grid_spec,
        compiler_params=pltpu.CompilerParams(
            dimension_semantics=("parallel", "arbitrary"),
            # Budget re-derived for the gather-in-kernel design: resident
            # tables + weights + tiny id/mask tiles; fits v7x's 64 MiB VMEM.
            vmem_limit_bytes=48 * 1024 * 1024,
        ),
        cost_estimate=cost,
    )(
        prob_ids, prob_mask,
        code_ids, code_mask,
        prob_invcnt, code_invcnt,
        test_case_input["input_seq"], test_case_input["output_seq"],
        params["prob_embed"], params["code_embed"],
        params["w_prob"], params["b_prob"],
        params["w_code"], params["b_code"],
        params["w_tc_in"], params["w_tc_out"], params["b_tc"],
        w_proj_p, w_proj_t, w_proj_c, params["b_proj"],
    )


def _reference_forward(problem_input, test_case_input, code_input, params):
    """Pure-JAX reference (same bf16 embedding tables, same fused math)."""
    f32 = jnp.float32
    prob_emb = jnp.take(params["prob_embed"].astype(f32),
                        problem_input["input_ids"], axis=0)
    code_emb = jnp.take(params["code_embed"].astype(f32),
                        code_input["input_ids"], axis=0)
    pm = problem_input["attention_mask"].astype(f32)
    cm = code_input["attention_mask"].astype(f32)

    p_pool = (prob_emb * pm[:, :, None]).sum(1) / jnp.maximum(pm.sum(1, keepdims=True), 1.0)
    c_pool = (code_emb * cm[:, :, None]).sum(1) / jnp.maximum(cm.sum(1, keepdims=True), 1.0)
    p_repr = jnp.tanh(p_pool @ params["w_prob"] + params["b_prob"][0])
    c_repr = jnp.tanh(c_pool @ params["w_code"] + params["b_code"][0])
    t_repr = jnp.tanh(
        test_case_input["input_seq"] @ params["w_tc_in"]
        + test_case_input["output_seq"] @ params["w_tc_out"]
        + params["b_tc"][0])
    combined = jnp.concatenate([p_repr, t_repr, c_repr], axis=1)        # (B, 3H)
    return combined @ params["w_proj"] + params["b_proj"][0]


if __name__ == "__main__":
    # Small but lane/sublane-aligned demo shapes (128-multiples on lane dims).
    B, S = 16, 256
    VOCAB, E, H = 128, 128, 128
    Din, Dout = 128, 128

    key = jax.random.PRNGKey(0)
    ks = jax.random.split(key, 14)

    params = {
        # Embedding tables stored bf16 (kept resident in VMEM inside the kernel).
        "prob_embed": (jax.random.normal(ks[0], (VOCAB, E), jnp.float32) * 0.1).astype(jnp.bfloat16),
        "code_embed": (jax.random.normal(ks[1], (VOCAB, E), jnp.float32) * 0.1).astype(jnp.bfloat16),
        "w_prob":  jax.random.normal(ks[2], (E, H), jnp.float32) * 0.1,
        "b_prob":  jax.random.normal(ks[3], (1, H), jnp.float32) * 0.01,
        "w_code":  jax.random.normal(ks[4], (E, H), jnp.float32) * 0.1,
        "b_code":  jax.random.normal(ks[5], (1, H), jnp.float32) * 0.01,
        "w_tc_in":  jax.random.normal(ks[6], (Din, H), jnp.float32) * 0.1,
        "w_tc_out": jax.random.normal(ks[7], (Dout, H), jnp.float32) * 0.1,
        "b_tc":     jax.random.normal(ks[8], (1, H), jnp.float32) * 0.01,
        # Fused projection weight: rows [0:H)=problem, [H:2H)=test, [2H:3H)=code.
        "w_proj":   jax.random.normal(ks[9], (3 * H, H), jnp.float32) * 0.1,
        "b_proj":   jax.random.normal(ks[10], (1, H), jnp.float32) * 0.01,
    }

    problem_input = {
        "input_ids": jax.random.randint(ks[11], (B, S), 0, VOCAB, jnp.int32),
        "attention_mask": jnp.concatenate(
            [jnp.ones((B, S - 3), jnp.float32), jnp.zeros((B, 3), jnp.float32)], axis=1),
    }
    code_input = {
        "input_ids": jax.random.randint(ks[12], (B, S), 0, VOCAB, jnp.int32),
        "attention_mask": jnp.ones((B, S), jnp.float32),
    }
    test_case_input = {
        "input_seq": jax.random.normal(jax.random.PRNGKey(1), (B, Din), jnp.float32),
        "output_seq": jax.random.normal(jax.random.PRNGKey(2), (B, Dout), jnp.float32),
    }

    # Small demo batch -> small explicit tiles (2 batch tiles x 2 sequence tiles);
    # production defaults are block_b=128, block_s=512.
    out = codecontrast_forward(problem_input, test_case_input, code_input, params,
                               block_b=8, block_s=128)
    out = jax.block_until_ready(out)

    ref = _reference_forward(problem_input, test_case_input, code_input, params)
    assert out.shape == (B, H)
    assert jnp.allclose(out, ref, atol=1e-3, rtol=1e-3), "Pallas kernel mismatch vs reference"

    print("KERNEL_OK")
</pallas_src>

<mosaic_0001>
module attributes {stable_mosaic.version = 11 : i64} {
  func.func @_codecontrast_kernel(%arg0: i32, %arg1: i32, %arg2: memref<8x128xi32, #tpu.memory_space<vmem>>, %arg3: memref<8x128xf32, #tpu.memory_space<vmem>>, %arg4: memref<8x128xi32, #tpu.memory_space<vmem>>, %arg5: memref<8x128xf32, #tpu.memory_space<vmem>>, %arg6: memref<8x1xf32, #tpu.memory_space<vmem>>, %arg7: memref<8x1xf32, #tpu.memory_space<vmem>>, %arg8: memref<8x128xf32, #tpu.memory_space<vmem>>, %arg9: memref<8x128xf32, #tpu.memory_space<vmem>>, %arg10: memref<128x128xbf16, #tpu.memory_space<vmem>>, %arg11: memref<128x128xbf16, #tpu.memory_space<vmem>>, %arg12: memref<128x128xf32, #tpu.memory_space<vmem>>, %arg13: memref<1x128xf32, #tpu.memory_space<vmem>>, %arg14: memref<128x128xf32, #tpu.memory_space<vmem>>, %arg15: memref<1x128xf32, #tpu.memory_space<vmem>>, %arg16: memref<128x128xf32, #tpu.memory_space<vmem>>, %arg17: memref<128x128xf32, #tpu.memory_space<vmem>>, %arg18: memref<1x128xf32, #tpu.memory_space<vmem>>, %arg19: memref<128x128xf32, #tpu.memory_space<vmem>>, %arg20: memref<128x128xf32, #tpu.memory_space<vmem>>, %arg21: memref<128x128xf32, #tpu.memory_space<vmem>>, %arg22: memref<1x128xf32, #tpu.memory_space<vmem>>, %arg23: memref<8x128xf32, #tpu.memory_space<vmem>>, %arg24: memref<8x128xf32, #tpu.memory_space<vmem>>, %arg25: memref<8x128xf32, #tpu.memory_space<vmem>>) attributes {dimension_semantics = [#tpu.dimension_semantics<parallel>, #tpu.dimension_semantics<arbitrary>], iteration_bounds = array<i64: 2, 2>, scalar_prefetch = 0 : i64, scratch_operands = 2 : i64, tpu.core_type = #tpu.core_type<tc>, window_params = [{transform_indices = @transform_0, window_bounds = array<i64: 8, 128>}, {transform_indices = @transform_1, window_bounds = array<i64: 8, 128>}, {transform_indices = @transform_2, window_bounds = array<i64: 8, 128>}, {transform_indices = @transform_3, window_bounds = array<i64: 8, 128>}, {transform_indices = @transform_4, window_bounds = array<i64: 8, 1>}, {transform_indices = @transform_5, window_bounds = array<i64: 8, 1>}, {transform_indices = @transform_6, window_bounds = array<i64: 8, 128>}, {transform_indices = @transform_7, window_bounds = array<i64: 8, 128>}, {pipeline_mode = #tpu.pipeline_mode<synchronous>, transform_indices = @transform_8, window_bounds = array<i64: 128, 128>}, {pipeline_mode = #tpu.pipeline_mode<synchronous>, transform_indices = @transform_9, window_bounds = array<i64: 128, 128>}, {pipeline_mode = #tpu.pipeline_mode<synchronous>, transform_indices = @transform_10, window_bounds = array<i64: 128, 128>}, {pipeline_mode = #tpu.pipeline_mode<synchronous>, transform_indices = @transform_11, window_bounds = array<i64: 1, 128>}, {pipeline_mode = #tpu.pipeline_mode<synchronous>, transform_indices = @transform_12, window_bounds = array<i64: 128, 128>}, {pipeline_mode = #tpu.pipeline_mode<synchronous>, transform_indices = @transform_13, window_bounds = array<i64: 1, 128>}, {pipeline_mode = #tpu.pipeline_mode<synchronous>, transform_indices = @transform_14, window_bounds = array<i64: 128, 128>}, {pipeline_mode = #tpu.pipeline_mode<synchronous>, transform_indices = @transform_15, window_bounds = array<i64: 128, 128>}, {pipeline_mode = #tpu.pipeline_mode<synchronous>, transform_indices = @transform_16, window_bounds = array<i64: 1, 128>}, {pipeline_mode = #tpu.pipeline_mode<synchronous>, transform_indices = @transform_17, window_bounds = array<i64: 128, 128>}, {pipeline_mode = #tpu.pipeline_mode<synchronous>, transform_indices = @transform_18, window_bounds = array<i64: 128, 128>}, {pipeline_mode = #tpu.pipeline_mode<synchronous>, transform_indices = @transform_19, window_bounds = array<i64: 128, 128>}, {pipeline_mode = #tpu.pipeline_mode<synchronous>, transform_indices = @transform_20, window_bounds = array<i64: 1, 128>}, {transform_indices = @transform_21, window_bounds = array<i64: 8, 128>}]} {
    %c0_i32 = arith.constant 0 : i32
    %0 = arith.cmpi eq, %arg1, %c0_i32 : i32
    %1 = arith.extui %0 : i1 to i32
    %c0_i32_0 = arith.constant 0 : i32
    %2 = arith.cmpi ne, %1, %c0_i32_0 : i32
    scf.if %2 {
      %cst_20 = arith.constant 0.000000e+00 : f32
      %36 = vector.broadcast %cst_20 : f32 to vector<8x128xf32>
      %c0_21 = arith.constant 0 : index
      %c0_22 = arith.constant 0 : index
      %37 = vector.load %arg24[%c0_21, %c0_22] : memref<8x128xf32, #tpu.memory_space<vmem>>, vector<8x128xf32>
      tpu.vector_store %arg24[%c0_21, %c0_22], %36 {strides = array<i32>} : memref<8x128xf32, #tpu.memory_space<vmem>>, vector<8x128xf32>,
      %cst_23 = arith.constant 0.000000e+00 : f32
      %38 = vector.broadcast %cst_23 : f32 to vector<8x128xf32>
      %c0_24 = arith.constant 0 : index
      %c0_25 = arith.constant 0 : index
      %39 = vector.load %arg25[%c0_24, %c0_25] : memref<8x128xf32, #tpu.memory_space<vmem>>, vector<8x128xf32>
      tpu.vector_store %arg25[%c0_24, %c0_25], %38 {strides = array<i32>} : memref<8x128xf32, #tpu.memory_space<vmem>>, vector<8x128xf32>,
    } else {
    }
    %c0 = arith.constant 0 : index
    %c0_1 = arith.constant 0 : index
    %3 = vector.load %arg2[%c0, %c0_1] : memref<8x128xi32, #tpu.memory_space<vmem>>, vector<8x128xi32>
    %c0_2 = arith.constant 0 : index
    %c0_3 = arith.constant 0 : index
    %4 = vector.load %arg3[%c0_2, %c0_3] : memref<8x128xf32, #tpu.memory_space<vmem>>, vector<8x128xf32>
    %5 = tpu.iota {dimensions = array<i32: 2>} : vector<8x128x128xi32>
    %6 = vector.shape_cast %3 : vector<8x128xi32> to vector<8x128x1xi32>
    %7 = vector.broadcast %6 : vector<8x128x1xi32> to vector<8x128x128xi32>
    %8 = arith.cmpi eq, %7, %5 : vector<8x128x128xi32>
    %9 = vector.shape_cast %4 : vector<8x128xf32> to vector<8x128x1xf32>
    %cst = arith.constant 0.000000e+00 : f32
    %10 = vector.shape_cast %9 : vector<8x128x1xf32> to vector<8x128x1xf32>
    %11 = vector.broadcast %10 : vector<8x128x1xf32> to vector<8x128x128xf32>
    %12 = vector.broadcast %cst : f32 to vector<8x128x128xf32>
    %13 = arith.select %8, %11, %12 : vector<8x128x128xi1>, vector<8x128x128xf32>
    %c0_4 = arith.constant 0 : index
    %c0_5 = arith.constant 0 : index
    %14 = vector.load %arg24[%c0_4, %c0_5] : memref<8x128xf32, #tpu.memory_space<vmem>>, vector<8x128xf32>
    %cst_6 = arith.constant dense<0.000000e+00> : vector<8x128xf32>
    %15 = vector.multi_reduction <add>, %13, %cst_6 [1] : vector<8x128x128xf32> to vector<8x128xf32>
    %16 = arith.addf %14, %15 : vector<8x128xf32>
    %c0_7 = arith.constant 0 : index
    %c0_8 = arith.constant 0 : index
    %17 = vector.load %arg24[%c0_7, %c0_8] : memref<8x128xf32, #tpu.memory_space<vmem>>, vector<8x128xf32>
    tpu.vector_store %arg24[%c0_7, %c0_8], %16 {strides = array<i32>} : memref<8x128xf32, #tpu.memory_space<vmem>>, vector<8x128xf32>,
    %c0_9 = arith.constant 0 : index
    %c0_10 = arith.constant 0 : index
    %18 = vector.load %arg4[%c0_9, %c0_10] : memref<8x128xi32, #tpu.memory_space<vmem>>, vector<8x128xi32>
    %c0_11 = arith.constant 0 : index
    %c0_12 = arith.constant 0 : index
    %19 = vector.load %arg5[%c0_11, %c0_12] : memref<8x128xf32, #tpu.memory_space<vmem>>, vector<8x128xf32>
    %20 = tpu.iota {dimensions = array<i32: 2>} : vector<8x128x128xi32>
    %21 = vector.shape_cast %18 : vector<8x128xi32> to vector<8x128x1xi32>
    %22 = vector.broadcast %21 : vector<8x128x1xi32> to vector<8x128x128xi32>
    %23 = arith.cmpi eq, %22, %20 : vector<8x128x128xi32>
    %24 = vector.shape_cast %19 : vector<8x128xf32> to vector<8x128x1xf32>
    %cst_13 = arith.constant 0.000000e+00 : f32
    %25 = vector.shape_cast %24 : vector<8x128x1xf32> to vector<8x128x1xf32>
    %26 = vector.broadcast %25 : vector<8x128x1xf32> to vector<8x128x128xf32>
    %27 = vector.broadcast %cst_13 : f32 to vector<8x128x128xf32>
    %28 = arith.select %23, %26, %27 : vector<8x128x128xi1>, vector<8x128x128xf32>
    %c0_14 = arith.constant 0 : index
    %c0_15 = arith.constant 0 : index
    %29 = vector.load %arg25[%c0_14, %c0_15] : memref<8x128xf32, #tpu.memory_space<vmem>>, vector<8x128xf32>
    %cst_16 = arith.constant dense<0.000000e+00> : vector<8x128xf32>
    %30 = vector.multi_reduction <add>, %28, %cst_16 [1] : vector<8x128x128xf32> to vector<8x128xf32>
    %31 = arith.addf %29, %30 : vector<8x128xf32>
    %c0_17 = arith.constant 0 : index
    %c0_18 = arith.constant 0 : index
    %32 = vector.load %arg25[%c0_17, %c0_18] : memref<8x128xf32, #tpu.memory_space<vmem>>, vector<8x128xf32>
    tpu.vector_store %arg25[%c0_17, %c0_18], %31 {strides = array<i32>} : memref<8x128xf32, #tpu.memory_space<vmem>>, vector<8x128xf32>,
    %c1_i32 = arith.constant 1 : i32
    %33 = arith.cmpi eq, %arg1, %c1_i32 : i32
    %34 = arith.extui %33 : i1 to i32
    %c0_i32_19 = arith.constant 0 : i32
    %35 = arith.cmpi ne, %34, %c0_i32_19 : i32
    scf.if %35 {
      %c0_20 = arith.constant 0 : index
      %c0_21 = arith.constant 0 : index
      %36 = vector.load %arg10[%c0_20, %c0_21] : memref<128x128xbf16, #tpu.memory_space<vmem>>, vector<128x128xbf16>
      %37 = arith.extf %36 : vector<128x128xbf16> to vector<128x128xf32>
      %c0_22 = arith.constant 0 : index
      %c0_23 = arith.constant 0 : index
      %38 = vector.load %arg11[%c0_22, %c0_23] : memref<128x128xbf16, #tpu.memory_space<vmem>>, vector<128x128xbf16>
      %39 = arith.extf %38 : vector<128x128xbf16> to vector<128x128xf32>
      %c0_24 = arith.constant 0 : index
      %c0_25 = arith.constant 0 : index
      %40 = vector.load %arg24[%c0_24, %c0_25] : memref<8x128xf32, #tpu.memory_space<vmem>>, vector<8x128xf32>
      %cst_26 = arith.constant dense<0.000000e+00> : vector<8x128xf32>
      %41 = tpu.matmul %40, %37, %cst_26 {dimension_numbers = #tpu.dot_dimension_numbers<[1], [0], [0], [1], [0, 0, 1, 1], [], []>} : vector<8x128xf32>, vector<128x128xf32>, vector<8x128xf32> -> vector<8x128xf32>
      %c0_27 = arith.constant 0 : index
      %c0_28 = arith.constant 0 : index
      %42 = vector.load %arg6[%c0_27, %c0_28] : memref<8x1xf32, #tpu.memory_space<vmem>>, vector<8x1xf32>
      %43 = vector.broadcast %42 : vector<8x1xf32> to vector<8x128xf32>
      %44 = arith.mulf %41, %43 : vector<8x128xf32>
      %c0_29 = arith.constant 0 : index
      %c0_30 = arith.constant 0 : index
      %45 = vector.load %arg25[%c0_29, %c0_30] : memref<8x128xf32, #tpu.memory_space<vmem>>, vector<8x128xf32>
      %cst_31 = arith.constant dense<0.000000e+00> : vector<8x128xf32>
      %46 = tpu.matmul %45, %39, %cst_31 {dimension_numbers = #tpu.dot_dimension_numbers<[1], [0], [0], [1], [0, 0, 1, 1], [], []>} : vector<8x128xf32>, vector<128x128xf32>, vector<8x128xf32> -> vector<8x128xf32>
      %c0_32 = arith.constant 0 : index
      %c0_33 = arith.constant 0 : index
      %47 = vector.load %arg7[%c0_32, %c0_33] : memref<8x1xf32, #tpu.memory_space<vmem>>, vector<8x1xf32>
      %48 = vector.broadcast %47 : vector<8x1xf32> to vector<8x128xf32>
      %49 = arith.mulf %46, %48 : vector<8x128xf32>
      %c0_34 = arith.constant 0 : index
      %c0_35 = arith.constant 0 : index
      %50 = vector.load %arg12[%c0_34, %c0_35] : memref<128x128xf32, #tpu.memory_space<vmem>>, vector<128x128xf32>
      %cst_36 = arith.constant dense<0.000000e+00> : vector<8x128xf32>
      %51 = tpu.matmul %44, %50, %cst_36 {dimension_numbers = #tpu.dot_dimension_numbers<[1], [0], [0], [1], [0, 0, 1, 1], [], []>} : vector<8x128xf32>, vector<128x128xf32>, vector<8x128xf32> -> vector<8x128xf32>
      %c0_37 = arith.constant 0 : index
      %c0_38 = arith.constant 0 : index
      %52 = vector.load %arg13[%c0_37, %c0_38] : memref<1x128xf32, #tpu.memory_space<vmem>>, vector<1x128xf32>
      %53 = vector.broadcast %52 : vector<1x128xf32> to vector<8x128xf32>
      %54 = arith.addf %51, %53 : vector<8x128xf32>
      %55 = math.tanh %54 : vector<8x128xf32>
      %c0_39 = arith.constant 0 : index
      %c0_40 = arith.constant 0 : index
      %56 = vector.load %arg14[%c0_39, %c0_40] : memref<128x128xf32, #tpu.memory_space<vmem>>, vector<128x128xf32>
      %cst_41 = arith.constant dense<0.000000e+00> : vector<8x128xf32>
      %57 = tpu.matmul %49, %56, %cst_41 {dimension_numbers = #tpu.dot_dimension_numbers<[1], [0], [0], [1], [0, 0, 1, 1], [], []>} : vector<8x128xf32>, vector<128x128xf32>, vector<8x128xf32> -> vector<8x128xf32>
      %c0_42 = arith.constant 0 : index
      %c0_43 = arith.constant 0 : index
      %58 = vector.load %arg15[%c0_42, %c0_43] : memref<1x128xf32, #tpu.memory_space<vmem>>, vector<1x128xf32>
      %59 = vector.broadcast %58 : vector<1x128xf32> to vector<8x128xf32>
      %60 = arith.addf %57, %59 : vector<8x128xf32>
      %61 = math.tanh %60 : vector<8x128xf32>
      %c0_44 = arith.constant 0 : index
      %c0_45 = arith.constant 0 : index
      %62 = vector.load %arg8[%c0_44, %c0_45] : memref<8x128xf32, #tpu.memory_space<vmem>>, vector<8x128xf32>
      %c0_46 = arith.constant 0 : index
      %c0_47 = arith.constant 0 : index
      %63 = vector.load %arg16[%c0_46, %c0_47] : memref<128x128xf32, #tpu.memory_space<vmem>>, vector<128x128xf32>
      %cst_48 = arith.constant dense<0.000000e+00> : vector<8x128xf32>
      %64 = tpu.matmul %62, %63, %cst_48 {dimension_numbers = #tpu.dot_dimension_numbers<[1], [0], [0], [1], [0, 0, 1, 1], [], []>} : vector<8x128xf32>, vector<128x128xf32>, vector<8x128xf32> -> vector<8x128xf32>
      %c0_49 = arith.constant 0 : index
      %c0_50 = arith.constant 0 : index
      %65 = vector.load %arg9[%c0_49, %c0_50] : memref<8x128xf32, #tpu.memory_space<vmem>>, vector<8x128xf32>
      %c0_51 = arith.constant 0 : index
      %c0_52 = arith.constant 0 : index
      %66 = vector.load %arg17[%c0_51, %c0_52] : memref<128x128xf32, #tpu.memory_space<vmem>>, vector<128x128xf32>
      %cst_53 = arith.constant dense<0.000000e+00> : vector<8x128xf32>
      %67 = tpu.matmul %65, %66, %cst_53 {dimension_numbers = #tpu.dot_dimension_numbers<[1], [0], [0], [1], [0, 0, 1, 1], [], []>} : vector<8x128xf32>, vector<128x128xf32>, vector<8x128xf32> -> vector<8x128xf32>
      %68 = arith.addf %64, %67 : vector<8x128xf32>
      %c0_54 = arith.constant 0 : index
      %c0_55 = arith.constant 0 : index
      %69 = vector.load %arg18[%c0_54, %c0_55] : memref<1x128xf32, #tpu.memory_space<vmem>>, vector<1x128xf32>
      %70 = vector.broadcast %69 : vector<1x128xf32> to vector<8x128xf32>
      %71 = arith.addf %68, %70 : vector<8x128xf32>
      %72 = math.tanh %71 : vector<8x128xf32>
      %c0_56 = arith.constant 0 : index
      %c0_57 = arith.constant 0 : index
      %73 = vector.load %arg19[%c0_56, %c0_57] : memref<128x128xf32, #tpu.memory_space<vmem>>, vector<128x128xf32>
      %cst_58 = arith.constant dense<0.000000e+00> : vector<8x128xf32>
      %74 = tpu.matmul %55, %73, %cst_58 {dimension_numbers = #tpu.dot_dimension_numbers<[1], [0], [0], [1], [0, 0, 1, 1], [], []>} : vector<8x128xf32>, vector<128x128xf32>, vector<8x128xf32> -> vector<8x128xf32>
      %c0_59 = arith.constant 0 : index
      %c0_60 = arith.constant 0 : index
      %75 = vector.load %arg20[%c0_59, %c0_60] : memref<128x128xf32, #tpu.memory_space<vmem>>, vector<128x128xf32>
      %cst_61 = arith.constant dense<0.000000e+00> : vector<8x128xf32>
      %76 = tpu.matmul %72, %75, %cst_61 {dimension_numbers = #tpu.dot_dimension_numbers<[1], [0], [0], [1], [0, 0, 1, 1], [], []>} : vector<8x128xf32>, vector<128x128xf32>, vector<8x128xf32> -> vector<8x128xf32>
      %77 = arith.addf %74, %76 : vector<8x128xf32>
      %c0_62 = arith.constant 0 : index
      %c0_63 = arith.constant 0 : index
      %78 = vector.load %arg21[%c0_62, %c0_63] : memref<128x128xf32, #tpu.memory_space<vmem>>, vector<128x128xf32>
      %cst_64 = arith.constant dense<0.000000e+00> : vector<8x128xf32>
      %79 = tpu.matmul %61, %78, %cst_64 {dimension_numbers = #tpu.dot_dimension_numbers<[1], [0], [0], [1], [0, 0, 1, 1], [], []>} : vector<8x128xf32>, vector<128x128xf32>, vector<8x128xf32> -> vector<8x128xf32>
      %80 = arith.addf %77, %79 : vector<8x128xf32>
      %c0_65 = arith.constant 0 : index
      %c0_66 = arith.constant 0 : index
      %81 = vector.load %arg22[%c0_65, %c0_66] : memref<1x128xf32, #tpu.memory_space<vmem>>, vector<1x128xf32>
      %82 = vector.broadcast %81 : vector<1x128xf32> to vector<8x128xf32>
      %83 = arith.addf %80, %82 : vector<8x128xf32>
      %c0_67 = arith.constant 0 : index
      %c0_68 = arith.constant 0 : index
      %84 = vector.load %arg23[%c0_67, %c0_68] : memref<8x128xf32, #tpu.memory_space<vmem>>, vector<8x128xf32>
      tpu.vector_store %arg23[%c0_67, %c0_68], %83 {strides = array<i32>} : memref<8x128xf32, #tpu.memory_space<vmem>>, vector<8x128xf32>,
    } else {
    }
    return
  }
  func.func @transform_0(%arg0: i32, %arg1: i32) -> (i32, i32) {
    %c0_i32 = arith.constant 0 : i32
    return %arg0, %arg1 : i32, i32
  }
  func.func @transform_1(%arg0: i32, %arg1: i32) -> (i32, i32) {
    %c0_i32 = arith.constant 0 : i32
    return %arg0, %arg1 : i32, i32
  }
  func.func @transform_2(%arg0: i32, %arg1: i32) -> (i32, i32) {
    %c0_i32 = arith.constant 0 : i32
    return %arg0, %arg1 : i32, i32
  }
  func.func @transform_3(%arg0: i32, %arg1: i32) -> (i32, i32) {
    %c0_i32 = arith.constant 0 : i32
    return %arg0, %arg1 : i32, i32
  }
  func.func @transform_4(%arg0: i32, %arg1: i32) -> (i32, i32) {
    %c0_i32 = arith.constant 0 : i32
    %c0_i32_0 = arith.constant 0 : i32
    return %arg0, %c0_i32 : i32, i32
  }
  func.func @transform_5(%arg0: i32, %arg1: i32) -> (i32, i32) {
    %c0_i32 = arith.constant 0 : i32
    %c0_i32_0 = arith.constant 0 : i32
    return %arg0, %c0_i32 : i32, i32
  }
  func.func @transform_6(%arg0: i32, %arg1: i32) -> (i32, i32) {
    %c0_i32 = arith.constant 0 : i32
    %c0_i32_0 = arith.constant 0 : i32
    return %arg0, %c0_i32 : i32, i32
  }
  func.func @transform_7(%arg0: i32, %arg1: i32) -> (i32, i32) {
    %c0_i32 = arith.constant 0 : i32
    %c0_i32_0 = arith.constant 0 : i32
    return %arg0, %c0_i32 : i32, i32
  }
  func.func @transform_8(%arg0: i32, %arg1: i32) -> (i32, i32) {
    %c0_i32 = arith.constant 0 : i32
    %c0_i32_0 = arith.constant 0 : i32
    %c0_i32_1 = arith.constant 0 : i32
    return %c0_i32, %c0_i32_0 : i32, i32
  }
  func.func @transform_9(%arg0: i32, %arg1: i32) -> (i32, i32) {
    %c0_i32 = arith.constant 0 : i32
    %c0_i32_0 = arith.constant 0 : i32
    %c0_i32_1 = arith.constant 0 : i32
    return %c0_i32, %c0_i32_0 : i32, i32
  }
  func.func @transform_10(%arg0: i32, %arg1: i32) -> (i32, i32) {
    %c0_i32 = arith.constant 0 : i32
    %c0_i32_0 = arith.constant 0 : i32
    %c0_i32_1 = arith.constant 0 : i32
    return %c0_i32, %c0_i32_0 : i32, i32
  }
  func.func @transform_11(%arg0: i32, %arg1: i32) -> (i32, i32) {
    %c0_i32 = arith.constant 0 : i32
    %c0_i32_0 = arith.constant 0 : i32
    %c0_i32_1 = arith.constant 0 : i32
    return %c0_i32, %c0_i32_0 : i32, i32
  }
  func.func @transform_12(%arg0: i32, %arg1: i32) -> (i32, i32) {
    %c0_i32 = arith.constant 0 : i32
    %c0_i32_0 = arith.constant 0 : i32
    %c0_i32_1 = arith.constant 0 : i32
    return %c0_i32, %c0_i32_0 : i32, i32
  }
  func.func @transform_13(%arg0: i32, %arg1: i32) -> (i32, i32) {
    %c0_i32 = arith.constant 0 : i32
    %c0_i32_0 = arith.constant 0 : i32
    %c0_i32_1 = arith.constant 0 : i32
    return %c0_i32, %c0_i32_0 : i32, i32
  }
  func.func @transform_14(%arg0: i32, %arg1: i32) -> (i32, i32) {
    %c0_i32 = arith.constant 0 : i32
    %c0_i32_0 = arith.constant 0 : i32
    %c0_i32_1 = arith.constant 0 : i32
    return %c0_i32, %c0_i32_0 : i32, i32
  }
  func.func @transform_15(%arg0: i32, %arg1: i32) -> (i32, i32) {
    %c0_i32 = arith.constant 0 : i32
    %c0_i32_0 = arith.constant 0 : i32
    %c0_i32_1 = arith.constant 0 : i32
    return %c0_i32, %c0_i32_0 : i32, i32
  }
  func.func @transform_16(%arg0: i32, %arg1: i32) -> (i32, i32) {
    %c0_i32 = arith.constant 0 : i32
    %c0_i32_0 = arith.constant 0 : i32
    %c0_i32_1 = arith.constant 0 : i32
    return %c0_i32, %c0_i32_0 : i32, i32
  }
  func.func @transform_17(%arg0: i32, %arg1: i32) -> (i32, i32) {
    %c0_i32 = arith.constant 0 : i32
    %c0_i32_0 = arith.constant 0 : i32
    %c0_i32_1 = arith.constant 0 : i32
    return %c0_i32, %c0_i32_0 : i32, i32
  }
  func.func @transform_18(%arg0: i32, %arg1: i32) -> (i32, i32) {
    %c0_i32 = arith.constant 0 : i32
    %c0_i32_0 = arith.constant 0 : i32
    %c0_i32_1 = arith.constant 0 : i32
    return %c0_i32, %c0_i32_0 : i32, i32
  }
  func.func @transform_19(%arg0: i32, %arg1: i32) -> (i32, i32) {
    %c0_i32 = arith.constant 0 : i32
    %c0_i32_0 = arith.constant 0 : i32
    %c0_i32_1 = arith.constant 0 : i32
    return %c0_i32, %c0_i32_0 : i32, i32
  }
  func.func @transform_20(%arg0: i32, %arg1: i32) -> (i32, i32) {
    %c0_i32 = arith.constant 0 : i32
    %c0_i32_0 = arith.constant 0 : i32
    %c0_i32_1 = arith.constant 0 : i32
    return %c0_i32, %c0_i32_0 : i32, i32
  }
  func.func @transform_21(%arg0: i32, %arg1: i32) -> (i32, i32) {
    %c0_i32 = arith.constant 0 : i32
    %c0_i32_0 = arith.constant 0 : i32
    return %arg0, %c0_i32 : i32, i32
  }
}

</mosaic_0001>

<bundles_post_ra>
// kernel: tpu_custom_call.1
= control target key start
LH: loop header
LB: loop body
LE: loop exit
PB: predicated region body
PF: predicated region fallthrough
CT: control target
= control target key end

     0   :  { %s10022_s0 = inlined_call_operand.vmem [shape: s32[16,256], index: 0, kind: input, shape index: {}]   ;;  %s10023_s1 = inlined_call_operand.hbm [shape: f32[16,256], index: 1, kind: input, shape index: {}]   ;;  %s10024_s2 = inlined_call_operand.hbm [shape: s32[16,256], index: 2, kind: input, shape index: {}]   ;;  %s10025_s3 = inlined_call_operand.hbm [shape: f32[16,256], index: 3, kind: input, shape index: {}]   ;;  %s10026_s4 = inlined_call_operand.vmem [shape: f32[16,1], index: 4, kind: input, shape index: {}]   ;;  %s10027_s5 = inlined_call_operand.vmem [shape: f32[16,1], index: 5, kind: input, shape index: {}]   ;;  %s10028_s6 = inlined_call_operand.hbm [shape: f32[16,128], index: 6, kind: input, shape index: {}]   ;;  %s10029_s7 = inlined_call_operand.hbm [shape: f32[16,128], index: 7, kind: input, shape index: {}]   ;;  %s10030_s8 = inlined_call_operand.hbm [shape: bf16[128,128], index: 8, kind: input, shape index: {}]   ;;  %s10031_s9 = inlined_call_operand.hbm [shape: bf16[128,128], index: 9, kind: input, shape index: {}]   ;;  %s10032_s10 = inlined_call_operand.hbm [shape: f32[128,128], index: 10, kind: input, shape index: {}]   ;;  %s10033_s11 = inlined_call_operand.vmem [shape: f32[1,128], index: 11, kind: input, shape index: {}]   ;;  %s10034_s12 = inlined_call_operand.hbm [shape: f32[128,128], index: 12, kind: input, shape index: {}]   ;;  %s10035_s13 = inlined_call_operand.vmem [shape: f32[1,128], index: 13, kind: input, shape index: {}]   ;;  %s10036_s14 = inlined_call_operand.hbm [shape: f32[128,128], index: 14, kind: input, shape index: {}]   ;;  %s10037_s15 = inlined_call_operand.hbm [shape: f32[128,128], index: 15, kind: input, shape index: {}]   ;;  %s10038_s16 = inlined_call_operand.vmem [shape: f32[1,128], index: 16, kind: input, shape index: {}]   ;;  %s10039_s17 = inlined_call_operand.hbm [shape: f32[128,128], index: 17, kind: input, shape index: {}]   ;;  %s10040_s18 = inlined_call_operand.hbm [shape: f32[128,128], index: 18, kind: input, shape index: {}]   ;;  %s10041_s19 = inlined_call_operand.hbm [shape: f32[128,128], index: 19, kind: input, shape index: {}]   ;;  %s10042_s20 = inlined_call_operand.vmem [shape: f32[1,128], index: 20, kind: input, shape index: {}]   ;;  %s10043_s21 = inlined_call_operand.hbm [shape: f32[16,128], index: 21, kind: output, shape index: {}]  }
   0x1   :  { %10114 = sst [smem:[#allocation226_spill]] %s10022_s0 }
   0x2   :  { %10115 = sst [smem:[#allocation227_spill]] %s10023_s1 }
   0x3   :  { %10116 = sst [smem:[#allocation228_spill]] %s10024_s2 }
   0x4   :  { %10117 = sst [smem:[#allocation229_spill]] %s10025_s3 }
   0x5   :  { %10118 = sst [smem:[#allocation230_spill]] %s10026_s4 }
   0x6   :  { %10119 = sst [smem:[#allocation231_spill]] %s10027_s5 }
   0x7   :  { %10120 = sst [smem:[#allocation232_spill]] %s10028_s6 }
   0x8   :  { %10121 = sst [smem:[#allocation233_spill]] %s10029_s7 }
   0x9   :  { %10122 = sst [smem:[#allocation234_spill]] %s10030_s8 }
   0xa   :  { %10123 = sst [smem:[#allocation235_spill]] %s10031_s9 }
   0xb   :  { %10124 = sst [smem:[#allocation236_spill]] %s10032_s10 }
   0xc   :  { %10125 = sst [smem:[#allocation237_spill]] %s10033_s11 }
   0xd   :  { %10126 = sst [smem:[#allocation238_spill]] %s10035_s13 }
   0xe   :  { %10127 = sst [smem:[#allocation239_spill]] %s10036_s14 }
   0xf   :  { %10128 = sst [smem:[#allocation240_spill]] %s10038_s16 }
  0x10   :  { %10129 = sst [smem:[#allocation241_spill]] %s10039_s17 }
  0x11   :  { %10130 = sst [smem:[#allocation242_spill]] %s10041_s19 }
  0x12   :  { %10131 = sst [smem:[#allocation243_spill]] %s10042_s20 }
  0x13   :  { %10132 = sst [smem:[#allocation244_spill]] %s10043_s21 }
  0x14   :  { %26 = vsyncpa [#allocation5], 0 }
  0x15   :  { %28 = vsyncpa [#allocation5 + $0x1], 0 }
  0x16   :  { %29 = vsyncpa [#allocation8], 0 }
  0x17   :  { %31 = vsyncpa [#allocation8 + $0x1], 0 }
  0x18   :  { %32 = vsyncpa [#allocation11], 0 }
  0x19   :  { %34 = vsyncpa [#allocation11 + $0x1], 0 }
  0x1a   :  { %35 = vsyncpa [#allocation14], 0 }
  0x1b   :  { %36 = vsyncpa [#allocation17], 0 }
  0x1c   :  { %37 = vsyncpa [#allocation20], 0 }
  0x1d   :  { %38 = vsyncpa [#allocation23], 0 }
  0x1e   :  { %39 = vsyncpa [#allocation26], 0 }
  0x1f   :  { %40 = vsyncpa [#allocation6], 0 }
  0x20   :  { %42 = vsyncpa [#allocation6 + $0x1], 0  ;;  %s7272_s2 = smov 0   ;;  %s7274_s25 = smov 0  }
  0x21   :  { %s7276_s26 = smov 0   ;;  %s7278_s27 = smov 0  }
  0x22   :  { %s7280_s3 = smov 0   ;;  %s7282_s28 = smov 0  }
  0x23   :  { %s7284_s29 = smov 0   ;;  %s7286_s0 = smov 0  }
  0x24   :  { %s7288_s4 = smov 0   ;;  %s7290_s30 = smov 0  }
  0x25   :  { %s7292_s5 = smov 0  }
  0x26 LB: > { %10133 = sst [smem:[#allocation37_spill]] %s7105_s2  ;;  %s7328_s22 = sadd.s32 4294967295, %s7145_s5   ;;  %s7145_s5 = sphi %s7292_s5, %s48_s5   ;;  %s7141_s30 = sphi %s7290_s30, %s10693_s30   ;;  %s7137_s4 = sphi %s7288_s4, %s10692_s4   ;;  %s7133_s0 = sphi %s7286_s0, %s10691_s0   ;;  %s7129_s29 = sphi %s7284_s29, %s10690_s29   ;;  %s7125_s28 = sphi %s7282_s28, %s10696_s28   ;;  %s7121_s3 = sphi %s7280_s3, %s10695_s3   ;;  %s7117_s27 = sphi %s7278_s27, %s10694_s27   ;;  %s7113_s26 = sphi %s7276_s26, %s10688_s26   ;;  %s7109_s25 = sphi %s7274_s25, %s10687_s25   ;;  %s7105_s2 = sphi %s7272_s2, %s10686_s2  }
  0x27   : > { %10134 = sst [smem:[#allocation38_spill]] %s7109_s25  ;;  %p5791_p0 = scmp.ge.s32.totalorder %s7145_s5, 1 }
  0x28   : > { %10135 = sst [smem:[#allocation39_spill]] %s7113_s26  ;;  %p111_p1 = scmp.eq.s32.totalorder %s7328_s22, 0 }
  0x29   : > { %10136 = sst [smem:[#allocation40_spill]] %s7129_s29  ;;  %p580_p2 = scmp.lt.s32.totalorder %s7145_s5, 5 }
  0x2a   : > { %10137 = sst [smem:[#allocation41_spill]] %s7133_s0  ;;  %s7147_s20 = smov [#allocation13]  }
  0x2b   : > { %10138 = sst [smem:[#allocation42_spill]] %s7137_s4  ;;  %p7336_p3 = pnand %p5791_p0, %p580_p2 }
  0x2c   : > { %10139 = sst [smem:[#allocation43_spill]] %s7141_s30  ;;  %s593_s13 = sshll.u32 %s7147_s20, 4  ;;  %s594_s13 = int_to_ptr.vmem [resolvable:$true] %s593_s13 }
  0x2d   : > { %10140 = sst [smem:[#allocation44_spill]] %s7328_s22  ;;  %p5967_p4 = pneg %p7336_p3 }
  0x2e   : > { %s10141_s8 = sld [smem:[#allocation234_spill]]  ;;  %s10048_s1 = smov 64  }
  0x2f   : > { %s10142_s21 = scalar_select %p7336_p3, 1, 0 }
  0x30   : > { %p7344_p5 = pnand %p5967_p4, %p111_p1  ;;  %s10145_s10 = sld [smem:[#allocation236_spill]] }
  0x31   : > { %10143 = sst [smem:[#allocation45_spill]] %s10142_s21  ;;  %s7150_s20 = smov [#allocation16]  }
  0x32   : > { %s621_s0 = sshll.u32 %s7150_s20, 4  ;;  %s10050_s21 = smov 128   ;;  %s622_s0 = int_to_ptr.vmem [resolvable:$true] %s621_s0 }
  0x33   : > { %s10052_s16 = smov 8   ;;  %s10146_s14 = sld [smem:[#allocation239_spill]] }
  0x34   : > { %s591_s24 = sshll.u32 %s10141_s8, 4  ;;  %s10049_s8 = smov 4   ;;  %s592_s24 = int_to_ptr.hbm [resolvable:$true] %s591_s24 }
  0x35   : > { %5970 = dma.hbm_to_vmem [thread:$0]  (!%p7344_p5), %s592_s24, 1024, %s594_s13, [#allocation14], %s10048_s1, %s10048_s1, %s10049_s8  }
  0x36   : > { %s619_s23 = sshll.u32 %s10145_s10, 4  ;;  %s7153_s13 = smov [#allocation19]   ;;  %s620_s23 = int_to_ptr.hbm [resolvable:$true] %s619_s23 }
  0x37   : > { %5976 = dma.hbm_to_vmem [thread:$0]  (!%p7344_p5), %s620_s23, 2048, %s622_s0, [#allocation17], %s10050_s21, %s10050_s21, %s10052_s16  }
  0x38   : > { %s655_s24 = sshll.u32 %s7153_s13, 4  ;;  %s10147_s17 = sld [smem:[#allocation241_spill]]  ;;  %s656_s24 = int_to_ptr.vmem [resolvable:$true] %s655_s24 }
  0x39   : > { %s653_s19 = sshll.u32 %s10146_s14, 4  ;;  %s7154_s10 = smov [#allocation22]   ;;  %s654_s19 = int_to_ptr.hbm [resolvable:$true] %s653_s19 }
  0x3a   : > { %5982 = dma.hbm_to_vmem [thread:$0]  (!%p7344_p5), %s654_s19, 2048, %s656_s24, [#allocation20], %s10050_s21, %s10050_s21, %s10052_s16  }
  0x3b   : > { %s686_s0 = sshll.u32 %s7154_s10, 4  ;;  %s57_s23 = sadd.s32 1, %s7137_s4  ;;  %s687_s0 = int_to_ptr.vmem [resolvable:$true] %s686_s0 }
  0x3c   : > { %s60_s1 = sadd.s32 1, %s7141_s30  ;;  %p58_p6 = scmp.ge.s32.totalorder %s57_s23, 2 }
  0x3d   : > { %s97_s19 = sadd.s32 1, %s7125_s28  ;;  %p104_p7 = scmp.ne.s32.totalorder %s7125_s28, %s7121_s3 }
  0x3e   : > { %s684_s8 = sshll.u32 %s10147_s17, 4  ;;  %p105_p8 = scmp.eq.s32.totalorder %s7145_s5, 0  ;;  %s685_s8 = int_to_ptr.hbm [resolvable:$true] %s684_s8 }
  0x3f   : > { %5988 = dma.hbm_to_vmem [thread:$0]  (!%p7344_p5), %s685_s8, 2048, %s687_s0, [#allocation23], %s10050_s21, %s10050_s21, %s10052_s16  }
  0x40   : > { %s10698_s23 = smov (%p58_p6, %s57_s23), 0  ;;  %s10700_s1 = smov (!%p58_p6, %s60_s1), %s7141_s30 }
  0x41   : > { %10148 = sst [smem:[#allocation46_spill]] %s10698_s23  ;;  %s93_s29 = ssub.s32 %s7137_s4, %s10698_s23 }
  0x42   : > { %p7390_p9 = por %p105_p8, %p104_p7  ;;  %p62_p10 = scmp.ge.s32.totalorder %s10700_s1, 2 }
  0x43   : > { %p110_p11 = scmp.ne.s32.totalorder %s7121_s3, %s7117_s27  ;;  %p10058_p12 = scmp.lt.s32.totalorder %s7145_s5, 4 }
  0x44   : > { %s10054_s13 = sand.u32 1, %s7125_s28   ;;  %s10702_s1 = smov (%p62_p10, %s10700_s1), 0 }
  0x45   : > { %10150 = sst [smem:[#allocation47_spill]] %s10702_s1  ;;  %p7402_p13 = por %p111_p1, %p110_p11 }
  0x46   : > { %s7408_s20 = sshll.u32 %s10054_s13, 3  ;;  %s92_s10 = ssub.s32 %s7141_s30, %s10702_s1 }
  0x47   : > { %s5803_s0 = sshll.u32 %s7141_s30, 1  ;;  %s94_s21 = sor.u32 %s93_s29, %s92_s10 }
  0x48   : > { %p229_p0 = scmp.eq.s32.totalorder %s92_s10, 0  ;;  %p95_p2 = scmp.eq.s32.totalorder %s94_s21, 0 }
  0x49   : > { %s750_s27 = sadd.s32 %s7137_s4, %s5803_s0  ;;  %p7420_p4 = pnand %p10058_p12, %p7390_p9 }
  0x4a   : > { %s7414_s16 = sshll.u32 %s750_s27, 3  ;;  %s10059_s21 = sand.u32 1, %s7145_s5  }
  0x4b   : > { %s7425_s29 = scalar_select %p95_p2, %s7125_s28, %s97_s19  }
  0x4c   : > { %s10154_s17 = sld [smem:[#allocation228_spill]]  ;;  %s767_s8 = scalar_lea.vmem [#allocation7], %s7408_s20 }
  0x4d   : > { %10153 = sst [smem:[#allocation48_spill]] %s7425_s29  ;;  %s777_s1 = sshll.u32 %s767_s8, 4  ;;  %s778_s1 = int_to_ptr.vmem [resolvable:$true] %s777_s1 }
  0x4e   : > { %s7435_s4 = scalar_lea.sflag [#allocation8], %s10059_s21  ;;  %s5790_s19 = sadd.s32 4294967294, %s7145_s5  }
  0x4f   : > { %s231_s29 = sadd.s32 1, %s7113_s26  ;;  %p238_p6 = scmp.ne.s32.totalorder %s7113_s26, %s7109_s25 }
  0x50   : > { %s7446_s14 = scalar_select %p229_p0, %s7113_s26, %s231_s29  }
  0x51   : > { %p7450_p7 = por %p238_p6, %p105_p8  ;;  %p244_p9 = scmp.ne.s32.totalorder %s7109_s25, %s7105_s2 }
  0x52   : > { %s773_s27 = scalar_lea.hbm %s10154_s17, %s7414_s16  ;;  %10155 = sst [smem:[#allocation49_spill]] %s7446_s14 }
  0x53   : > { %s775_s23 = sshll.u32 %s773_s27, 4  ;;  %p567_p10 = scmp.eq.s32.totalorder %s7328_s22, 3  ;;  %s776_s23 = int_to_ptr.hbm [resolvable:$true] %s775_s23 }
  0x54   : > { %6001 = dma.hbm_to_vmem [thread:$0]  (!%p7420_p4), %s776_s23, 128, %s778_s1, %s7435_s4  }
  0x55   : > { %p573_p11 = scmp.eq.s32.totalorder %s5790_s19, 3  ;;  %p7459_p2 = por %p244_p9, %p111_p1 }
  0x56   : > { %p7463_p12 = por %p567_p10, %p238_p6  ;;  %s821_s29 = sand.u32 1, %s7113_s26  }
  0x57   : > { %s10157_s23 = scalar_select %p7459_p2, 1, 0 }
  0x58   : > { %s10159_s1 = scalar_select %p7463_p12, 1, 0 }
  0x59   : > { %10158 = sst [smem:[#allocation50_spill]] %s10157_s23  ;;  %p7467_p0 = por %p573_p11, %p244_p9 }
  0x5a   : > { %10160 = sst [smem:[#allocation51_spill]] %s10159_s1  ;;  %s5812_s0 = sshll.u32 %s7141_s30, 3 }
  0x5b   : > { %s10161_s10 = scalar_select %p7467_p0, 1, 0 }
  0x5c   : > { %s7473_s27 = sshll.u32 %s821_s29, 3  ;;  %s10163_s6 = sld [smem:[#allocation232_spill]] }
  0x5d   : > { %10162 = sst [smem:[#allocation52_spill]] %s10161_s10  ;;  %s823_s2 = scalar_lea.vmem [#allocation10], %s7473_s27 }
  0x5e   : > { %s831_s23 = sshll.u32 %s823_s2, 4  ;;  %p10164_p8 = scmp.lt.s32.totalorder %s7145_s5, 4  ;;  %s832_s23 = int_to_ptr.vmem [resolvable:$true] %s831_s23 }
  0x5f   : > { %s10166_s7 = sld [smem:[#allocation233_spill]]  ;;  %s7155_s17 = smov [#allocation15]  }
  0x60   : > { %p7483_p6 = pnand %p10164_p8, %p7450_p7  ;;  %s10167_s9 = sld [smem:[#allocation235_spill]] }
  0x61   : > { %s607_s10 = sshll.u32 %s7155_s17, 4  ;;  %s636_s30 = sshll.u32 %s10034_s12, 4  ;;  %s608_s10 = int_to_ptr.vmem [resolvable:$true] %s607_s10  ;;  %s637_s30 = int_to_ptr.hbm [resolvable:$true] %s636_s30 }
  0x62   : > { %s827_s21 = scalar_lea.hbm %s10163_s6, %s5812_s0  ;;  %s10168_s6 = sand.u32 1, %s7145_s5  }
  0x63   : > { %s829_s14 = sshll.u32 %s827_s21, 4  ;;  %s7497_s2 = scalar_lea.sflag [#allocation11], %s10168_s6  ;;  %s830_s14 = int_to_ptr.hbm [resolvable:$true] %s829_s14 }
  0x64   : > { %6007 = dma.hbm_to_vmem [thread:$0]  (!%p7483_p6), %s830_s14, 128, %s832_s23, %s7497_s2  }
  0x65   : > { %s7490_s26 = scalar_lea.hbm %s10166_s7, %s5812_s0  ;;  %s10169_s0 = smov 4  }
  0x66   : > { %s605_s21 = sshll.u32 %s10167_s9, 4  ;;  %s10170_s29 = smov 64   ;;  %s606_s21 = int_to_ptr.hbm [resolvable:$true] %s605_s21 }
  0x67   : > { %5973 = dma.hbm_to_vmem [thread:$0]  (!%p7344_p5), %s606_s21, 1024, %s608_s10, [#allocation14], %s10170_s29, %s10170_s29, %s10169_s0  }
  0x68   : > { %s667_s19 = sshll.u32 %s10037_s15, 4  ;;  %s7156_s14 = smov [#allocation18]   ;;  %s668_s19 = int_to_ptr.hbm [resolvable:$true] %s667_s19 }
  0x69   : > { %s638_s23 = sshll.u32 %s7156_s14, 4  ;;  %s10171_s25 = smov 8   ;;  %s639_s23 = int_to_ptr.vmem [resolvable:$true] %s638_s23 }
  0x6a   : > { %s10172_s22 = smov 128   ;;  %s7157_s17 = smov [#allocation21]  }
  0x6b   : > { %5979 = dma.hbm_to_vmem [thread:$0]  (!%p7344_p5), %s637_s30, 2048, %s639_s23, [#allocation17], %s10172_s22, %s10172_s22, %s10171_s25  }
  0x6c   : > { %s669_s7 = sshll.u32 %s7157_s17, 4  ;;  %s698_s21 = sshll.u32 %s10040_s18, 4  ;;  %s670_s7 = int_to_ptr.vmem [resolvable:$true] %s669_s7  ;;  %s699_s21 = int_to_ptr.hbm [resolvable:$true] %s698_s21 }
  0x6d   : > { %5985 = dma.hbm_to_vmem [thread:$0]  (!%p7344_p5), %s668_s19, 2048, %s670_s7, [#allocation20], %s10172_s22, %s10172_s22, %s10171_s25  }
  0x6e   : > { %s10173_s6 = sld [smem:[#allocation242_spill]]  ;;  %s7158_s8 = smov [#allocation24]  }
  0x6f   : > { %s700_s14 = sshll.u32 %s7158_s8, 4  ;;  %s7159_s9 = smov [#allocation25]   ;;  %s701_s14 = int_to_ptr.vmem [resolvable:$true] %s700_s14 }
  0x70   : > { %5991 = dma.hbm_to_vmem [thread:$0]  (!%p7344_p5), %s699_s21, 2048, %s701_s14, [#allocation23], %s10172_s22, %s10172_s22, %s10171_s25  }
  0x71   : > { %s714_s23 = sshll.u32 %s7159_s9, 4  ;;  %s10174_s17 = sld [smem:[#allocation227_spill]]  ;;  %s715_s23 = int_to_ptr.vmem [resolvable:$true] %s714_s23 }
  0x72   : > { %s746_s0 = scalar_lea.vmem [#allocation4], %s7408_s20  ;;  %s10175_s11 = sand.u32 1, %s7125_s28  }
  0x73   : > { %s756_s29 = sshll.u32 %s746_s0, 4  ;;  %s743_s21 = scalar_lea.sflag [#allocation5], %s10175_s11  ;;  %s757_s29 = int_to_ptr.vmem [resolvable:$true] %s756_s29 }
  0x74   : > { %s712_s30 = sshll.u32 %s10173_s6, 4  ;;  %s788_s14 = scalar_lea.vmem [#allocation9], %s7408_s20  ;;  %s713_s30 = int_to_ptr.hbm [resolvable:$true] %s712_s30 }
  0x75   : > { %5994 = dma.hbm_to_vmem [thread:$0]  (!%p7344_p5), %s713_s30, 2048, %s715_s23, [#allocation26], %s10172_s22, %s10172_s22, %s10171_s25  }
  0x76   : > { %s10176_s22 = sld [smem:[#allocation229_spill]]  ;;  %s798_s9 = sshll.u32 %s788_s14, 4  ;;  %s799_s9 = int_to_ptr.vmem [resolvable:$true] %s798_s9 }
  0x77   : > { %s752_s10 = scalar_lea.hbm %s10174_s17, %s7414_s16  ;;  %s848_s7 = sshll.u32 %s7490_s26, 4  ;;  %s849_s7 = int_to_ptr.hbm [resolvable:$true] %s848_s7 }
  0x78   : > { %s754_s6 = sshll.u32 %s752_s10, 4  ;;  %s842_s19 = scalar_lea.vmem [#allocation12], %s7473_s27  ;;  %s755_s6 = int_to_ptr.hbm [resolvable:$true] %s754_s6 }
  0x79   : > { %5998 = dma.hbm_to_vmem [thread:$0]  (!%p7420_p4), %s755_s6, 128, %s757_s29, %s743_s21  }
  0x7a   : > { %s850_s17 = sshll.u32 %s842_s19, 4  ;;  %859 = sbr.rel (%p7336_p3) target bundleno = 4056 (0xfd8), region = 104  ;;  %s851_s17 = int_to_ptr.vmem [resolvable:$true] %s850_s17 }
  0x7b   : > { %6010 = dma.hbm_to_vmem [thread:$0]  (!%p7483_p6), %s849_s7, 128, %s851_s17, %s7497_s2  }
  0x7c   : > { %s794_s30 = scalar_lea.hbm %s10176_s22, %s7414_s16 }
  0x7d   : > { %s796_s23 = sshll.u32 %s794_s30, 4  ;;  %s797_s23 = int_to_ptr.hbm [resolvable:$true] %s796_s23 }
  0x7e   : > { %6004 = dma.hbm_to_vmem [thread:$0]  (!%p7420_p4), %s797_s23, 128, %s799_s9, %s7435_s4  }
  0x7f   : > { %s861_s16 = sand.u32 1, %s7121_s3  }
  0x80   : > { %s7564_s20 = sshll.u32 %s861_s16, 3  ;;  %s862_s0 = scalar_lea.sflag [#allocation5], %s861_s16 }
  0x81   : > { %s865_s29 = scalar_lea.vmem [#allocation4], %s7564_s20 }
  0x82   : > { %7068 = dma.done.wait (%p7402_p13), %s862_s0, 128  }
  0x83   : > { %7070 = vsyncadd (%p7402_p13), %s862_s0, 4294967168  ;;  %s10178_s26 = sld [smem:[#allocation44_spill]]  ;;  %s875_s1 = scalar_lea.vmem [#allocation7], %s7564_s20 }
  0x89   : > { %s871_s4 = sand.u32 1, %s10178_s26  }
  0x8a   : > { %s872_s13 = scalar_lea.sflag [#allocation8], %s871_s4 }
  0x8b   : > { %7072 = dma.done.wait (%p7402_p13), %s872_s13, 256  }
  0x8c   : > { %7074 = vsyncadd (%p7402_p13), %s872_s13, 4294967040  ;;  %s10179_s27 = sld [smem:[#allocation38_spill]]  ;;  %s885_s21 = scalar_lea.vmem [#allocation9], %s7564_s20 }
  0x8d   : > { %s892_s8 = scalar_lea.sflag [#allocation11], %s871_s4 }
  0x92   : > { %s10072_s6 = sand.u32 1, %s10179_s27  }
  0x93   : > { %s7580_s11 = sshll.u32 %s10072_s6, 3 }
  0x94   : > { %7076 = dma.done.wait (%p7459_p2), %s892_s8, 256  }
  0x95   : > { %7078 = vsyncadd (%p7459_p2), %s892_s8, 4294967040 }
  0x96   : > { %7080 = dma.done.wait (%p111_p1), [#allocation14], 2048  }
  0x97   : > { %7082 = vsyncadd (%p111_p1), [#allocation14], 4294965248 }
  0x98   : > { %7084 = dma.done.wait (%p111_p1), [#allocation17], 4096  }
  0x99   : > { %7086 = vsyncadd (%p111_p1), [#allocation17], 4294963200 }
  0x9a   : > { %7088 = dma.done.wait (%p111_p1), [#allocation20], 4096  }
  0x9b   : > { %7090 = vsyncadd (%p111_p1), [#allocation20], 4294963200 }
  0x9c   : > { %7092 = dma.done.wait (%p111_p1), [#allocation23], 4096  }
  0x9d   : > { %7094 = vsyncadd (%p111_p1), [#allocation23], 4294963200 }
  0x9e   : > { %7096 = dma.done.wait (%p111_p1), [#allocation26], 2048  }
  0x9f   : > { %7098 = vsyncadd (%p111_p1), [#allocation26], 4294965248  ;;  %s10181_s22 = sld [smem:[#allocation41_spill]]  ;;  %s1045_s24 = scalar_lea.vmem [#allocation27], %s7580_s11 }
  0xa0   : > { %s10182_s30 = sld [smem:[#allocation40_spill]] }
  0xa1   : > { %s10183_s10 = sld [smem:[#allocation230_spill]] }
  0xa2   : > { %s10184_s13 = sld [smem:[#allocation231_spill]] }
  0xa3   : > { %s10185_s6 = sld [smem:[#allocation226_spill]] }
  0xa5   : > { %p1046_p3 = scmp.lt.s32.totalorder %s10181_s22, 1 }
  0xa6   : > { %p1048_p5 = scmp.lt.s32.totalorder %s10182_s30, 1  ;;  %p5835_p1 = scmp.ne.s32.totalorder %s10182_s30, 0 }
  0xa7   : > { %s10704_s22 = smov (!%p1046_p3, %s10181_s22), 1 }
  0xa8   : > { %s1049_s14 = scalar_select %p1048_p5, %s10182_s30, 1 }
  0xa9   : > { %s5831_s9 = sshll.u32 %s10704_s22, 1  ;;  %s5833_s23 = sshll.u32 %s10704_s22, 3 }
  0xaa   : > { %s1051_s7 = sadd.s32 %s5831_s9, %s1049_s14  ;;  %s7616_s16 = scalar_lea.vmem %s10183_s10, %s5833_s23 }
  0xab   : > { %s5832_s0 = sshll.u32 %s1051_s7, 3  ;;  %s7621_s27 = scalar_lea.vmem %s10184_s13, %s5833_s23 }
  0xac   : > { %s1053_s25 = scalar_lea.vmem %s10185_s6, %s5832_s0  ;;  %1065 = sbr.rel (%p5835_p1) target bundleno = 180 (0xb4), region = 164 }
  0xb1   : > { %v7160_v0 = vmov 0.0  }
  0xb2   : > { %1066 = vst [vmem:[#allocation2] sm:$0xff] %v7160_v0 }
  0xb3   : > { %1067 = vst [vmem:[#allocation3] sm:$0xff] %v7160_v0 }
  0xb4 PF: > { %v10073_v1 = vlaneseq  ;;  %v7643_v6 = vld [vmem:[%s1053_s25] sm:$0xff]  ;;  %v7671_v12 = vld [vmem:[%s865_s29] sm:$0xff]  ;;  %s10671_s20 = sld [smem:[#allocation40_spill]] }
  0xb5   : > { %v7646_v7 = vperm.slane %v7643_v6, 0  ;;  %v7658_v10 = vperm.slane %v7643_v6, 2  ;;  %v7664_v11 = vperm.slane %v7643_v6, 7  ;;  %v7680_v15 = vperm.slane %v7671_v12, 4  ;;  %v7687_v16 = vld [vmem:[%s875_s1] sm:$0xff]  ;;  %v7709_v21 = vld [vmem:[%s885_s21] sm:$0xff] }
  0xb6   : > { %v7629_v2 = vshrl.u32 %v10073_v1, 7  ;;  %v7690_v17 = vperm.slane %v7687_v16, 1  ;;  %v7702_v20 = vperm.slane %v7687_v16, 6  ;;  %v7712_v22 = vperm.slane %v7709_v21, 3 }
  0xb7   : > { %10186 = vst [vmem:[#allocation53_spill] sm:$0xff] %v7680_v15  ;;  %v7745_v27 = vperm.slane %v7643_v6, 1  ;;  %v7791_v32 = vperm.slane %v7643_v6, 3  ;;  %v7799_v34 = vperm.slane %v7671_v12, 0  ;;  %v7807_v36 = vperm.slane %v7671_v12, 5 }
  0xb8   : > { %v7632_v3 = vadd.s32 32, %v7629_v2  ;;  %v7635_v4 = vadd.s32 16, %v7629_v2  ;;  %v7638_v5 = vadd.s32 8, %v7629_v2  ;;  %v7652_v8 = vadd.s32 40, %v7629_v2  ;;  %10187 = vst [vmem:[#allocation54_spill] sm:$0xff] %v7690_v17 }
  0xb9   : > { %v7655_v9 = vadd.s32 24, %v7629_v2  ;;  %v7674_v13 = vadd.s32 56, %v7629_v2  ;;  %v7677_v14 = vadd.s32 48, %v7629_v2  ;;  %v7696_v18 = vadd.s32 80, %v7629_v2  ;;  %10188 = vst [vmem:[#allocation55_spill] sm:$0xff] %v7702_v20 }
  0xba   : > { %6141 = vset.pattern.permute.xlu2 %v7632_v3  ;;  %6139 = vset.pattern.permute.xlu1 %v7635_v4  ;;  %v7699_v19 = vadd.s32 72, %v7629_v2  ;;  %10189 = vst [vmem:[#allocation56_spill] sm:$0xff] %v7712_v22  ;;  %v7718_v23 = vadd.s32 96, %v7629_v2  ;;  %v7721_v24 = vadd.s32 88, %v7629_v2  ;;  %v7730_v25 = vadd.s32 120, %v7629_v2  ;;  %p5836_p13 = scmp.ne.s32.totalorder %s10671_s20, 1 }
  0xbb   : > { %6138 = vset.pattern.permute.xlu0 %v7638_v5  ;;  %v7733_v26 = vadd.s32 112, %v7629_v2  ;;  %v7763_v28 = vadd.s32 64, %v7629_v2  ;;  %v7778_v29 = vadd.s32 104, %v7629_v2  ;;  %10193 = vst [vmem:[#allocation60_spill] sm:$0xff] %v7807_v36  ;;  %v7815_v38 = vperm.slane %v7687_v16, 2  ;;  %s10672_s29 = scalar_lea.vmem (!%p5836_p13), [#allocation12], %s7580_s11 }
  0xbc   : > { %v7821_v39 = vperm.slane %v7687_v16, 7  ;;  %v7829_v41 = vperm.slane %v7709_v21, 4  ;;  %v7934_v60 = vperm.slane %v7643_v6, 4  ;;  %v7945_v62 = vperm.slane %v7671_v12, 1  ;;  %s10673_s1 = scalar_lea.vmem (!%p5836_p13), [#allocation10], %s7580_s11  ;;  %s10674_s25 = sld [smem:[#allocation240_spill]] (!%p5836_p13) }
  0xbd   : > { %10195 = vst [vmem:[#allocation62_spill] sm:$0xff] %v7815_v38  ;;  %v7953_v0 = vperm.slane %v7671_v12, 6  ;;  %s10675_s14 = sld [smem:[#allocation237_spill]] (!%p5836_p13) }
  0xbe   : > { %10196 = vst [vmem:[#allocation63_spill] sm:$0xff] %v7821_v39  ;;  %s10676_s7 = sld [smem:[#allocation238_spill]] (!%p5836_p13) }
  0xbf   : > { %10198 = vst [vmem:[#allocation65_spill] sm:$0xff] %v7829_v41  ;;  %s10677_s10 = sld [smem:[#allocation243_spill]] (!%p5836_p13) }
  0xc0   : > { %10217 = vst [vmem:[#allocation84_spill] sm:$0xff] %v7953_v0 }
  0xc2   : > { %1101 = vperm.xlu2 %6141, %v7646_v7   ;;  %1089 = vperm.xlu1 %6139, %v7646_v7  }
  0xc3   : > { %1083 = vperm.xlu0 %6138, %v7646_v7  }
  0xca   : > { %6142 = vset.pattern.permute.xlu2 %v7652_v8  ;;  %6140 = vset.pattern.permute.xlu1 %v7655_v9 }
  0xcb   : > { %1277 = vperm.xlu0 %6138, %v7658_v10  }
  0xd2   : > { %1107 = vperm.xlu2 %6142, %v7646_v7   ;;  %1095 = vperm.xlu1 %6140, %v7646_v7  }
  0xd3   : > { %1762 = vperm.xlu0 %6138, %v7664_v11  }
  0xda   : > { %6144 = vset.pattern.permute.xlu2 %v7674_v13  ;;  %6143 = vset.pattern.permute.xlu1 %v7677_v14 }
  0xdb   : > { %2375 = vperm.xlu0 %6138, %v7680_v15  }
  0xe2   : > { %1119 = vperm.xlu2 %6144, %v7646_v7   ;;  %1113 = vperm.xlu1 %6143, %v7646_v7  }
  0xe3   : > { %3184 = vperm.xlu0 %6138, %v7690_v17  }
  0xea   : > { %6146 = vset.pattern.permute.xlu2 %v7696_v18  ;;  %6145 = vset.pattern.permute.xlu1 %v7699_v19 }
  0xeb   : > { %3669 = vperm.xlu0 %6138, %v7702_v20  }
  0xf2   : > { %1137 = vperm.xlu2 %6146, %v7646_v7   ;;  %1131 = vperm.xlu1 %6145, %v7646_v7  }
  0xf3   : > { %4282 = vperm.xlu0 %6138, %v7712_v22  }
  0xfa   : > { %6148 = vset.pattern.permute.xlu2 %v7718_v23  ;;  %6147 = vset.pattern.permute.xlu1 %v7721_v24 }
  0xfb   : > { %6485 = vset.pattern.permute.xlu0 %v7677_v14 }
 0x102   : > { %1149 = vperm.xlu2 %6148, %v7646_v7   ;;  %1143 = vperm.xlu1 %6147, %v7646_v7  }
 0x103   : > { %1307 = vperm.xlu0 %6485, %v7658_v10  }
 0x10a   : > { %6150 = vset.pattern.permute.xlu2 %v7730_v25  ;;  %6149 = vset.pattern.permute.xlu1 %v7733_v26 }
 0x10b   : > { %1792 = vperm.xlu0 %6485, %v7664_v11  }
 0x112   : > { %1167 = vperm.xlu2 %6150, %v7646_v7   ;;  %1161 = vperm.xlu1 %6149, %v7646_v7  }
 0x113   : > { %2405 = vperm.xlu0 %6485, %v7680_v15  }
 0x11a   : > { %6152 = vset.pattern.permute.xlu2 %v7638_v5  ;;  %6151 = vset.pattern.permute.xlu1 %v7629_v2 }
 0x11b   : > { %3214 = vperm.xlu0 %6485, %v7690_v17  }
 0x122   : > { %1180 = vperm.xlu2 %6152, %v7745_v27   ;;  %1174 = vperm.xlu1 %6151, %v7745_v27  }
 0x123   : > { %3699 = vperm.xlu0 %6485, %v7702_v20  }
 0x12a   : > { %6154 = vset.pattern.permute.xlu2 %v7632_v3  ;;  %6153 = vset.pattern.permute.xlu1 %v7655_v9 }
 0x12b   : > { %4312 = vperm.xlu0 %6485, %v7712_v22  }
 0x132   : > { %1198 = vperm.xlu2 %6154, %v7745_v27   ;;  %1192 = vperm.xlu1 %6153, %v7745_v27  }
 0x133   : > { %6490 = vset.pattern.permute.xlu0 %v7721_v24 }
 0x135   : > { %v7780_v30 = vpop.permute.xlu0 %1083 }
 0x13a   : > { %6156 = vset.pattern.permute.xlu2 %v7677_v14  ;;  %6155 = vset.pattern.permute.xlu1 %v7652_v8 }
 0x13b   : > { %1337 = vperm.xlu0 %6490, %v7658_v10  }
 0x13d   : > { %v7785_v31 = vpop.permute.xlu0 %1277 }
 0x13e   : > { %10190 = vst [vmem:[#allocation57_spill] sm:$0xff] %v7785_v31 }
 0x142   : > { %1210 = vperm.xlu2 %6156, %v7745_v27   ;;  %1204 = vperm.xlu1 %6155, %v7745_v27  }
 0x143   : > { %1822 = vperm.xlu0 %6490, %v7664_v11  }
 0x145   : > { %v7795_v33 = vpop.permute.xlu0 %1762 }
 0x146   : > { %10191 = vst [vmem:[#allocation58_spill] sm:$0xff] %v7795_v33  ;;  %v8098_v33 = vperm.slane %v7687_v16, 4 }
 0x148   : > { %10239 = vst [vmem:[#allocation106_spill] sm:$0xff] %v8098_v33 }
 0x14a   : > { %6158 = vset.pattern.permute.xlu2 %v7699_v19  ;;  %6157 = vset.pattern.permute.xlu1 %v7763_v28 }
 0x14b   : > { %2435 = vperm.xlu0 %6490, %v7680_v15  }
 0x14d   : > { %v7804_v35 = vpop.permute.xlu0 %2375 }
 0x14e   : > { %10192 = vst [vmem:[#allocation59_spill] sm:$0xff] %v7804_v35 }
 0x152   : > { %1228 = vperm.xlu2 %6158, %v7745_v27   ;;  %1222 = vperm.xlu1 %6157, %v7745_v27  }
 0x153   : > { %3244 = vperm.xlu0 %6490, %v7690_v17  }
 0x155   : > { %v7812_v37 = vpop.permute.xlu0 %3184 }
 0x156   : > { %10194 = vst [vmem:[#allocation61_spill] sm:$0xff] %v7812_v37 }
 0x15a   : > { %6160 = vset.pattern.permute.xlu2 %v7721_v24  ;;  %6159 = vset.pattern.permute.xlu1 %v7696_v18 }
 0x15b   : > { %3729 = vperm.xlu0 %6490, %v7702_v20  }
 0x15d   : > { %v7823_v40 = vpop.permute.xlu0 %3669 }
 0x15e   : > { %10197 = vst [vmem:[#allocation64_spill] sm:$0xff] %v7823_v40 }
 0x162   : > { %1240 = vperm.xlu2 %6160, %v7745_v27   ;;  %1234 = vperm.xlu1 %6159, %v7745_v27  }
 0x163   : > { %4342 = vperm.xlu0 %6490, %v7712_v22  }
 0x165   : > { %v7833_v42 = vpop.permute.xlu0 %4282 }
 0x166   : > { %10199 = vst [vmem:[#allocation66_spill] sm:$0xff] %v7833_v42 }
 0x16a   : > { %6162 = vset.pattern.permute.xlu2 %v7733_v26  ;;  %6161 = vset.pattern.permute.xlu1 %v7778_v29 }
 0x16b   : > { %6495 = vset.pattern.permute.xlu0 %v7629_v2 }
 0x172   : > { %1258 = vperm.xlu2 %6162, %v7745_v27   ;;  %1252 = vperm.xlu1 %6161, %v7745_v27  }
 0x173   : > { %1077 = vperm.xlu0 %6495, %v7646_v7  }
 0x175   : > { %v7839_v43 = vpop.permute.xlu0 %1307 }
 0x176   : > { %10200 = vst [vmem:[#allocation67_spill] sm:$0xff] %v7839_v43 }
 0x17a   : > { %6164 = vset.pattern.permute.xlu2 %v7629_v2  ;;  %6163 = vset.pattern.permute.xlu1 %v7730_v25 }
 0x17b   : > { %1368 = vperm.xlu0 %6495, %v7791_v32  }
 0x17d   : > { %v7844_v44 = vpop.permute.xlu0 %1792 }
 0x17e   : > { %10201 = vst [vmem:[#allocation68_spill] sm:$0xff] %v7844_v44 }
 0x182   : > { %1271 = vperm.xlu2 %6164, %v7658_v10   ;;  %1264 = vperm.xlu1 %6163, %v7745_v27  }
 0x183   : > { %1981 = vperm.xlu0 %6495, %v7799_v34  }
 0x185   : > { %v7849_v45 = vpop.permute.xlu0 %2405 }
 0x186   : > { %10202 = vst [vmem:[#allocation69_spill] sm:$0xff] %v7849_v45 }
 0x18a   : > { %6166 = vset.pattern.permute.xlu2 %v7655_v9  ;;  %6165 = vset.pattern.permute.xlu1 %v7635_v4 }
 0x18b   : > { %2466 = vperm.xlu0 %6495, %v7807_v36  }
 0x18d   : > { %v7856_v46 = vpop.permute.xlu0 %3214 }
 0x18e   : > { %10203 = vst [vmem:[#allocation70_spill] sm:$0xff] %v7856_v46 }
 0x192   : > { %1289 = vperm.xlu2 %6166, %v7658_v10   ;;  %1283 = vperm.xlu1 %6165, %v7658_v10  }
 0x193   : > { %3275 = vperm.xlu0 %6495, %v7815_v38  }
 0x195   : > { %v7862_v47 = vpop.permute.xlu0 %3699 }
 0x196   : > { %10204 = vst [vmem:[#allocation71_spill] sm:$0xff] %v7862_v47  ;;  %v7977_v47 = vperm.slane %v7709_v21, 5 }
 0x198   : > { %10222 = vst [vmem:[#allocation89_spill] sm:$0xff] %v7977_v47 }
 0x19a   : > { %6168 = vset.pattern.permute.xlu2 %v7652_v8  ;;  %6167 = vset.pattern.permute.xlu1 %v7632_v3 }
 0x19b   : > { %3760 = vperm.xlu0 %6495, %v7821_v39  }
 0x19d   : > { %v7867_v48 = vpop.permute.xlu0 %4312 }
 0x19e   : > { %10205 = vst [vmem:[#allocation72_spill] sm:$0xff] %v7867_v48  ;;  %v8006_v48 = vperm.slane %v7643_v6, 5 }
 0x1a2   : > { %1301 = vperm.xlu2 %6168, %v7658_v10   ;;  %1295 = vperm.xlu1 %6167, %v7658_v10  }
 0x1a3   : > { %4373 = vperm.xlu0 %6495, %v7829_v41  }
 0x1aa   : > { %6170 = vset.pattern.permute.xlu2 %v7763_v28  ;;  %6169 = vset.pattern.permute.xlu1 %v7674_v13 }
 0x1ab   : > { %6500 = vset.pattern.permute.xlu0 %v7652_v8 }
 0x1ad   : > { %v7872_v49 = vpop.permute.xlu0 %1337 }
 0x1ae   : > { %10206 = vst [vmem:[#allocation73_spill] sm:$0xff] %v7872_v49 }
 0x1b2   : > { %1319 = vperm.xlu2 %6170, %v7658_v10   ;;  %1313 = vperm.xlu1 %6169, %v7658_v10  }
 0x1b3   : > { %1398 = vperm.xlu0 %6500, %v7791_v32  }
 0x1b5   : > { %v7879_v50 = vpop.permute.xlu0 %1822 }
 0x1b6   : > { %10207 = vst [vmem:[#allocation74_spill] sm:$0xff] %v7879_v50  ;;  %v8088_v50 = vperm.slane %v7671_v12, 7 }
 0x1b8   : > { %10237 = vst [vmem:[#allocation104_spill] sm:$0xff] %v8088_v50 }
 0x1ba   : > { %6172 = vset.pattern.permute.xlu2 %v7696_v18  ;;  %6171 = vset.pattern.permute.xlu1 %v7699_v19 }
 0x1bb   : > { %2011 = vperm.xlu0 %6500, %v7799_v34  }
 0x1bd   : > { %v7885_v51 = vpop.permute.xlu0 %2435 }
 0x1be   : > { %10208 = vst [vmem:[#allocation75_spill] sm:$0xff] %v7885_v51 }
 0x1c2   : > { %1331 = vperm.xlu2 %6172, %v7658_v10   ;;  %1325 = vperm.xlu1 %6171, %v7658_v10  }
 0x1c3   : > { %2496 = vperm.xlu0 %6500, %v7807_v36  }
 0x1c5   : > { %v7890_v52 = vpop.permute.xlu0 %3244 }
 0x1c6   : > { %10209 = vst [vmem:[#allocation76_spill] sm:$0xff] %v7890_v52 }
 0x1ca   : > { %6174 = vset.pattern.permute.xlu2 %v7778_v29  ;;  %6173 = vset.pattern.permute.xlu1 %v7718_v23 }
 0x1cb   : > { %3305 = vperm.xlu0 %6500, %v7815_v38  }
 0x1cd   : > { %v7895_v53 = vpop.permute.xlu0 %3729 }
 0x1ce   : > { %10210 = vst [vmem:[#allocation77_spill] sm:$0xff] %v7895_v53 }
 0x1d2   : > { %1349 = vperm.xlu2 %6174, %v7658_v10   ;;  %1343 = vperm.xlu1 %6173, %v7658_v10  }
 0x1d3   : > { %3790 = vperm.xlu0 %6500, %v7821_v39  }
 0x1d5   : > { %v7902_v54 = vpop.permute.xlu0 %4342 }
 0x1d6   : > { %10211 = vst [vmem:[#allocation78_spill] sm:$0xff] %v7902_v54 }
 0x1da   : > { %6176 = vset.pattern.permute.xlu2 %v7730_v25  ;;  %6175 = vset.pattern.permute.xlu1 %v7733_v26 }
 0x1db   : > { %4403 = vperm.xlu0 %6500, %v7829_v41  }
 0x1e2   : > { %1361 = vperm.xlu2 %6176, %v7658_v10   ;;  %1355 = vperm.xlu1 %6175, %v7658_v10  }
 0x1e3   : > { %6505 = vset.pattern.permute.xlu0 %v7696_v18 }
 0x1e5   : > { %v7908_v55 = vpop.permute.xlu0 %1077 }
 0x1ea   : > { %6178 = vset.pattern.permute.xlu2 %v7635_v4  ;;  %6177 = vset.pattern.permute.xlu1 %v7638_v5 }
 0x1eb   : > { %1428 = vperm.xlu0 %6505, %v7791_v32  }
 0x1ed   : > { %v7913_v56 = vpop.permute.xlu0 %1368 }
 0x1ee   : > { %10212 = vst [vmem:[#allocation79_spill] sm:$0xff] %v7913_v56 }
 0x1f2   : > { %1380 = vperm.xlu2 %6178, %v7791_v32   ;;  %1374 = vperm.xlu1 %6177, %v7791_v32  }
 0x1f3   : > { %2041 = vperm.xlu0 %6505, %v7799_v34  }
 0x1f5   : > { %v7918_v57 = vpop.permute.xlu0 %1981 }
 0x1fa   : > { %6180 = vset.pattern.permute.xlu2 %v7632_v3  ;;  %6179 = vset.pattern.permute.xlu1 %v7655_v9 }
 0x1fb   : > { %2526 = vperm.xlu0 %6505, %v7807_v36  }
 0x1fd   : > { %v7925_v58 = vpop.permute.xlu0 %2466 }
 0x1fe   : > { %10213 = vst [vmem:[#allocation80_spill] sm:$0xff] %v7925_v58  ;;  %v8113_v58 = vperm.slane %v7709_v21, 1 }
 0x200   : > { %10242 = vst [vmem:[#allocation109_spill] sm:$0xff] %v8113_v58 }
 0x202   : > { %1392 = vperm.xlu2 %6180, %v7791_v32   ;;  %1386 = vperm.xlu1 %6179, %v7791_v32  }
 0x203   : > { %3335 = vperm.xlu0 %6505, %v7815_v38  }
 0x205   : > { %v7931_v59 = vpop.permute.xlu0 %3275 }
 0x206   : > { %10214 = vst [vmem:[#allocation81_spill] sm:$0xff] %v7931_v59 }
 0x20a   : > { %6182 = vset.pattern.permute.xlu2 %v7674_v13  ;;  %6181 = vset.pattern.permute.xlu1 %v7677_v14 }
 0x20b   : > { %3820 = vperm.xlu0 %6505, %v7821_v39  }
 0x20d   : > { %v7939_v61 = vpop.permute.xlu0 %3760 }
 0x20e   : > { %10215 = vst [vmem:[#allocation82_spill] sm:$0xff] %v7939_v61  ;;  %v7969_v61 = vperm.slane %v7709_v21, 0 }
 0x210   : > { %10220 = vst [vmem:[#allocation87_spill] sm:$0xff] %v7969_v61 }
 0x212   : > { %1410 = vperm.xlu2 %6182, %v7791_v32   ;;  %1404 = vperm.xlu1 %6181, %v7791_v32  }
 0x213   : > { %4433 = vperm.xlu0 %6505, %v7829_v41  }
 0x215   : > { %v7947_v63 = vpop.permute.xlu0 %4373 }
 0x216   : > { %10216 = vst [vmem:[#allocation83_spill] sm:$0xff] %v7947_v63 }
 0x21a   : > { %6184 = vset.pattern.permute.xlu2 %v7699_v19  ;;  %6183 = vset.pattern.permute.xlu1 %v7763_v28 }
 0x21b   : > { %6510 = vset.pattern.permute.xlu0 %v7730_v25 }
 0x222   : > { %1422 = vperm.xlu2 %6184, %v7791_v32   ;;  %1416 = vperm.xlu1 %6183, %v7791_v32  }
 0x223   : > { %1458 = vperm.xlu0 %6510, %v7791_v32  }
 0x225   : > { %v7957_v10 = vpop.permute.xlu0 %1398 }
 0x226   : > { %10218 = vst [vmem:[#allocation85_spill] sm:$0xff] %v7957_v10 }
 0x22a   : > { %6186 = vset.pattern.permute.xlu2 %v7718_v23  ;;  %6185 = vset.pattern.permute.xlu1 %v7721_v24 }
 0x22b   : > { %2071 = vperm.xlu0 %6510, %v7799_v34  }
 0x22d   : > { %v7966_v1 = vpop.permute.xlu0 %2011 }
 0x232   : > { %1440 = vperm.xlu2 %6186, %v7791_v32   ;;  %1434 = vperm.xlu1 %6185, %v7791_v32  }
 0x233   : > { %2556 = vperm.xlu0 %6510, %v7807_v36  }
 0x235   : > { %v7974_v53 = vpop.permute.xlu0 %2496 }
 0x236   : > { %10221 = vst [vmem:[#allocation88_spill] sm:$0xff] %v7974_v53  ;;  %v8110_v53 = vperm.slane %v7643_v6, 6 }
 0x23a   : > { %6188 = vset.pattern.permute.xlu2 %v7733_v26  ;;  %6187 = vset.pattern.permute.xlu1 %v7778_v29 }
 0x23b   : > { %3365 = vperm.xlu0 %6510, %v7815_v38  }
 0x23d   : > { %v7982_v40 = vpop.permute.xlu0 %3305 }
 0x23e   : > { %10223 = vst [vmem:[#allocation90_spill] sm:$0xff] %v7982_v40 }
 0x242   : > { %1452 = vperm.xlu2 %6188, %v7791_v32   ;;  %1446 = vperm.xlu1 %6187, %v7791_v32   ;;  %v7961_v32 = vperm.slane %v7687_v16, 3 }
 0x243   : > { %3850 = vperm.xlu0 %6510, %v7821_v39  }
 0x244   : > { %10219 = vst [vmem:[#allocation86_spill] sm:$0xff] %v7961_v32 }
 0x245   : > { %v7987_v63 = vpop.permute.xlu0 %3790 }
 0x246   : > { %10224 = vst [vmem:[#allocation91_spill] sm:$0xff] %v7987_v63 }
 0x24a   : > { %6190 = vset.pattern.permute.xlu2 %v7638_v5  ;;  %6189 = vset.pattern.permute.xlu1 %v7629_v2 }
 0x24b   : > { %4463 = vperm.xlu0 %6510, %v7829_v41  }
 0x24d   : > { %v7994_v54 = vpop.permute.xlu0 %4403 }
 0x24e   : > { %10225 = vst [vmem:[#allocation92_spill] sm:$0xff] %v7994_v54 }
 0x252   : > { %1471 = vperm.xlu2 %6190, %v7934_v60   ;;  %1465 = vperm.xlu1 %6189, %v7934_v60  }
 0x253   : > { %6515 = vset.pattern.permute.xlu0 %v7632_v3 }
 0x25a   : > { %6192 = vset.pattern.permute.xlu2 %v7655_v9  ;;  %6191 = vset.pattern.permute.xlu1 %v7635_v4 }
 0x25b   : > { %1489 = vperm.xlu0 %6515, %v7934_v60  }
 0x25d   : > { %v8000_v63 = vpop.permute.xlu0 %1428 }
 0x25e   : > { %10226 = vst [vmem:[#allocation93_spill] sm:$0xff] %v8000_v63 }
 0x262   : > { %1483 = vperm.xlu2 %6192, %v7934_v60   ;;  %1477 = vperm.xlu1 %6191, %v7934_v60  }
 0x263   : > { %2102 = vperm.xlu0 %6515, %v7945_v62  }
 0x265   : > { %v8008_v54 = vpop.permute.xlu0 %2041 }
 0x26a   : > { %6194 = vset.pattern.permute.xlu2 %v7677_v14  ;;  %6193 = vset.pattern.permute.xlu1 %v7652_v8 }
 0x26b   : > { %2587 = vperm.xlu0 %6515, %v7953_v0  }
 0x26d   : > { %v8013_v42 = vpop.permute.xlu0 %2526 }
 0x26e   : > { %10227 = vst [vmem:[#allocation94_spill] sm:$0xff] %v8013_v42 }
 0x272   : > { %1501 = vperm.xlu2 %6194, %v7934_v60   ;;  %1495 = vperm.xlu1 %6193, %v7934_v60  }
 0x273   : > { %3396 = vperm.xlu0 %6515, %v7961_v32  }
 0x275   : > { %v8018_v41 = vpop.permute.xlu0 %3335 }
 0x276   : > { %10228 = vst [vmem:[#allocation95_spill] sm:$0xff] %v8018_v41 }
 0x27a   : > { %6196 = vset.pattern.permute.xlu2 %v7763_v28  ;;  %6195 = vset.pattern.permute.xlu1 %v7674_v13 }
 0x27b   : > { %4009 = vperm.xlu0 %6515, %v7969_v61  }
 0x27d   : > { %v8025_v40 = vpop.permute.xlu0 %3820 }
 0x27e   : > { %10229 = vst [vmem:[#allocation96_spill] sm:$0xff] %v8025_v40  ;;  %v8046_v40 = vpop.permute.xlu2 %1101 }
 0x282   : > { %1513 = vperm.xlu2 %6196, %v7934_v60   ;;  %1507 = vperm.xlu1 %6195, %v7934_v60  }
 0x283   : > { %4494 = vperm.xlu0 %6515, %v7977_v47  }
 0x285   : > { %v8031_v41 = vpop.permute.xlu0 %4433 }
 0x286   : > { %10230 = vst [vmem:[#allocation97_spill] sm:$0xff] %v8031_v41  ;;  %v8048_v41 = vpop.permute.xlu1 %1089  ;;  %v8055_v52 = vpop.permute.xlu2 %1107 }
 0x28a   : > { %6198 = vset.pattern.permute.xlu2 %v7721_v24  ;;  %6197 = vset.pattern.permute.xlu1 %v7696_v18 }
 0x28b   : > { %6520 = vset.pattern.permute.xlu0 %v7699_v19 }
 0x28e   : > { %v8057_v46 = vpop.permute.xlu1 %1095 }
 0x292   : > { %1531 = vperm.xlu2 %6198, %v7934_v60   ;;  %1525 = vperm.xlu1 %6197, %v7934_v60  }
 0x293   : > { %1519 = vperm.xlu0 %6520, %v7934_v60  }
 0x295   : > { %v8036_v59 = vpop.permute.xlu0 %1458 }
 0x296   : > { %10231 = vst [vmem:[#allocation98_spill] sm:$0xff] %v8036_v59  ;;  %v8066_v39 = vpop.permute.xlu1 %1113 }
 0x29a   : > { %6200 = vset.pattern.permute.xlu2 %v7778_v29  ;;  %6199 = vset.pattern.permute.xlu1 %v7718_v23 }
 0x29b   : > { %2132 = vperm.xlu0 %6520, %v7945_v62  }
 0x2a2   : > { %1543 = vperm.xlu2 %6200, %v7934_v60   ;;  %1537 = vperm.xlu1 %6199, %v7934_v60  }
 0x2a3   : > { %2617 = vperm.xlu0 %6520, %v7953_v0  }
 0x2aa   : > { %6202 = vset.pattern.permute.xlu2 %v7629_v2  ;;  %6201 = vset.pattern.permute.xlu1 %v7730_v25 }
 0x2ab   : > { %3426 = vperm.xlu0 %6520, %v7961_v32  }
 0x2b2   : > { %1562 = vperm.xlu2 %6202, %v8006_v48   ;;  %1555 = vperm.xlu1 %6201, %v7934_v60  }
 0x2b3   : > { %4039 = vperm.xlu0 %6520, %v7969_v61  }
 0x2ba   : > { %6204 = vset.pattern.permute.xlu2 %v7635_v4  ;;  %6203 = vset.pattern.permute.xlu1 %v7638_v5 }
 0x2bb   : > { %4524 = vperm.xlu0 %6520, %v7977_v47  }
 0x2c2   : > { %1574 = vperm.xlu2 %6204, %v8006_v48   ;;  %1568 = vperm.xlu1 %6203, %v8006_v48  }
 0x2c3   : > { %6525 = vset.pattern.permute.xlu0 %v7733_v26 }
 0x2ca   : > { %6206 = vset.pattern.permute.xlu2 %v7652_v8  ;;  %6205 = vset.pattern.permute.xlu1 %v7632_v3 }
 0x2cb   : > { %1549 = vperm.xlu0 %6525, %v7934_v60   ;;  %v8041_v60 = vpop.permute.xlu0 %2071 }
 0x2cc   : > { %10232 = vst [vmem:[#allocation99_spill] sm:$0xff] %v8041_v60 }
 0x2d2   : > { %1592 = vperm.xlu2 %6206, %v8006_v48   ;;  %1586 = vperm.xlu1 %6205, %v8006_v48  }
 0x2d3   : > { %2162 = vperm.xlu0 %6525, %v7945_v62   ;;  %v8050_v22 = vpop.permute.xlu0 %2556 }
 0x2d4   : > { %10233 = vst [vmem:[#allocation100_spill] sm:$0xff] %v8050_v22 }
 0x2da   : > { %6208 = vset.pattern.permute.xlu2 %v7674_v13  ;;  %6207 = vset.pattern.permute.xlu1 %v7677_v14 }
 0x2db   : > { %2647 = vperm.xlu0 %6525, %v7953_v0   ;;  %v8061_v37 = vpop.permute.xlu0 %3365 }
 0x2dc   : > { %10234 = vst [vmem:[#allocation101_spill] sm:$0xff] %v8061_v37  ;;  %v8078_v37 = vpop.permute.xlu1 %1131 }
 0x2e2   : > { %1604 = vperm.xlu2 %6208, %v8006_v48   ;;  %1598 = vperm.xlu1 %6207, %v8006_v48  }
 0x2e3   : > { %3456 = vperm.xlu0 %6525, %v7961_v32   ;;  %v8076_v32 = vperm.slane %v7671_v12, 2 }
 0x2ea   : > { %6210 = vset.pattern.permute.xlu2 %v7696_v18  ;;  %6209 = vset.pattern.permute.xlu1 %v7699_v19 }
 0x2eb   : > { %4069 = vperm.xlu0 %6525, %v7969_v61   ;;  %v8064_v61 = vpop.permute.xlu2 %1119 }
 0x2f2   : > { %1622 = vperm.xlu2 %6210, %v8006_v48   ;;  %1616 = vperm.xlu1 %6209, %v8006_v48  }
 0x2f3   : > { %4554 = vperm.xlu0 %6525, %v7977_v47   ;;  %v8071_v47 = vpop.permute.xlu0 %3850  ;;  %v8073_v20 = vpop.permute.xlu2 %1137 }
 0x2f4   : > { %10235 = vst [vmem:[#allocation102_spill] sm:$0xff] %v8071_v47  ;;  %v8090_v47 = vpop.permute.xlu1 %1143 }
 0x2fa   : > { %6212 = vset.pattern.permute.xlu2 %v7718_v23  ;;  %6211 = vset.pattern.permute.xlu1 %v7721_v24 }
 0x2fb   : > { %6530 = vset.pattern.permute.xlu0 %v7655_v9  ;;  %v8083_v38 = vpop.permute.xlu2 %1149  ;;  %v8085_v17 = vpop.permute.xlu0 %4463 }
 0x2fc   : > { %10236 = vst [vmem:[#allocation103_spill] sm:$0xff] %v8085_v17  ;;  %v8100_v22 = vpop.permute.xlu1 %1161 }
 0x2fd   : > { %10240 = vst [vmem:[#allocation107_spill] sm:$0xff] %v8100_v22 }
 0x302   : > { %1634 = vperm.xlu2 %6212, %v8006_v48   ;;  %1628 = vperm.xlu1 %6211, %v8006_v48  }
 0x303   : > { %1580 = vperm.xlu0 %6530, %v8006_v48   ;;  %v8095_v44 = vpop.permute.xlu2 %1167  ;;  %v8102_v42 = vpop.permute.xlu0 %1489 }
 0x304   : > { %10238 = vst [vmem:[#allocation105_spill] sm:$0xff] %v8095_v44  ;;  %v8115_v0 = vpop.permute.xlu1 %1174 }
 0x305   : > { %10241 = vst [vmem:[#allocation108_spill] sm:$0xff] %v8102_v42  ;;  %v8125_v42 = vperm.slane %v7709_v21, 6 }
 0x307   : > { %10243 = vst [vmem:[#allocation110_spill] sm:$0xff] %v8125_v42 }
 0x30a   : > { %6214 = vset.pattern.permute.xlu2 %v7730_v25  ;;  %6213 = vset.pattern.permute.xlu1 %v7733_v26 }
 0x30b   : > { %2193 = vperm.xlu0 %6530, %v8076_v32   ;;  %v8107_v17 = vpop.permute.xlu2 %1180  ;;  %v8119_v51 = vpop.permute.xlu0 %2102 }
 0x30c   : > { %v8127_v6 = vpop.permute.xlu1 %1192 }
 0x312   : > { %1652 = vperm.xlu2 %6214, %v8006_v48   ;;  %1646 = vperm.xlu1 %6213, %v8006_v48  }
 0x313   : > { %2678 = vperm.xlu0 %6530, %v8088_v50   ;;  %v8122_v45 = vpop.permute.xlu2 %1198  ;;  %v8131_v35 = vpop.permute.xlu0 %2587 }
 0x314   : > { %10244 = vst [vmem:[#allocation111_spill] sm:$0xff] %v8131_v35  ;;  %v8136_v59 = vpop.permute.xlu1 %1204 }
 0x31a   : > { %6216 = vset.pattern.permute.xlu2 %v7638_v5  ;;  %6215 = vset.pattern.permute.xlu1 %v7629_v2 }
 0x31b   : > { %3487 = vperm.xlu0 %6530, %v8098_v33   ;;  %v8134_v36 = vpop.permute.xlu2 %1210  ;;  %v8141_v63 = vpop.permute.xlu0 %3396 }
 0x31c   : > { %10245 = vst [vmem:[#allocation112_spill] sm:$0xff] %v8141_v63  ;;  %v8145_v56 = vpop.permute.xlu1 %1222 }
 0x322   : > { %1665 = vperm.xlu2 %6216, %v8110_v53   ;;  %1659 = vperm.xlu1 %6215, %v8110_v53  }
 0x323   : > { %4100 = vperm.xlu0 %6530, %v8113_v58   ;;  %v8143_v10 = vpop.permute.xlu2 %1228  ;;  %v8152_v15 = vpop.permute.xlu0 %4009 }
 0x324   : > { %10246 = vst [vmem:[#allocation113_spill] sm:$0xff] %v8152_v15  ;;  %v8154_v49 = vpop.permute.xlu1 %1234 }
 0x32a   : > { %6218 = vset.pattern.permute.xlu2 %v7632_v3  ;;  %6217 = vset.pattern.permute.xlu1 %v7655_v9 }
 0x32b   : > { %4585 = vperm.xlu0 %6530, %v8125_v42   ;;  %v8150_v35 = vpop.permute.xlu2 %1240  ;;  %v8163_v31 = vpop.permute.xlu0 %4494 }
 0x32c   : > { %v8161_v43 = vpop.permute.xlu1 %1252  ;;  %10249 = vst [vmem:[#allocation116_spill] sm:$0xff] %v8163_v31 }
 0x32d   : > { %10248 = vst [vmem:[#allocation115_spill] sm:$0xff] %v8161_v43 }
 0x332   : > { %1683 = vperm.xlu2 %6218, %v8110_v53   ;;  %1677 = vperm.xlu1 %6217, %v8110_v53  }
 0x333   : > { %6535 = vset.pattern.permute.xlu0 %v7763_v28  ;;  %v8159_v63 = vpop.permute.xlu2 %1258  ;;  %v8174_v44 = vpop.permute.xlu0 %1519 }
 0x334   : > { %10247 = vst [vmem:[#allocation114_spill] sm:$0xff] %v8159_v63  ;;  %v8170_v60 = vpop.permute.xlu1 %1264 }
 0x335   : > { %10251 = vst [vmem:[#allocation118_spill] sm:$0xff] %v8170_v60 }
 0x336   : > { %10252 = vst [vmem:[#allocation119_spill] sm:$0xff] %v8174_v44 }
 0x33a   : > { %6220 = vset.pattern.permute.xlu2 %v7677_v14  ;;  %6219 = vset.pattern.permute.xlu1 %v7652_v8 }
 0x33b   : > { %1125 = vperm.xlu0 %6535, %v7646_v7   ;;  %v8168_v15 = vpop.permute.xlu2 %1271 }
 0x33c   : > { %10250 = vst [vmem:[#allocation117_spill] sm:$0xff] %v8168_v15  ;;  %v8179_v31 = vpop.permute.xlu1 %1283  ;;  %v8184_v15 = vpop.permute.xlu0 %2132 }
 0x33d   : > { %10254 = vst [vmem:[#allocation121_spill] sm:$0xff] %v8179_v31 }
 0x342   : > { %1695 = vperm.xlu2 %6220, %v8110_v53   ;;  %1689 = vperm.xlu1 %6219, %v8110_v53  }
 0x343   : > { %1610 = vperm.xlu0 %6535, %v8006_v48   ;;  %v8177_v63 = vpop.permute.xlu2 %1289 }
 0x344   : > { %10253 = vst [vmem:[#allocation120_spill] sm:$0xff] %v8177_v63  ;;  %v8188_v43 = vpop.permute.xlu1 %1295  ;;  %v8193_v44 = vpop.permute.xlu0 %2617 }
 0x345   : > { %10256 = vst [vmem:[#allocation123_spill] sm:$0xff] %v8188_v43 }
 0x346   : > { %10257 = vst [vmem:[#allocation124_spill] sm:$0xff] %v8193_v44 }
 0x34a   : > { %6222 = vset.pattern.permute.xlu2 %v7699_v19  ;;  %6221 = vset.pattern.permute.xlu1 %v7763_v28 }
 0x34b   : > { %2223 = vperm.xlu0 %6535, %v8076_v32   ;;  %v8186_v60 = vpop.permute.xlu2 %1301 }
 0x34c   : > { %10255 = vst [vmem:[#allocation122_spill] sm:$0xff] %v8186_v60  ;;  %v8197_v31 = vpop.permute.xlu1 %1313  ;;  %v8204_v43 = vpop.permute.xlu0 %3426 }
 0x34d   : > { %10259 = vst [vmem:[#allocation126_spill] sm:$0xff] %v8197_v31 }
 0x34e   : > { %10261 = vst [vmem:[#allocation128_spill] sm:$0xff] %v8204_v43 }
 0x352   : > { %1713 = vperm.xlu2 %6222, %v8110_v53   ;;  %1707 = vperm.xlu1 %6221, %v8110_v53  }
 0x353   : > { %2708 = vperm.xlu0 %6535, %v8088_v50   ;;  %v8195_v63 = vpop.permute.xlu2 %1319 }
 0x354   : > { %10258 = vst [vmem:[#allocation125_spill] sm:$0xff] %v8195_v63  ;;  %v8206_v22 = vpop.permute.xlu1 %1325  ;;  %v8215_v31 = vpop.permute.xlu0 %4039 }
 0x355   : > { %10262 = vst [vmem:[#allocation129_spill] sm:$0xff] %v8206_v22 }
 0x356   : > { %10264 = vst [vmem:[#allocation131_spill] sm:$0xff] %v8215_v31 }
 0x35a   : > { %6224 = vset.pattern.permute.xlu2 %v7721_v24  ;;  %6223 = vset.pattern.permute.xlu1 %v7696_v18 }
 0x35b   : > { %3517 = vperm.xlu0 %6535, %v8098_v33   ;;  %v8202_v60 = vpop.permute.xlu2 %1331 }
 0x35c   : > { %10260 = vst [vmem:[#allocation127_spill] sm:$0xff] %v8202_v60  ;;  %v8213_v63 = vpop.permute.xlu1 %1343  ;;  %v8226_v22 = vpop.permute.xlu0 %4524 }
 0x35d   : > { %10267 = vst [vmem:[#allocation134_spill] sm:$0xff] %v8226_v22 }
 0x362   : > { %1725 = vperm.xlu2 %6224, %v8110_v53   ;;  %1719 = vperm.xlu1 %6223, %v8110_v53  }
 0x363   : > { %4130 = vperm.xlu0 %6535, %v8113_v58   ;;  %v8211_v44 = vpop.permute.xlu2 %1349 }
 0x364   : > { %10263 = vst [vmem:[#allocation130_spill] sm:$0xff] %v8211_v44  ;;  %v8222_v60 = vpop.permute.xlu1 %1355 }
 0x365   : > { %10266 = vst [vmem:[#allocation133_spill] sm:$0xff] %v8222_v60 }
 0x36a   : > { %6226 = vset.pattern.permute.xlu2 %v7733_v26  ;;  %6225 = vset.pattern.permute.xlu1 %v7778_v29 }
 0x36b   : > { %4615 = vperm.xlu0 %6535, %v8125_v42   ;;  %v8220_v43 = vpop.permute.xlu2 %1361 }
 0x36c   : > { %10265 = vst [vmem:[#allocation132_spill] sm:$0xff] %v8220_v43  ;;  %v8231_v31 = vpop.permute.xlu1 %1374 }
 0x36d   : > { %10269 = vst [vmem:[#allocation136_spill] sm:$0xff] %v8231_v31 }
 0x372   : > { %1743 = vperm.xlu2 %6226, %v8110_v53   ;;  %1737 = vperm.xlu1 %6225, %v8110_v53  }
 0x373   : > { %6540 = vset.pattern.permute.xlu0 %v7778_v29  ;;  %v8229_v44 = vpop.permute.xlu2 %1380 }
 0x374   : > { %10268 = vst [vmem:[#allocation135_spill] sm:$0xff] %v8229_v44  ;;  %v8240_v60 = vpop.permute.xlu1 %1386 }
 0x375   : > { %10272 = vst [vmem:[#allocation139_spill] sm:$0xff] %v8240_v60 }
 0x37a   : > { %6228 = vset.pattern.permute.xlu2 %v7629_v2  ;;  %6227 = vset.pattern.permute.xlu1 %v7730_v25 }
 0x37b   : > { %1155 = vperm.xlu0 %6540, %v7646_v7   ;;  %v8236_v7 = vpop.permute.xlu0 %1549  ;;  %v8238_v43 = vpop.permute.xlu2 %1392 }
 0x37c   : > { %10270 = vst [vmem:[#allocation137_spill] sm:$0xff] %v8236_v7  ;;  %v8249_v44 = vpop.permute.xlu1 %1404 }
 0x37d   : > { %10271 = vst [vmem:[#allocation138_spill] sm:$0xff] %v8238_v43 }
 0x37e   : > { %10274 = vst [vmem:[#allocation141_spill] sm:$0xff] %v8249_v44 }
 0x382   : > { %1756 = vperm.xlu2 %6228, %v7664_v11   ;;  %1749 = vperm.xlu1 %6227, %v8110_v53  }
 0x383   : > { %1640 = vperm.xlu0 %6540, %v8006_v48   ;;  %v8245_v48 = vpop.permute.xlu2 %1410  ;;  %v8247_v22 = vpop.permute.xlu0 %2162 }
 0x384   : > { %10273 = vst [vmem:[#allocation140_spill] sm:$0xff] %v8245_v48  ;;  %v8258_v60 = vpop.permute.xlu1 %1416 }
 0x385   : > { %10277 = vst [vmem:[#allocation144_spill] sm:$0xff] %v8258_v60 }
 0x38a   : > { %6230 = vset.pattern.permute.xlu2 %v7655_v9  ;;  %6229 = vset.pattern.permute.xlu1 %v7635_v4 }
 0x38b   : > { %2253 = vperm.xlu0 %6540, %v8076_v32   ;;  %v8254_v7 = vpop.permute.xlu2 %1422  ;;  %v8256_v43 = vpop.permute.xlu0 %2647 }
 0x38c   : > { %10275 = vst [vmem:[#allocation142_spill] sm:$0xff] %v8254_v7  ;;  %v8265_v48 = vpop.permute.xlu1 %1434  ;;  %v8336_v7 = vperm.slane %v7709_v21, 2 }
 0x38d   : > { %10276 = vst [vmem:[#allocation143_spill] sm:$0xff] %v8256_v43 }
 0x38e   : > { %10279 = vst [vmem:[#allocation146_spill] sm:$0xff] %v8265_v48 }
 0x38f   : > { %10300 = vst [vmem:[#allocation167_spill] sm:$0xff] %v8336_v7 }
 0x392   : > { %1774 = vperm.xlu2 %6230, %v7664_v11   ;;  %1768 = vperm.xlu1 %6229, %v7664_v11  }
 0x393   : > { %2738 = vperm.xlu0 %6540, %v8088_v50   ;;  %v8263_v50 = vpop.permute.xlu2 %1440  ;;  %v8267_v44 = vpop.permute.xlu0 %3456 }
 0x394   : > { %10278 = vst [vmem:[#allocation145_spill] sm:$0xff] %v8263_v50  ;;  %v8274_v43 = vpop.permute.xlu1 %1446 }
 0x395   : > { %10280 = vst [vmem:[#allocation147_spill] sm:$0xff] %v8267_v44 }
 0x396   : > { %10282 = vst [vmem:[#allocation149_spill] sm:$0xff] %v8274_v43 }
 0x39a   : > { %6232 = vset.pattern.permute.xlu2 %v7652_v8  ;;  %6231 = vset.pattern.permute.xlu1 %v7632_v3 }
 0x39b   : > { %3547 = vperm.xlu0 %6540, %v8098_v33   ;;  %v8272_v33 = vpop.permute.xlu2 %1452 }
 0x39c   : > { %10281 = vst [vmem:[#allocation148_spill] sm:$0xff] %v8272_v33  ;;  %v8283_v44 = vpop.permute.xlu1 %1465 }
 0x39d   : > { %10285 = vst [vmem:[#allocation152_spill] sm:$0xff] %v8283_v44  ;;  %v8302_v44 = vperm.slane %v7671_v12, 3 }
 0x3a2   : > { %1786 = vperm.xlu2 %6232, %v7664_v11   ;;  %1780 = vperm.xlu1 %6231, %v7664_v11  }
 0x3a3   : > { %4160 = vperm.xlu0 %6540, %v8113_v58   ;;  %v8278_v58 = vpop.permute.xlu0 %4069  ;;  %v8281_v50 = vpop.permute.xlu2 %1471 }
 0x3a4   : > { %10283 = vst [vmem:[#allocation150_spill] sm:$0xff] %v8278_v58  ;;  %v8292_v43 = vpop.permute.xlu1 %1477 }
 0x3a5   : > { %10284 = vst [vmem:[#allocation151_spill] sm:$0xff] %v8281_v50 }
 0x3a6   : > { %10288 = vst [vmem:[#allocation155_spill] sm:$0xff] %v8292_v43 }
 0x3aa   : > { %6234 = vset.pattern.permute.xlu2 %v7763_v28  ;;  %6233 = vset.pattern.permute.xlu1 %v7674_v13 }
 0x3ab   : > { %4645 = vperm.xlu0 %6540, %v8125_v42   ;;  %v8288_v42 = vpop.permute.xlu0 %4554  ;;  %v8290_v33 = vpop.permute.xlu2 %1483 }
 0x3ac   : > { %10286 = vst [vmem:[#allocation153_spill] sm:$0xff] %v8288_v42  ;;  %v8304_v48 = vpop.permute.xlu1 %1495 }
 0x3ad   : > { %10287 = vst [vmem:[#allocation154_spill] sm:$0xff] %v8290_v33  ;;  %v8312_v33 = vperm.slane %v7687_v16, 0 }
 0x3ae   : > { %10291 = vst [vmem:[#allocation158_spill] sm:$0xff] %v8304_v48 }
 0x3af   : > { %10293 = vst [vmem:[#allocation160_spill] sm:$0xff] %v8312_v33 }
 0x3b2   : > { %1804 = vperm.xlu2 %6234, %v7664_v11   ;;  %1798 = vperm.xlu1 %6233, %v7664_v11  }
 0x3b3   : > { %6545 = vset.pattern.permute.xlu0 %v7635_v4  ;;  %v8297_v58 = vpop.permute.xlu2 %1501  ;;  %v8299_v50 = vpop.permute.xlu0 %1580 }
 0x3b4   : > { %10289 = vst [vmem:[#allocation156_spill] sm:$0xff] %v8297_v58  ;;  %v8314_v43 = vpop.permute.xlu1 %1507 }
 0x3b5   : > { %10290 = vst [vmem:[#allocation157_spill] sm:$0xff] %v8299_v50  ;;  %v8324_v50 = vperm.slane %v7687_v16, 5 }
 0x3b6   : > { %10294 = vst [vmem:[#allocation161_spill] sm:$0xff] %v8314_v43 }
 0x3b7   : > { %10296 = vst [vmem:[#allocation163_spill] sm:$0xff] %v8324_v50 }
 0x3ba   : > { %6236 = vset.pattern.permute.xlu2 %v7696_v18  ;;  %6235 = vset.pattern.permute.xlu1 %v7699_v19 }
 0x3bb   : > { %1186 = vperm.xlu0 %6545, %v7745_v27   ;;  %v8309_v42 = vpop.permute.xlu2 %1513  ;;  %v8316_v58 = vpop.permute.xlu0 %2193 }
 0x3bc   : > { %10292 = vst [vmem:[#allocation159_spill] sm:$0xff] %v8309_v42  ;;  %v8326_v48 = vpop.permute.xlu1 %1525 }
 0x3bd   : > { %10297 = vst [vmem:[#allocation164_spill] sm:$0xff] %v8326_v48 }
 0x3c2   : > { %1816 = vperm.xlu2 %6236, %v7664_v11   ;;  %1810 = vperm.xlu1 %6235, %v7664_v11  }
 0x3c3   : > { %1671 = vperm.xlu0 %6545, %v8110_v53   ;;  %v8321_v12 = vpop.permute.xlu2 %1531  ;;  %v8328_v42 = vpop.permute.xlu0 %2678 }
 0x3c4   : > { %10295 = vst [vmem:[#allocation162_spill] sm:$0xff] %v8321_v12  ;;  %v8338_v60 = vpop.permute.xlu1 %1537  ;;  %v8348_v12 = vperm.slane %v7709_v21, 7 }
 0x3c5   : > { %10298 = vst [vmem:[#allocation165_spill] sm:$0xff] %v8328_v42 }
 0x3c6   : > { %10301 = vst [vmem:[#allocation168_spill] sm:$0xff] %v8338_v60 }
 0x3c7   : > { %10304 = vst [vmem:[#allocation171_spill] sm:$0xff] %v8348_v12 }
 0x3ca   : > { %6238 = vset.pattern.permute.xlu2 %v7778_v29  ;;  %6237 = vset.pattern.permute.xlu1 %v7718_v23 }
 0x3cb   : > { %2284 = vperm.xlu0 %6545, %v8302_v44   ;;  %v8333_v43 = vpop.permute.xlu2 %1543  ;;  %v8342_v16 = vpop.permute.xlu0 %3487 }
 0x3cc   : > { %10299 = vst [vmem:[#allocation166_spill] sm:$0xff] %v8333_v43  ;;  %v8350_v48 = vpop.permute.xlu1 %1555 }
 0x3cd   : > { %10302 = vst [vmem:[#allocation169_spill] sm:$0xff] %v8342_v16 }
 0x3ce   : > { %10305 = vst [vmem:[#allocation172_spill] sm:$0xff] %v8350_v48 }
 0x3d2   : > { %1834 = vperm.xlu2 %6238, %v7664_v11   ;;  %1828 = vperm.xlu1 %6237, %v7664_v11  }
 0x3d3   : > { %3093 = vperm.xlu0 %6545, %v8312_v33   ;;  %v8345_v42 = vpop.permute.xlu2 %1562  ;;  %v8355_v43 = vpop.permute.xlu0 %4100 }
 0x3d4   : > { %10303 = vst [vmem:[#allocation170_spill] sm:$0xff] %v8345_v42  ;;  %v8359_v16 = vpop.permute.xlu1 %1568 }
 0x3d5   : > { %10306 = vst [vmem:[#allocation173_spill] sm:$0xff] %v8355_v43 }
 0x3d6   : > { %10308 = vst [vmem:[#allocation175_spill] sm:$0xff] %v8359_v16 }
 0x3da   : > { %6240 = vset.pattern.permute.xlu2 %v7730_v25  ;;  %6239 = vset.pattern.permute.xlu1 %v7733_v26 }
 0x3db   : > { %3578 = vperm.xlu0 %6545, %v8324_v50   ;;  %v8366_v42 = vpop.permute.xlu0 %4585 }
 0x3dc   : > { %10310 = vst [vmem:[#allocation177_spill] sm:$0xff] %v8366_v42  ;;  %v8368_v48 = vpop.permute.xlu1 %1586 }
 0x3dd   : > { %10311 = vst [vmem:[#allocation178_spill] sm:$0xff] %v8368_v48 }
 0x3e2   : > { %1846 = vperm.xlu2 %6240, %v7664_v11   ;;  %1840 = vperm.xlu1 %6239, %v7664_v11   ;;  %v8357_v11 = vpop.permute.xlu2 %1574 }
 0x3e3   : > { %4191 = vperm.xlu0 %6545, %v8336_v7   ;;  %10307 = vst [vmem:[#allocation174_spill] sm:$0xff] %v8357_v11  ;;  %v8377_v16 = vpop.permute.xlu0 %1125 }
 0x3e4   : > { %v8375_v11 = vpop.permute.xlu1 %1598 }
 0x3e5   : > { %10313 = vst [vmem:[#allocation180_spill] sm:$0xff] %v8375_v11 }
 0x3ea   : > { %6242 = vset.pattern.permute.xlu2 %v7635_v4  ;;  %6241 = vset.pattern.permute.xlu1 %v7638_v5  ;;  %v8364_v21 = vpop.permute.xlu2 %1592 }
 0x3eb   : > { %4676 = vperm.xlu0 %6545, %v8348_v12   ;;  %10309 = vst [vmem:[#allocation176_spill] sm:$0xff] %v8364_v21  ;;  %v8388_v48 = vpop.permute.xlu0 %1610 }
 0x3ec   : > { %v8384_v21 = vpop.permute.xlu1 %1616  ;;  %10316 = vst [vmem:[#allocation183_spill] sm:$0xff] %v8388_v48 }
 0x3ed   : > { %10315 = vst [vmem:[#allocation182_spill] sm:$0xff] %v8384_v21 }
 0x3f2   : > { %1993 = vperm.xlu2 %6242, %v7799_v34   ;;  %1987 = vperm.xlu1 %6241, %v7799_v34   ;;  %v8373_v43 = vpop.permute.xlu2 %1604 }
 0x3f3   : > { %6550 = vset.pattern.permute.xlu0 %v7674_v13  ;;  %10312 = vst [vmem:[#allocation179_spill] sm:$0xff] %v8373_v43 }
 0x3f4   : > { %v8393_v11 = vpop.permute.xlu1 %1628 }
 0x3f5   : > { %10318 = vst [vmem:[#allocation185_spill] sm:$0xff] %v8393_v11 }
 0x3fa   : > { %6244 = vset.pattern.permute.xlu2 %v7632_v3  ;;  %6243 = vset.pattern.permute.xlu1 %v7655_v9  ;;  %v8382_v42 = vpop.permute.xlu2 %1622 }
 0x3fb   : > { %1216 = vperm.xlu0 %6550, %v7745_v27   ;;  %10314 = vst [vmem:[#allocation181_spill] sm:$0xff] %v8382_v42  ;;  %v8398_v42 = vpop.permute.xlu0 %2223 }
 0x3fc   : > { %v8402_v60 = vpop.permute.xlu1 %1646 }
 0x3fd   : > { %10320 = vst [vmem:[#allocation187_spill] sm:$0xff] %v8402_v60 }
 0x402   : > { %2005 = vperm.xlu2 %6244, %v7799_v34   ;;  %1999 = vperm.xlu1 %6243, %v7799_v34   ;;  %v8391_v43 = vpop.permute.xlu2 %1634 }
 0x403   : > { %1701 = vperm.xlu0 %6550, %v8110_v53   ;;  %10317 = vst [vmem:[#allocation184_spill] sm:$0xff] %v8391_v43  ;;  %v8407_v43 = vpop.permute.xlu0 %2708 }
 0x404   : > { %10321 = vst [vmem:[#allocation188_spill] sm:$0xff] %v8407_v43  ;;  %v8411_v48 = vpop.permute.xlu1 %1659 }
 0x405   : > { %10323 = vst [vmem:[#allocation190_spill] sm:$0xff] %v8411_v48 }
 0x40a   : > { %6246 = vset.pattern.permute.xlu2 %v7674_v13  ;;  %6245 = vset.pattern.permute.xlu1 %v7677_v14  ;;  %v8400_v21 = vpop.permute.xlu2 %1652 }
 0x40b   : > { %2314 = vperm.xlu0 %6550, %v8302_v44   ;;  %10319 = vst [vmem:[#allocation186_spill] sm:$0xff] %v8400_v21  ;;  %v8418_v60 = vpop.permute.xlu0 %3517 }
 0x40c   : > { %10325 = vst [vmem:[#allocation192_spill] sm:$0xff] %v8418_v60  ;;  %v8420_v31 = vpop.permute.xlu1 %1677 }
 0x40d   : > { %10326 = vst [vmem:[#allocation193_spill] sm:$0xff] %v8420_v31 }
 0x412   : > { %2023 = vperm.xlu2 %6246, %v7799_v34   ;;  %2017 = vperm.xlu1 %6245, %v7799_v34   ;;  %v8409_v11 = vpop.permute.xlu2 %1665 }
 0x413   : > { %3123 = vperm.xlu0 %6550, %v8312_v33   ;;  %10322 = vst [vmem:[#allocation189_spill] sm:$0xff] %v8409_v11  ;;  %v8429_v48 = vpop.permute.xlu0 %4130 }
 0x414   : > { %v8427_v11 = vpop.permute.xlu1 %1689  ;;  %10329 = vst [vmem:[#allocation196_spill] sm:$0xff] %v8429_v48 }
 0x415   : > { %10328 = vst [vmem:[#allocation195_spill] sm:$0xff] %v8427_v11 }
 0x41a   : > { %6248 = vset.pattern.permute.xlu2 %v7699_v19  ;;  %6247 = vset.pattern.permute.xlu1 %v7763_v28  ;;  %v8416_v21 = vpop.permute.xlu2 %1683 }
 0x41b   : > { %3608 = vperm.xlu0 %6550, %v8324_v50   ;;  %10324 = vst [vmem:[#allocation191_spill] sm:$0xff] %v8416_v21  ;;  %v8440_v31 = vpop.permute.xlu0 %4615 }
 0x41c   : > { %v8436_v21 = vpop.permute.xlu1 %1707  ;;  %10332 = vst [vmem:[#allocation199_spill] sm:$0xff] %v8440_v31 }
 0x41d   : > { %10331 = vst [vmem:[#allocation198_spill] sm:$0xff] %v8436_v21 }
 0x422   : > { %2035 = vperm.xlu2 %6248, %v7799_v34   ;;  %2029 = vperm.xlu1 %6247, %v7799_v34   ;;  %v8425_v43 = vpop.permute.xlu2 %1695 }
 0x423   : > { %4221 = vperm.xlu0 %6550, %v8336_v7   ;;  %10327 = vst [vmem:[#allocation194_spill] sm:$0xff] %v8425_v43 }
 0x424   : > { %v8445_v48 = vpop.permute.xlu1 %1719 }
 0x425   : > { %10334 = vst [vmem:[#allocation201_spill] sm:$0xff] %v8445_v48 }
 0x42a   : > { %6250 = vset.pattern.permute.xlu2 %v7718_v23  ;;  %6249 = vset.pattern.permute.xlu1 %v7721_v24  ;;  %v8434_v60 = vpop.permute.xlu2 %1713 }
 0x42b   : > { %4706 = vperm.xlu0 %6550, %v8348_v12   ;;  %10330 = vst [vmem:[#allocation197_spill] sm:$0xff] %v8434_v60  ;;  %v8450_v60 = vpop.permute.xlu0 %1155 }
 0x42c   : > { %v8454_v11 = vpop.permute.xlu1 %1737 }
 0x42d   : > { %10336 = vst [vmem:[#allocation203_spill] sm:$0xff] %v8454_v11 }
 0x432   : > { %2053 = vperm.xlu2 %6250, %v7799_v34   ;;  %2047 = vperm.xlu1 %6249, %v7799_v34   ;;  %v8443_v43 = vpop.permute.xlu2 %1725 }
 0x433   : > { %6555 = vset.pattern.permute.xlu0 %v7718_v23  ;;  %10333 = vst [vmem:[#allocation200_spill] sm:$0xff] %v8443_v43  ;;  %v8461_v31 = vpop.permute.xlu0 %1640 }
 0x434   : > { %v8463_v43 = vpop.permute.xlu1 %1749 }
 0x435   : > { %10338 = vst [vmem:[#allocation205_spill] sm:$0xff] %v8463_v43 }
 0x43a   : > { %6252 = vset.pattern.permute.xlu2 %v7733_v26  ;;  %6251 = vset.pattern.permute.xlu1 %v7778_v29  ;;  %v8452_v21 = vpop.permute.xlu2 %1743 }
 0x43b   : > { %1246 = vperm.xlu0 %6555, %v7745_v27   ;;  %10335 = vst [vmem:[#allocation202_spill] sm:$0xff] %v8452_v21  ;;  %v8472_v21 = vpop.permute.xlu0 %2253 }
 0x442   : > { %2065 = vperm.xlu2 %6252, %v7799_v34   ;;  %2059 = vperm.xlu1 %6251, %v7799_v34   ;;  %v8459_v27 = vpop.permute.xlu2 %1756 }
 0x443   : > { %1731 = vperm.xlu0 %6555, %v8110_v53   ;;  %10337 = vst [vmem:[#allocation204_spill] sm:$0xff] %v8459_v27  ;;  %v8470_v53 = vpop.permute.xlu1 %1768  ;;  %v8481_v11 = vpop.permute.xlu0 %2738 }
 0x444   : > { %10340 = vst [vmem:[#allocation207_spill] sm:$0xff] %v8470_v53 }
 0x445   : > { %10343 = vst [vmem:[#allocation210_spill] sm:$0xff] %v8481_v11 }
 0x44a   : > { %6254 = vset.pattern.permute.xlu2 %v7638_v5  ;;  %6253 = vset.pattern.permute.xlu1 %v7629_v2  ;;  %v8468_v34 = vpop.permute.xlu2 %1774 }
 0x44b   : > { %2344 = vperm.xlu0 %6555, %v8302_v44   ;;  %10339 = vst [vmem:[#allocation206_spill] sm:$0xff] %v8468_v34  ;;  %v8479_v43 = vpop.permute.xlu1 %1780 }
 0x44c   : > { %10342 = vst [vmem:[#allocation209_spill] sm:$0xff] %v8479_v43 }
 0x452   : > { %2084 = vperm.xlu2 %6254, %v7945_v62   ;;  %2078 = vperm.xlu1 %6253, %v7945_v62   ;;  %v8477_v27 = vpop.permute.xlu2 %1786 }
 0x453   : > { %3153 = vperm.xlu0 %6555, %v8312_v33   ;;  %10341 = vst [vmem:[#allocation208_spill] sm:$0xff] %v8477_v27  ;;  %v8488_v53 = vpop.permute.xlu1 %1798 }
 0x454   : > { %10345 = vst [vmem:[#allocation212_spill] sm:$0xff] %v8488_v53 }
 0x45a   : > { %6256 = vset.pattern.permute.xlu2 %v7655_v9  ;;  %6255 = vset.pattern.permute.xlu1 %v7635_v4  ;;  %v8486_v34 = vpop.permute.xlu2 %1804 }
 0x45b   : > { %3638 = vperm.xlu0 %6555, %v8324_v50   ;;  %10344 = vst [vmem:[#allocation211_spill] sm:$0xff] %v8486_v34  ;;  %v8492_v50 = vpop.permute.xlu0 %3547  ;;  %v8497_v11 = vpop.permute.xlu1 %1810 }
 0x45c   : > { %10346 = vst [vmem:[#allocation213_spill] sm:$0xff] %v8492_v50 }
 0x45d   : > { %10348 = vst [vmem:[#allocation215_spill] sm:$0xff] %v8497_v11  ;;  %v10355_v11 = vlaneseq }
 0x462   : > { %2096 = vperm.xlu2 %6256, %v7945_v62   ;;  %2090 = vperm.xlu1 %6255, %v7945_v62   ;;  %v8495_v27 = vpop.permute.xlu2 %1816 }
 0x463   : > { %4251 = vperm.xlu0 %6555, %v8336_v7   ;;  %10347 = vst [vmem:[#allocation214_spill] sm:$0xff] %v8495_v27  ;;  %v8502_v7 = vpop.permute.xlu0 %4160  ;;  %v8504_v34 = vpop.permute.xlu1 %1828 }
 0x464   : > { %10349 = vst [vmem:[#allocation216_spill] sm:$0xff] %v8502_v7  ;;  %v8519_v7 = vand.u32 127, %v10355_v11 }
 0x465   : > { %10350 = vst [vmem:[#allocation217_spill] sm:$0xff] %v8504_v34 }
 0x466   : > { %vm1849_vm0 = vcmp.eq.s32.totalorder %v7780_v30, %v8519_v7  ;;  %vm1848_vm1 = vcmp.eq.s32.totalorder %v7908_v55, %v8519_v7  ;;  %vm1850_vm2 = vcmp.eq.s32.totalorder %v8048_v41, %v8519_v7  ;;  %vm1851_vm3 = vcmp.eq.s32.totalorder %v8057_v46, %v8519_v7 }
 0x467   : > { %vm1852_vm4 = vcmp.eq.s32.totalorder %v8046_v40, %v8519_v7  ;;  %vm1853_vm5 = vcmp.eq.s32.totalorder %v8055_v52, %v8519_v7  ;;  %vm1854_vm6 = vcmp.eq.s32.totalorder %v8066_v39, %v8519_v7  ;;  %vm1856_vm7 = vcmp.eq.s32.totalorder %v8377_v16, %v8519_v7 }
 0x468   : > { %v2757_v46 = vsel %vm1853_vm5, %v7966_v1, 0.0  ;;  %vm1855_vm8 = vcmp.eq.s32.totalorder %v8064_v61, %v8519_v7  ;;  %vm1857_vm9 = vcmp.eq.s32.totalorder %v8078_v37, %v8519_v7  ;;  %vm1858_vm10 = vcmp.eq.s32.totalorder %v8073_v20, %v8519_v7 }
 0x469   : > { %vm1859_vm11 = vcmp.eq.s32.totalorder %v8090_v47, %v8519_v7  ;;  %v2762_v61 = vsel %vm1858_vm10, %v8008_v54, 0.0  ;;  %vm1860_vm12 = vcmp.eq.s32.totalorder %v8083_v38, %v8519_v7  ;;  %vm1861_vm13 = vcmp.eq.s32.totalorder %v8450_v60, %v8519_v7 }
 0x46a   : > { %6258 = vset.pattern.permute.xlu2 %v7677_v14  ;;  %6257 = vset.pattern.permute.xlu1 %v7652_v8  ;;  %v8506_v53 = vpop.permute.xlu2 %1834  ;;  %vm1864_vm14 = vcmp.eq.s32.totalorder %v8115_v0, %v8519_v7  ;;  %vm1870_vm5 = vcmp.eq.s32.totalorder %v8134_v36, %v8519_v7 }
 0x46b   : > { %4736 = vperm.xlu0 %6555, %v8348_v12   ;;  %10351 = vst [vmem:[#allocation218_spill] sm:$0xff] %v8506_v53  ;;  %v8510_v12 = vpop.permute.xlu0 %4645  ;;  %v8512_v50 = vpop.permute.xlu1 %1840 }
 0x46c   : > { %10352 = vst [vmem:[#allocation219_spill] sm:$0xff] %v8510_v12  ;;  %v2752_v12 = vsel %vm1848_vm1, %v7918_v57, 0.0  ;;  %vm1867_vm1 = vcmp.eq.s32.totalorder %v8127_v6, %v8519_v7 }
 0x46d   : > { %10353 = vst [vmem:[#allocation220_spill] sm:$0xff] %v8512_v50 }
 0x472   : > { %2114 = vperm.xlu2 %6258, %v7945_v62   ;;  %2108 = vperm.xlu1 %6257, %v7945_v62   ;;  %v8516_v27 = vpop.permute.xlu2 %1846 }
 0x473   : > { %6563 = vset.pattern.permute.xlu0 %v7730_v25  ;;  %10354 = vst [vmem:[#allocation221_spill] sm:$0xff] %v8516_v27  ;;  %v1988_v34 = vpop.permute.xlu1 %1987  ;;  %v8521_v43 = vpop.permute.xlu0 %1186 }
 0x474   : > { %v2753_v50 = vsel %vm1849_vm0, %v1988_v34, 0.0  ;;  %vm1866_vm15 = vcmp.eq.s32.totalorder %v8521_v43, %v8519_v7  ;;  %vm1865_vm0 = vcmp.eq.s32.totalorder %v8107_v17, %v8519_v7 }
 0x475   : > { %v2881_v53 = vadd.f32 %v2753_v50, %v2752_v12 }
 0x47a   : > { %6260 = vset.pattern.permute.xlu2 %v7763_v28  ;;  %6259 = vset.pattern.permute.xlu1 %v7674_v13  ;;  %v1994_v27 = vpop.permute.xlu2 %1993 }
 0x47b   : > { %v2000_v11 = vpop.permute.xlu1 %1999  ;;  %v8536_v30 = vpop.permute.xlu0 %1671  ;;  %v2754_v55 = vsel %vm1850_vm2, %v1994_v27, 0.0  ;;  %vm1868_vm2 = vcmp.eq.s32.totalorder %v8122_v45, %v8519_v7 }
 0x47c   : > { %v2755_v33 = vsel %vm1851_vm3, %v2000_v11, 0.0  ;;  %v2882_v48 = vadd.f32 %v2881_v53, %v2754_v55  ;;  %vm1869_vm3 = vcmp.eq.s32.totalorder %v8136_v59, %v8519_v7 }
 0x47e   : > { %v2883_v34 = vadd.f32 %v2882_v48, %v2755_v33 }
 0x482   : > { %2126 = vperm.xlu2 %6260, %v7945_v62   ;;  %2120 = vperm.xlu1 %6259, %v7945_v62   ;;  %v2006_v57 = vpop.permute.xlu2 %2005 }
 0x483   : > { %v2756_v12 = vsel %vm1852_vm4, %v2006_v57, 0.0  ;;  %v8547_v27 = vpop.permute.xlu0 %2284 }
 0x484   : > { %v2018_v50 = vpop.permute.xlu1 %2017  ;;  %v2884_v41 = vadd.f32 %v2883_v34, %v2756_v12 }
 0x485   : > { %v2758_v33 = vsel %vm1854_vm6, %v2018_v50, 0.0  ;;  %vm1872_vm6 = vcmp.eq.s32.totalorder %v8145_v56, %v8519_v7 }
 0x486   : > { %v2885_v40 = vadd.f32 %v2884_v41, %v2757_v46 }
 0x488   : > { %v2886_v53 = vadd.f32 %v2885_v40, %v2758_v33 }
 0x48a   : > { %6262 = vset.pattern.permute.xlu2 %v7721_v24  ;;  %6261 = vset.pattern.permute.xlu1 %v7696_v18  ;;  %v2024_v48 = vpop.permute.xlu2 %2023 }
 0x48b   : > { %v2759_v39 = vsel %vm1855_vm8, %v2024_v48, 0.0  ;;  %v8555_v55 = vpop.permute.xlu0 %3093  ;;  %vm1874_vm8 = vcmp.eq.s32.totalorder %v8154_v49, %v8519_v7 }
 0x48c   : > { %v2887_v1 = vadd.f32 %v2886_v53, %v2759_v39 }
 0x492   : > { %2144 = vperm.xlu2 %6262, %v7945_v62   ;;  %2138 = vperm.xlu1 %6261, %v7945_v62   ;;  %v2036_v57 = vpop.permute.xlu2 %2035 }
 0x493   : > { %v2761_v16 = vsel %vm1857_vm9, %v2036_v57, 0.0  ;;  %v8566_v33 = vpop.permute.xlu0 %3578  ;;  %vm1875_vm9 = vcmp.eq.s32.totalorder %v8150_v35, %v8519_v7 }
 0x494   : > { %v2030_v11 = vpop.permute.xlu1 %2029  ;;  %10356 = vst [vmem:[#allocation222_spill] sm:$0xff] %v8566_v33 }
 0x495   : > { %v2760_v52 = vsel %vm1856_vm7, %v2030_v11, 0.0  ;;  %vm1873_vm7 = vcmp.eq.s32.totalorder %v8143_v10, %v8519_v7 }
 0x496   : > { %v2888_v34 = vadd.f32 %v2887_v1, %v2760_v52 }
 0x498   : > { %v2889_v50 = vadd.f32 %v2888_v34, %v2761_v16 }
 0x49a   : > { %6264 = vset.pattern.permute.xlu2 %v7778_v29  ;;  %6263 = vset.pattern.permute.xlu1 %v7718_v23  ;;  %v2890_v46 = vadd.f32 %v2889_v50, %v2762_v61  ;;  %v2054_v37 = vpop.permute.xlu2 %2053 }
 0x49b   : > { %v2764_v20 = vsel %vm1860_vm12, %v2054_v37, 0.0  ;;  %v8576_v11 = vpop.permute.xlu0 %4191 }
 0x4a2   : > { %2156 = vperm.xlu2 %6264, %v7945_v62   ;;  %2150 = vperm.xlu1 %6263, %v7945_v62   ;;  %v8596_v52 = vpop.permute.xlu2 %2065 }
 0x4a3   : > { %v8582_v38 = vpop.permute.xlu0 %4676 }
 0x4a4   : > { %v2048_v12 = vpop.permute.xlu1 %2047  ;;  %10357 = vst [vmem:[#allocation223_spill] sm:$0xff] %v8582_v38 }
 0x4a5   : > { %v2763_v41 = vsel %vm1859_vm11, %v2048_v12, 0.0 }
 0x4a6   : > { %v2891_v48 = vadd.f32 %v2890_v46, %v2763_v41 }
 0x4a8   : > { %v2892_v40 = vadd.f32 %v2891_v48, %v2764_v20 }
 0x4aa   : > { %6266 = vset.pattern.permute.xlu2 %v7629_v2  ;;  %6265 = vset.pattern.permute.xlu1 %v7730_v25 }
 0x4ac   : > { %v2085_v34 = vpop.permute.xlu2 %2084 }
 0x4ad   : > { %v2769_v61 = vsel %vm1865_vm0, %v2085_v34, 0.0  ;;  %vm3057_vm0 = vcmask 1041409  }
 0x4b2   : > { %2175 = vperm.xlu2 %6266, %v8076_v32   ;;  %2168 = vperm.xlu1 %6265, %v7945_v62   ;;  %v1217_v62 = vpop.permute.xlu0 %1216 }
 0x4b3   : > { %vm1871_vm4 = vcmp.eq.s32.totalorder %v1217_v62, %v8519_v7 }
 0x4b4   : > { %v2060_v47 = vpop.permute.xlu1 %2059 }
 0x4b5   : > { %v2765_v54 = vsel %vm1861_vm13, %v2060_v47, 0.0  ;;  %v2772_v47 = vsel %vm1868_vm2, %v8119_v51, 0.0 }
 0x4b6   : > { %v8574_v53 = vadd.f32 %v2892_v40, %v2765_v54 }
 0x4ba   : > { %6268 = vset.pattern.permute.xlu2 %v7635_v4  ;;  %6267 = vset.pattern.permute.xlu1 %v7638_v5  ;;  %v8588_v60 = vpop.permute.xlu0 %1701 }
 0x4bc   : > { %v2097_v46 = vpop.permute.xlu2 %2096 }
 0x4bd   : > { %v2771_v0 = vsel %vm1867_vm1, %v2097_v46, 0.0 }
 0x4c2   : > { %2187 = vperm.xlu2 %6268, %v8076_v32   ;;  %2181 = vperm.xlu1 %6267, %v8076_v32   ;;  %v8592_v39 = vpop.permute.xlu0 %2314 }
 0x4c4   : > { %v2079_v1 = vpop.permute.xlu1 %2078 }
 0x4c5   : > { %v2768_v50 = vsel %vm1864_vm14, %v2079_v1, 0.0 }
 0x4c6   : > { %v2902_v37 = vadd.f32 %v2769_v61, %v2768_v50 }
 0x4ca   : > { %6270 = vset.pattern.permute.xlu2 %v7652_v8  ;;  %6269 = vset.pattern.permute.xlu1 %v7632_v3  ;;  %v8598_v57 = vpop.permute.xlu0 %3123 }
 0x4cc   : > { %v2115_v17 = vpop.permute.xlu2 %2114 }
 0x4cd   : > { %v2774_v45 = vsel %vm1870_vm5, %v2115_v17, 0.0 }
 0x4d2   : > { %2205 = vperm.xlu2 %6270, %v8076_v32   ;;  %2199 = vperm.xlu1 %6269, %v8076_v32   ;;  %v8610_v12 = vpop.permute.xlu0 %3608 }
 0x4d3   : > { %10358 = vst [vmem:[#allocation224_spill] sm:$0xff] %v8610_v12 }
 0x4d4   : > { %v2091_v16 = vpop.permute.xlu1 %2090 }
 0x4d5   : > { %v2770_v41 = vsel %vm1866_vm15, %v2091_v16, 0.0 }
 0x4d6   : > { %v2903_v48 = vadd.f32 %v2902_v37, %v2770_v41  ;;  %v2777_v37 = vsel %vm1873_vm7, %v8184_v15, 0.0 }
 0x4d8   : > { %v2904_v20 = vadd.f32 %v2903_v48, %v2771_v0 }
 0x4da   : > { %6272 = vset.pattern.permute.xlu2 %v7674_v13  ;;  %6271 = vset.pattern.permute.xlu1 %v7677_v14  ;;  %v8621_v40 = vpop.permute.xlu0 %4221  ;;  %v2905_v6 = vadd.f32 %v2904_v20, %v2772_v47  ;;  %v10360_v20 = vld [vmem:[#allocation107_spill] sm:$0xff] }
 0x4db   : > { %vm1862_vm11 = vcmp.eq.s32.totalorder %v10360_v20, %v8519_v7 }
 0x4dc   : > { %v2127_v16 = vpop.permute.xlu2 %2126  ;;  %v2766_v47 = vsel %vm1862_vm11, %v8596_v52, 0.0 }
 0x4dd   : > { %v2776_v62 = vsel %vm1872_vm6, %v2127_v16, 0.0  ;;  %v2894_v35 = vadd.f32 %v8574_v53, %v2766_v47  ;;  %v10364_v16 = vld [vmem:[#allocation99_spill] sm:$0xff] }
 0x4e2   : > { %2217 = vperm.xlu2 %6272, %v8076_v32   ;;  %2211 = vperm.xlu1 %6271, %v8076_v32   ;;  %v8628_v61 = vpop.permute.xlu0 %4706 }
 0x4e3   : > { %10359 = vst [vmem:[#allocation225_spill] sm:$0xff] %v8628_v61 }
 0x4e4   : > { %v2109_v43 = vpop.permute.xlu1 %2108 }
 0x4e5   : > { %v2773_v54 = vsel %vm1869_vm3, %v2109_v43, 0.0 }
 0x4e6   : > { %v2906_v1 = vadd.f32 %v2905_v6, %v2773_v54  ;;  %v10361_v6 = vld [vmem:[#allocation115_spill] sm:$0xff] }
 0x4e7   : > { %vm1877_vm12 = vcmp.eq.s32.totalorder %v10361_v6, %v8519_v7 }
 0x4e8   : > { %v2907_v50 = vadd.f32 %v2906_v1, %v2774_v45  ;;  %v10362_v45 = vld [vmem:[#allocation105_spill] sm:$0xff] }
 0x4e9   : > { %vm1863_vm13 = vcmp.eq.s32.totalorder %v10362_v45, %v8519_v7  ;;  %v10367_v45 = vld [vmem:[#allocation117_spill] sm:$0xff] }
 0x4ea   : > { %6274 = vset.pattern.permute.xlu2 %v7696_v18  ;;  %6273 = vset.pattern.permute.xlu1 %v7699_v19  ;;  %v1247_v56 = vpop.permute.xlu0 %1246  ;;  %vm1880_vm2 = vcmp.eq.s32.totalorder %v10367_v45, %v8519_v7 }
 0x4eb   : > { %vm1876_vm10 = vcmp.eq.s32.totalorder %v1247_v56, %v8519_v7 }
 0x4ec   : > { %v2145_v36 = vpop.permute.xlu2 %2144 }
 0x4ed   : > { %v2779_v10 = vsel %vm1875_vm9, %v2145_v36, 0.0 }
 0x4f2   : > { %2235 = vperm.xlu2 %6274, %v8076_v32   ;;  %2229 = vperm.xlu1 %6273, %v8076_v32  }
 0x4f4   : > { %v2121_v34 = vpop.permute.xlu1 %2120 }
 0x4f5   : > { %v2775_v59 = vsel %vm1871_vm4, %v2121_v34, 0.0 }
 0x4f6   : > { %v2908_v51 = vadd.f32 %v2907_v50, %v2775_v59  ;;  %v2767_v50 = vsel %vm1863_vm13, %v10364_v16, 0.0  ;;  %vm1892_vm13 = vcmp.eq.s32.totalorder %v8213_v63, %v8519_v7 }
 0x4f7   : > { %v2895_v52 = vadd.f32 %v2894_v35, %v2767_v50  ;;  %v10366_v35 = vld [vmem:[#allocation57_spill] sm:$0xff] }
 0x4f8   : > { %v2909_v41 = vadd.f32 %v2908_v51, %v2776_v62  ;;  %vm1881_vm1 = vcmp.eq.s32.totalorder %v10366_v35, %v8519_v7  ;;  %v10368_v50 = vld [vmem:[#allocation121_spill] sm:$0xff] }
 0x4f9   : > { %v2896_v53 = vrot.slane %v2895_v52, 4  ;;  %vm1882_vm3 = vcmp.eq.s32.totalorder %v10368_v50, %v8519_v7  ;;  %v10376_v50 = vld [vmem:[#allocation73_spill] sm:$0xff] }
 0x4fa   : > { %6276 = vset.pattern.permute.xlu2 %v7718_v23  ;;  %6275 = vset.pattern.permute.xlu1 %v7721_v24  ;;  %v2910_v43 = vadd.f32 %v2909_v41, %v2777_v37  ;;  %vm1891_vm11 = vcmp.eq.s32.totalorder %v10376_v50, %v8519_v7 }
 0x4fb   : > { %v2897_v41 = vadd.f32 %v2896_v53, %v2895_v52  ;;  %v10369_v53 = vld [vmem:[#allocation123_spill] sm:$0xff] }
 0x4fc   : > { %v2157_v49 = vpop.permute.xlu2 %2156  ;;  %vm1884_vm4 = vcmp.eq.s32.totalorder %v10369_v53, %v8519_v7 }
 0x4fd   : > { %v2781_v34 = vsel %vm1877_vm12, %v2157_v49, 0.0 }
 0x502   : > { %2247 = vperm.xlu2 %6276, %v8076_v32   ;;  %2241 = vperm.xlu1 %6275, %v8076_v32  }
 0x504   : > { %v2139_v46 = vpop.permute.xlu1 %2138 }
 0x505   : > { %v2778_v48 = vsel %vm1874_vm8, %v2139_v46, 0.0  ;;  %v10365_v46 = vld [vmem:[#allocation118_spill] sm:$0xff] }
 0x506   : > { %v2911_v0 = vadd.f32 %v2910_v43, %v2778_v48  ;;  %vm1879_vm15 = vcmp.eq.s32.totalorder %v10365_v46, %v8519_v7  ;;  %v2898_v48 = vrot.slane %v2897_v41, 2 }
 0x508   : > { %v2912_v15 = vadd.f32 %v2911_v0, %v2779_v10  ;;  %v2899_v0 = vadd.f32 %v2898_v48, %v2897_v41  ;;  %v10370_v41 = vld [vmem:[#allocation120_spill] sm:$0xff] }
 0x509   : > { %vm1883_vm5 = vcmp.eq.s32.totalorder %v10370_v41, %v8519_v7 }
 0x50a   : > { %6278 = vset.pattern.permute.xlu2 %v7730_v25  ;;  %6277 = vset.pattern.permute.xlu1 %v7733_v26  ;;  %v2900_v20 = vrot.slane %v2899_v0, 1 }
 0x50c   : > { %v2176_v6 = vpop.permute.xlu2 %2175 }
 0x512   : > { %2265 = vperm.xlu2 %6278, %v8076_v32   ;;  %2259 = vperm.xlu1 %6277, %v8076_v32   ;;  %v10363_v32 = vld [vmem:[#allocation114_spill] sm:$0xff] }
 0x513   : > { %vm1878_vm14 = vcmp.eq.s32.totalorder %v10363_v32, %v8519_v7 }
 0x514   : > { %v2151_v17 = vpop.permute.xlu1 %2150  ;;  %v2782_v51 = vsel %vm1878_vm14, %v8247_v22, 0.0 }
 0x515   : > { %v2780_v54 = vsel %vm1876_vm10, %v2151_v17, 0.0 }
 0x516   : > { %v2913_v1 = vadd.f32 %v2912_v15, %v2780_v54  ;;  %v2901_v15 = vadd.f32 %v2900_v20, %v2899_v0  ;;  %v10372_v0 = vld [vmem:[#allocation122_spill] sm:$0xff] }
 0x517   : > { %vm1885_vm7 = vcmp.eq.s32.totalorder %v10372_v0, %v8519_v7 }
 0x518   : > { %v2914_v59 = vadd.f32 %v2913_v1, %v2781_v34 }
 0x51a   : > { %6280 = vset.pattern.permute.xlu2 %v7638_v5  ;;  %6279 = vset.pattern.permute.xlu1 %v7629_v2  ;;  %v2915_v62 = vadd.f32 %v2914_v59, %v2782_v51  ;;  %v2784_v59 = vsel %vm1880_vm2, %v2176_v6, 0.0  ;;  %v10374_v6 = vld [vmem:[#allocation125_spill] sm:$0xff]  ;;  %vm3059_vm2 = vcmask 1042434  }
 0x51b   : > { %vm1888_vm9 = vcmp.eq.s32.totalorder %v10374_v6, %v8519_v7 }
 0x51c   : > { %v2188_v32 = vpop.permute.xlu2 %2187 }
 0x51d   : > { %v2786_v51 = vsel %vm1882_vm3, %v2188_v32, 0.0  ;;  %v10375_v32 = vld [vmem:[#allocation129_spill] sm:$0xff] }
 0x51e   : > { %vm1889_vm10 = vcmp.eq.s32.totalorder %v10375_v32, %v8519_v7  ;;  %v10382_v32 = vld [vmem:[#allocation79_spill] sm:$0xff] }
 0x51f   : > { %vm1896_vm3 = vcmp.eq.s32.totalorder %v10382_v32, %v8519_v7  ;;  %v8772_v32 = vpop.permute.xlu0 %1731 }
 0x522   : > { %2278 = vperm.xlu2 %6280, %v8302_v44   ;;  %2272 = vperm.xlu1 %6279, %v8302_v44  }
 0x524   : > { %v2169_v36 = vpop.permute.xlu1 %2168 }
 0x525   : > { %v2783_v37 = vsel %vm1879_vm15, %v2169_v36, 0.0  ;;  %v2787_v36 = vsel %vm1883_vm5, %v8316_v58, 0.0  ;;  %v10373_v58 = vld [vmem:[#allocation126_spill] sm:$0xff] }
 0x526   : > { %v2916_v43 = vadd.f32 %v2915_v62, %v2783_v37  ;;  %vm1887_vm8 = vcmp.eq.s32.totalorder %v10373_v58, %v8519_v7 }
 0x528   : > { %v2917_v22 = vrot.slane %v2916_v43, 4 }
 0x52a   : > { %v2918_v56 = vadd.f32 %v2917_v22, %v2916_v43  ;;  %6282 = vset.pattern.permute.xlu2 %v7632_v3  ;;  %6281 = vset.pattern.permute.xlu1 %v7655_v9  ;;  %v10371_v22 = vld [vmem:[#allocation67_spill] sm:$0xff] }
 0x52b   : > { %vm1886_vm6 = vcmp.eq.s32.totalorder %v10371_v22, %v8519_v7 }
 0x52c   : > { %v2919_v10 = vrot.slane %v2918_v56, 2  ;;  %v2206_v46 = vpop.permute.xlu2 %2205 }
 0x52e   : > { %v2920_v49 = vadd.f32 %v2919_v10, %v2918_v56  ;;  %v2789_v56 = vsel %vm1885_vm7, %v2206_v46, 0.0 }
 0x530   : > { %v2921_v17 = vrot.slane %v2920_v49, 1 }
 0x532   : > { %v2922_v47 = vadd.f32 %v2921_v17, %v2920_v49  ;;  %2296 = vperm.xlu2 %6282, %v8302_v44   ;;  %2290 = vperm.xlu1 %6281, %v8302_v44  }
 0x534   : > { %v8667_v54 = vsel %vm3057_vm0, %v2922_v47, %v2901_v15  ;;  %v2182_v1 = vpop.permute.xlu1 %2181 }
 0x535   : > { %v2785_v34 = vsel %vm1881_vm1, %v2182_v1, 0.0  ;;  %v2792_v1 = vsel %vm1888_vm9, %v8398_v42, 0.0 }
 0x536   : > { %v2923_v16 = vadd.f32 %v2785_v34, %v2784_v59 }
 0x538   : > { %v2924_v52 = vadd.f32 %v2923_v16, %v2786_v51  ;;  %v10377_v51 = vld [vmem:[#allocation127_spill] sm:$0xff] }
 0x539   : > { %vm1890_vm12 = vcmp.eq.s32.totalorder %v10377_v51, %v8519_v7 }
 0x53a   : > { %6284 = vset.pattern.permute.xlu2 %v7677_v14  ;;  %6283 = vset.pattern.permute.xlu1 %v7652_v8  ;;  %v2925_v48 = vadd.f32 %v2924_v52, %v2787_v36 }
 0x53c   : > { %v2218_v10 = vpop.permute.xlu2 %2217 }
 0x53d   : > { %v2791_v47 = vsel %vm1887_vm8, %v2218_v10, 0.0  ;;  %v10380_v10 = vld [vmem:[#allocation133_spill] sm:$0xff] }
 0x53e   : > { %vm1894_vm15 = vcmp.eq.s32.totalorder %v10380_v10, %v8519_v7 }
 0x542   : > { %2308 = vperm.xlu2 %6284, %v8302_v44   ;;  %2302 = vperm.xlu1 %6283, %v8302_v44  }
 0x544   : > { %v2200_v62 = vpop.permute.xlu1 %2199 }
 0x545   : > { %v2788_v37 = vsel %vm1884_vm4, %v2200_v62, 0.0 }
 0x546   : > { %v2926_v43 = vadd.f32 %v2925_v48, %v2788_v37  ;;  %v10378_v48 = vld [vmem:[#allocation130_spill] sm:$0xff] }
 0x547   : > { %vm1893_vm14 = vcmp.eq.s32.totalorder %v10378_v48, %v8519_v7  ;;  %v10386_v48 = vld [vmem:[#allocation85_spill] sm:$0xff] }
 0x548   : > { %v2927_v49 = vadd.f32 %v2926_v43, %v2789_v56  ;;  %v2797_v22 = vsel %vm1893_vm14, %v8472_v21, 0.0  ;;  %v10379_v56 = vld [vmem:[#allocation53_spill] sm:$0xff]  ;;  %vm1901_vm7 = vcmp.eq.s32.totalorder %v10386_v48, %v8519_v7 }
 0x549   : > { %v10394_v48 = vld [vmem:[#allocation149_spill] sm:$0xff] }
 0x54a   : > { %6286 = vset.pattern.permute.xlu2 %v7699_v19  ;;  %6285 = vset.pattern.permute.xlu1 %v7763_v28 }
 0x54c   : > { %v2236_v59 = vpop.permute.xlu2 %2235 }
 0x54d   : > { %v2794_v52 = vsel %vm1890_vm12, %v2236_v59, 0.0 }
 0x552   : > { %2326 = vperm.xlu2 %6286, %v8302_v44   ;;  %2320 = vperm.xlu1 %6285, %v8302_v44  }
 0x554   : > { %v2212_v20 = vpop.permute.xlu1 %2211 }
 0x555   : > { %v2790_v17 = vsel %vm1886_vm6, %v2212_v20, 0.0 }
 0x556   : > { %v2928_v15 = vadd.f32 %v2927_v49, %v2790_v17  ;;  %v10381_v17 = vld [vmem:[#allocation132_spill] sm:$0xff] }
 0x557   : > { %vm1895_vm1 = vcmp.eq.s32.totalorder %v10381_v17, %v8519_v7  ;;  %v10388_v17 = vld [vmem:[#allocation141_spill] sm:$0xff] }
 0x558   : > { %v2929_v35 = vadd.f32 %v2928_v15, %v2791_v47  ;;  %vm1902_vm9 = vcmp.eq.s32.totalorder %v10388_v17, %v8519_v7 }
 0x55a   : > { %6288 = vset.pattern.permute.xlu2 %v7721_v24  ;;  %6287 = vset.pattern.permute.xlu1 %v7696_v18  ;;  %v2930_v34 = vadd.f32 %v2929_v35, %v2792_v1 }
 0x55c   : > { %v2248_v62 = vpop.permute.xlu2 %2247 }
 0x55d   : > { %v2796_v37 = vsel %vm1892_vm13, %v2248_v62, 0.0  ;;  %v10384_v62 = vld [vmem:[#allocation139_spill] sm:$0xff] }
 0x55e   : > { %vm1899_vm5 = vcmp.eq.s32.totalorder %v10384_v62, %v8519_v7 }
 0x562   : > { %2338 = vperm.xlu2 %6288, %v8302_v44   ;;  %2332 = vperm.xlu1 %6287, %v8302_v44  }
 0x564   : > { %v2230_v45 = vpop.permute.xlu1 %2229 }
 0x565   : > { %v2793_v16 = vsel %vm1889_vm10, %v2230_v45, 0.0 }
 0x566   : > { %v2931_v42 = vadd.f32 %v2930_v34, %v2793_v16 }
 0x568   : > { %v2932_v41 = vadd.f32 %v2931_v42, %v2794_v52  ;;  %v10383_v42 = vld [vmem:[#allocation136_spill] sm:$0xff] }
 0x569   : > { %vm1897_vm4 = vcmp.eq.s32.totalorder %v10383_v42, %v8519_v7  ;;  %v10392_v42 = vld [vmem:[#allocation142_spill] sm:$0xff] }
 0x56a   : > { %6290 = vset.pattern.permute.xlu2 %v7733_v26  ;;  %6289 = vset.pattern.permute.xlu1 %v7778_v29  ;;  %vm1905_vm13 = vcmp.eq.s32.totalorder %v10392_v42, %v8519_v7 }
 0x56c   : > { %v2266_v63 = vpop.permute.xlu2 %2265 }
 0x56d   : > { %v2799_v21 = vsel %vm1895_vm1, %v2266_v63, 0.0 }
 0x572   : > { %2356 = vperm.xlu2 %6290, %v8302_v44   ;;  %2350 = vperm.xlu1 %6289, %v8302_v44  }
 0x574   : > { %v2242_v53 = vpop.permute.xlu1 %2241 }
 0x575   : > { %v2795_v46 = vsel %vm1891_vm11, %v2242_v53, 0.0  ;;  %v10385_v53 = vld [vmem:[#allocation135_spill] sm:$0xff] }
 0x576   : > { %v2933_v36 = vadd.f32 %v2932_v41, %v2795_v46  ;;  %vm1898_vm6 = vcmp.eq.s32.totalorder %v10385_v53, %v8519_v7  ;;  %v10393_v53 = vld [vmem:[#allocation146_spill] sm:$0xff] }
 0x577   : > { %v2802_v41 = vsel %vm1898_vm6, %v8547_v27, 0.0  ;;  %vm1907_vm14 = vcmp.eq.s32.totalorder %v10393_v53, %v8519_v7 }
 0x578   : > { %v2934_v43 = vadd.f32 %v2933_v36, %v2796_v37 }
 0x57a   : > { %6292 = vset.pattern.permute.xlu2 %v7629_v2  ;;  %6291 = vset.pattern.permute.xlu1 %v7730_v25  ;;  %v2935_v0 = vadd.f32 %v2934_v43, %v2797_v22 }
 0x57c   : > { %v2279_v59 = vpop.permute.xlu2 %2278 }
 0x57d   : > { %v2801_v51 = vsel %vm1897_vm4, %v2279_v59, 0.0 }
 0x582   : > { %2369 = vperm.xlu2 %6292, %v10379_v56   ;;  %2362 = vperm.xlu1 %6291, %v8302_v44  }
 0x584   : > { %v2260_v20 = vpop.permute.xlu1 %2259 }
 0x585   : > { %v2798_v49 = vsel %vm1894_vm15, %v2260_v20, 0.0  ;;  %vm1909_vm15 = vcmp.eq.s32.totalorder %v10394_v48, %v8519_v7 }
 0x586   : > { %v2936_v58 = vadd.f32 %v2935_v0, %v2798_v49  ;;  %v10387_v0 = vld [vmem:[#allocation138_spill] sm:$0xff] }
 0x587   : > { %vm1900_vm8 = vcmp.eq.s32.totalorder %v10387_v0, %v8519_v7 }
 0x588   : > { %v2937_v15 = vadd.f32 %v2936_v58, %v2799_v21 }
 0x58a   : > { %v2938_v47 = vrot.slane %v2937_v15, 4  ;;  %6294 = vset.pattern.permute.xlu2 %v7655_v9  ;;  %6293 = vset.pattern.permute.xlu1 %v7635_v4 }
 0x58c   : > { %v2939_v6 = vadd.f32 %v2938_v47, %v2937_v15  ;;  %v2297_v36 = vpop.permute.xlu2 %2296  ;;  %v10389_v47 = vld [vmem:[#allocation144_spill] sm:$0xff] }
 0x58d   : > { %v2804_v10 = vsel %vm1900_vm8, %v2297_v36, 0.0  ;;  %vm1904_vm10 = vcmp.eq.s32.totalorder %v10389_v47, %v8519_v7 }
 0x58e   : > { %v2940_v35 = vrot.slane %v2939_v6, 2 }
 0x590   : > { %v2941_v44 = vadd.f32 %v2940_v35, %v2939_v6  ;;  %v10390_v6 = vld [vmem:[#allocation140_spill] sm:$0xff] }
 0x591   : > { %vm1903_vm11 = vcmp.eq.s32.totalorder %v10390_v6, %v8519_v7 }
 0x592   : > { %v2942_v1 = vrot.slane %v2941_v44, 1  ;;  %2387 = vperm.xlu2 %6294, %v10379_v56   ;;  %2381 = vperm.xlu1 %6293, %v10379_v56   ;;  %v2807_v35 = vsel %vm1903_vm11, %v8592_v39, 0.0 }
 0x594   : > { %v2943_v34 = vadd.f32 %v2942_v1, %v2941_v44 }
 0x596   : > { %v8730_v45 = vsel %vm3059_vm2, %v2943_v34, %v8667_v54  ;;  %v2273_v54 = vpop.permute.xlu1 %2272 }
 0x597   : > { %v2800_v16 = vsel %vm1896_vm3, %v2273_v54, 0.0  ;;  %v10391_v54 = vld [vmem:[#allocation93_spill] sm:$0xff] }
 0x598   : > { %v2944_v52 = vadd.f32 %v2801_v51, %v2800_v16  ;;  %vm1906_vm12 = vcmp.eq.s32.totalorder %v10391_v54, %v8519_v7 }
 0x59a   : > { %6296 = vset.pattern.permute.xlu2 %v7652_v8  ;;  %6295 = vset.pattern.permute.xlu1 %v7632_v3  ;;  %v2945_v37 = vadd.f32 %v2944_v52, %v2802_v41 }
 0x59c   : > { %v2309_v49 = vpop.permute.xlu2 %2308 }
 0x59d   : > { %v2806_v21 = vsel %vm1902_vm9, %v2309_v49, 0.0  ;;  %v10397_v49 = vld [vmem:[#allocation148_spill] sm:$0xff] }
 0x59e   : > { %vm1910_vm4 = vcmp.eq.s32.totalorder %v10397_v49, %v8519_v7 }
 0x5a2   : > { %2399 = vperm.xlu2 %6296, %v10379_v56   ;;  %2393 = vperm.xlu1 %6295, %v10379_v56  }
 0x5a4   : > { %v2291_v50 = vpop.permute.xlu1 %2290 }
 0x5a5   : > { %v2803_v46 = vsel %vm1899_vm5, %v2291_v50, 0.0  ;;  %vm3061_vm5 = vcmask 1043459  }
 0x5a6   : > { %v2946_v43 = vadd.f32 %v2945_v37, %v2803_v46  ;;  %v2345_v46 = vpop.permute.xlu0 %2344 }
 0x5a8   : > { %v2947_v20 = vadd.f32 %v2946_v43, %v2804_v10 }
 0x5aa   : > { %6298 = vset.pattern.permute.xlu2 %v7763_v28  ;;  %6297 = vset.pattern.permute.xlu1 %v7674_v13 }
 0x5ac   : > { %v2327_v1 = vpop.permute.xlu2 %2326 }
 0x5ad   : > { %v2809_v50 = vsel %vm1905_vm13, %v2327_v1, 0.0 }
 0x5b2   : > { %2417 = vperm.xlu2 %6298, %v10379_v56   ;;  %2411 = vperm.xlu1 %6297, %v10379_v56  }
 0x5b4   : > { %v2303_v22 = vpop.permute.xlu1 %2302 }
 0x5b5   : > { %v2805_v63 = vsel %vm1901_vm7, %v2303_v22, 0.0 }
 0x5b6   : > { %v2948_v27 = vadd.f32 %v2947_v20, %v2805_v63  ;;  %v10396_v20 = vld [vmem:[#allocation98_spill] sm:$0xff] }
 0x5b7   : > { %vm1911_vm3 = vcmp.eq.s32.totalorder %v10396_v20, %v8519_v7  ;;  %v10405_v20 = vld [vmem:[#allocation158_spill] sm:$0xff] }
 0x5b8   : > { %v2949_v15 = vadd.f32 %v2948_v27, %v2806_v21  ;;  %v10398_v27 = vld [vmem:[#allocation60_spill] sm:$0xff]  ;;  %vm1917_vm11 = vcmp.eq.s32.totalorder %v10405_v20, %v8519_v7 }
 0x5b9   : > { %v10417_v20 = vld [vmem:[#allocation84_spill] sm:$0xff] }
 0x5ba   : > { %6300 = vset.pattern.permute.xlu2 %v7696_v18  ;;  %6299 = vset.pattern.permute.xlu1 %v7699_v19  ;;  %v2950_v34 = vadd.f32 %v2949_v15, %v2807_v35 }
 0x5bc   : > { %v2339_v52 = vpop.permute.xlu2 %2338 }
 0x5bd   : > { %v2811_v41 = vsel %vm1907_vm14, %v2339_v52, 0.0 }
 0x5c2   : > { %2429 = vperm.xlu2 %6300, %v10379_v56   ;;  %2423 = vperm.xlu1 %6299, %v10379_v56  }
 0x5c4   : > { %v2321_v58 = vpop.permute.xlu1 %2320 }
 0x5c5   : > { %v2808_v44 = vsel %vm1904_vm10, %v2321_v58, 0.0 }
 0x5c6   : > { %v2951_v59 = vadd.f32 %v2950_v34, %v2808_v44 }
 0x5c8   : > { %v2952_v39 = vadd.f32 %v2951_v59, %v2809_v50  ;;  %v10400_v50 = vld [vmem:[#allocation151_spill] sm:$0xff] }
 0x5c9   : > { %vm1913_vm7 = vcmp.eq.s32.totalorder %v10400_v50, %v8519_v7 }
 0x5ca   : > { %6302 = vset.pattern.permute.xlu2 %v7778_v29  ;;  %6301 = vset.pattern.permute.xlu1 %v7718_v23 }
 0x5cc   : > { %v2357_v10 = vpop.permute.xlu2 %2356 }
 0x5cd   : > { %v2814_v17 = vsel %vm1910_vm4, %v2357_v10, 0.0 }
 0x5d2   : > { %2447 = vperm.xlu2 %6302, %v10379_v56   ;;  %2441 = vperm.xlu1 %6301, %v10379_v56  }
 0x5d4   : > { %v2333_v16 = vpop.permute.xlu1 %2332 }
 0x5d5   : > { %v2810_v51 = vsel %vm1906_vm12, %v2333_v16, 0.0 }
 0x5d6   : > { %v2953_v62 = vadd.f32 %v2952_v39, %v2810_v51  ;;  %v10401_v39 = vld [vmem:[#allocation155_spill] sm:$0xff] }
 0x5d7   : > { %vm1914_vm8 = vcmp.eq.s32.totalorder %v10401_v39, %v8519_v7 }
 0x5d8   : > { %v2954_v36 = vadd.f32 %v2953_v62, %v2811_v41  ;;  %v10402_v62 = vld [vmem:[#allocation59_spill] sm:$0xff] }
 0x5d9   : > { %v2817_v53 = vsel %vm1913_vm7, %v10402_v62, 0.0  ;;  %v10411_v62 = vld [vmem:[#allocation164_spill] sm:$0xff] }
 0x5da   : > { %6304 = vset.pattern.permute.xlu2 %v7730_v25  ;;  %6303 = vset.pattern.permute.xlu1 %v7733_v26 }
 0x5dc   : > { %v2370_v16 = vpop.permute.xlu2 %2369 }
 0x5e2   : > { %2459 = vperm.xlu2 %6304, %v10379_v56   ;;  %2453 = vperm.xlu1 %6303, %v10379_v56   ;;  %v10395_v56 = vld [vmem:[#allocation145_spill] sm:$0xff] }
 0x5e3   : > { %vm1908_vm1 = vcmp.eq.s32.totalorder %v10395_v56, %v8519_v7  ;;  %v10404_v56 = vld [vmem:[#allocation154_spill] sm:$0xff] }
 0x5e4   : > { %v2351_v37 = vpop.permute.xlu1 %2350  ;;  %v2812_v43 = vsel %vm1908_vm1, %v2345_v46, 0.0  ;;  %vm1915_vm10 = vcmp.eq.s32.totalorder %v10404_v56, %v8519_v7  ;;  %vm1922_vm1 = vcmp.eq.s32.totalorder %v10411_v62, %v8519_v7 }
 0x5e5   : > { %v2813_v22 = vsel %vm1909_vm15, %v2351_v37, 0.0  ;;  %v2955_v0 = vadd.f32 %v2954_v36, %v2812_v43  ;;  %v10403_v36 = vld [vmem:[#allocation108_spill] sm:$0xff] }
 0x5e6   : > { %vm1916_vm9 = vcmp.eq.s32.totalorder %v10403_v36, %v8519_v7 }
 0x5e7   : > { %v2956_v63 = vadd.f32 %v2955_v0, %v2813_v22 }
 0x5e9   : > { %v2957_v21 = vadd.f32 %v2956_v63, %v2814_v17 }
 0x5ea   : > { %6306 = vset.pattern.permute.xlu2 %v7635_v4  ;;  %6305 = vset.pattern.permute.xlu1 %v7638_v5 }
 0x5ec   : > { %v2388_v52 = vpop.permute.xlu2 %2387 }
 0x5ed   : > { %v2819_v43 = vsel %vm1915_vm10, %v2388_v52, 0.0 }
 0x5f2   : > { %2478 = vperm.xlu2 %6306, %v10398_v27   ;;  %2472 = vperm.xlu1 %6305, %v10398_v27  }
 0x5f4   : > { %v2363_v58 = vpop.permute.xlu1 %2362 }
 0x5f5   : > { %v2815_v15 = vsel %vm1911_vm3, %v2363_v58, 0.0  ;;  %v10406_v58 = vld [vmem:[#allocation156_spill] sm:$0xff] }
 0x5f6   : > { %v2958_v47 = vadd.f32 %v2957_v21, %v2815_v15  ;;  %vm1918_vm12 = vcmp.eq.s32.totalorder %v10406_v58, %v8519_v7  ;;  %v10407_v15 = vld [vmem:[#allocation161_spill] sm:$0xff] }
 0x5f7   : > { %vm1919_vm13 = vcmp.eq.s32.totalorder %v10407_v15, %v8519_v7 }
 0x5f8   : > { %v2959_v6 = vrot.slane %v2958_v47, 4 }
 0x5fa   : > { %v2960_v35 = vadd.f32 %v2959_v6, %v2958_v47  ;;  %6308 = vset.pattern.permute.xlu2 %v7632_v3  ;;  %6307 = vset.pattern.permute.xlu1 %v7655_v9  ;;  %v10408_v6 = vld [vmem:[#allocation69_spill] sm:$0xff] }
 0x5fc   : > { %v2961_v44 = vrot.slane %v2960_v35, 2  ;;  %v2400_v0 = vpop.permute.xlu2 %2399 }
 0x5fd   : > { %v2821_v17 = vsel %vm1917_vm11, %v2400_v0, 0.0 }
 0x5fe   : > { %v2962_v1 = vadd.f32 %v2961_v44, %v2960_v35  ;;  %v2822_v35 = vsel %vm1918_vm12, %v10408_v6, 0.0 }
 0x600   : > { %v2963_v34 = vrot.slane %v2962_v1, 1 }
 0x602   : > { %v2964_v54 = vadd.f32 %v2963_v34, %v2962_v1  ;;  %2490 = vperm.xlu2 %6308, %v10398_v27   ;;  %2484 = vperm.xlu1 %6307, %v10398_v27   ;;  %v10409_v34 = vld [vmem:[#allocation119_spill] sm:$0xff] }
 0x603   : > { %vm1921_vm14 = vcmp.eq.s32.totalorder %v10409_v34, %v8519_v7 }
 0x604   : > { %v8798_v59 = vsel %vm3061_vm5, %v2964_v54, %v8730_v45  ;;  %v2382_v42 = vpop.permute.xlu1 %2381  ;;  %v10399_v45 = vld [vmem:[#allocation152_spill] sm:$0xff] }
 0x605   : > { %vm1912_vm6 = vcmp.eq.s32.totalorder %v10399_v45, %v8519_v7  ;;  %v2818_v41 = vsel %vm1914_vm8, %v2382_v42, 0.0  ;;  %v10410_v42 = vld [vmem:[#allocation159_spill] sm:$0xff] }
 0x606   : > { %v2816_v51 = vsel %vm1912_vm6, %v2370_v16, 0.0  ;;  %vm1920_vm15 = vcmp.eq.s32.totalorder %v10410_v42, %v8519_v7 }
 0x607   : > { %v2965_v46 = vadd.f32 %v2817_v53, %v2816_v51 }
 0x609   : > { %v2966_v37 = vadd.f32 %v2965_v46, %v2818_v41  ;;  %v10412_v41 = vld [vmem:[#allocation162_spill] sm:$0xff] }
 0x60a   : > { %6310 = vset.pattern.permute.xlu2 %v7674_v13  ;;  %6309 = vset.pattern.permute.xlu1 %v7677_v14  ;;  %vm1923_vm3 = vcmp.eq.s32.totalorder %v10412_v41, %v8519_v7 }
 0x60b   : > { %v2967_v10 = vadd.f32 %v2966_v37, %v2819_v43 }
 0x60c   : > { %v2418_v47 = vpop.permute.xlu2 %2417 }
 0x60d   : > { %v2824_v45 = vsel %vm1920_vm15, %v2418_v47, 0.0  ;;  %v10418_v47 = vld [vmem:[#allocation172_spill] sm:$0xff] }
 0x60e   : > { %vm1927_vm8 = vcmp.eq.s32.totalorder %v10418_v47, %v8519_v7 }
 0x612   : > { %2508 = vperm.xlu2 %6310, %v10398_v27   ;;  %2502 = vperm.xlu1 %6309, %v10398_v27  }
 0x614   : > { %v2394_v48 = vpop.permute.xlu1 %2393 }
 0x615   : > { %v2820_v22 = vsel %vm1916_vm9, %v2394_v48, 0.0  ;;  %v10414_v48 = vld [vmem:[#allocation75_spill] sm:$0xff]  ;;  %vm3063_vm9 = vcmask 1044484  }
 0x616   : > { %v2968_v63 = vadd.f32 %v2967_v10, %v2820_v22  ;;  %v2827_v56 = vsel %vm1923_vm3, %v10414_v48, 0.0  ;;  %v10415_v10 = vld [vmem:[#allocation166_spill] sm:$0xff] }
 0x617   : > { %vm1925_vm6 = vcmp.eq.s32.totalorder %v10415_v10, %v8519_v7  ;;  %v10424_v10 = vld [vmem:[#allocation178_spill] sm:$0xff] }
 0x618   : > { %v2969_v21 = vadd.f32 %v2968_v63, %v2821_v17  ;;  %v10416_v63 = vld [vmem:[#allocation137_spill] sm:$0xff] }
 0x619   : > { %vm1926_vm7 = vcmp.eq.s32.totalorder %v10416_v63, %v8519_v7 }
 0x61a   : > { %6312 = vset.pattern.permute.xlu2 %v7699_v19  ;;  %6311 = vset.pattern.permute.xlu1 %v7763_v28  ;;  %v2970_v1 = vadd.f32 %v2969_v21, %v2822_v35 }
 0x61c   : > { %v2430_v51 = vpop.permute.xlu2 %2429 }
 0x61d   : > { %v2826_v53 = vsel %vm1922_vm1, %v2430_v51, 0.0 }
 0x622   : > { %2520 = vperm.xlu2 %6312, %v10398_v27   ;;  %2514 = vperm.xlu1 %6311, %v10398_v27  }
 0x624   : > { %v2412_v49 = vpop.permute.xlu1 %2411 }
 0x625   : > { %v2823_v44 = vsel %vm1919_vm13, %v2412_v49, 0.0 }
 0x626   : > { %v2971_v54 = vadd.f32 %v2970_v1, %v2823_v44 }
 0x628   : > { %v2972_v39 = vadd.f32 %v2971_v54, %v2824_v45 }
 0x62a   : > { %6314 = vset.pattern.permute.xlu2 %v7718_v23  ;;  %6313 = vset.pattern.permute.xlu1 %v7721_v24 }
 0x62c   : > { %v2448_v37 = vpop.permute.xlu2 %2447 }
 0x62d   : > { %v2829_v49 = vsel %vm1925_vm6, %v2448_v37, 0.0  ;;  %v10423_v37 = vld [vmem:[#allocation174_spill] sm:$0xff] }
 0x62e   : > { %vm1930_vm13 = vcmp.eq.s32.totalorder %v10423_v37, %v8519_v7  ;;  %v10433_v37 = vld [vmem:[#allocation94_spill] sm:$0xff] }
 0x632   : > { %2538 = vperm.xlu2 %6314, %v10398_v27   ;;  %2532 = vperm.xlu1 %6313, %v10398_v27  }
 0x634   : > { %v2424_v16 = vpop.permute.xlu1 %2423 }
 0x635   : > { %v2825_v50 = vsel %vm1921_vm14, %v2424_v16, 0.0  ;;  %vm1932_vm14 = vcmp.eq.s32.totalorder %v10424_v10, %v8519_v7  ;;  %v10435_v10 = vld [vmem:[#allocation104_spill] sm:$0xff] }
 0x636   : > { %v2973_v52 = vadd.f32 %v2972_v39, %v2825_v50  ;;  %v10419_v39 = vld [vmem:[#allocation170_spill] sm:$0xff] }
 0x637   : > { %vm1928_vm10 = vcmp.eq.s32.totalorder %v10419_v39, %v8519_v7 }
 0x638   : > { %v2974_v46 = vadd.f32 %v2973_v52, %v2826_v53  ;;  %v10420_v52 = vld [vmem:[#allocation175_spill] sm:$0xff]  ;;  %v10421_v53 = vld [vmem:[#allocation80_spill] sm:$0xff] }
 0x639   : > { %vm1929_vm11 = vcmp.eq.s32.totalorder %v10420_v52, %v8519_v7  ;;  %v2832_v41 = vsel %vm1928_vm10, %v10421_v53, 0.0  ;;  %v10431_v53 = vld [vmem:[#allocation181_spill] sm:$0xff] }
 0x63a   : > { %6316 = vset.pattern.permute.xlu2 %v7733_v26  ;;  %6315 = vset.pattern.permute.xlu1 %v7778_v29  ;;  %v2975_v22 = vadd.f32 %v2974_v46, %v2827_v56  ;;  %v10422_v46 = vld [vmem:[#allocation157_spill] sm:$0xff] }
 0x63b   : > { %vm1931_vm12 = vcmp.eq.s32.totalorder %v10422_v46, %v8519_v7 }
 0x63c   : > { %v2460_v17 = vpop.permute.xlu2 %2459 }
 0x63d   : > { %v2831_v35 = vsel %vm1927_vm8, %v2460_v17, 0.0 }
 0x642   : > { %2550 = vperm.xlu2 %6316, %v10398_v27   ;;  %2544 = vperm.xlu1 %6315, %v10398_v27   ;;  %v10413_v27 = vld [vmem:[#allocation168_spill] sm:$0xff] }
 0x643   : > { %vm1924_vm4 = vcmp.eq.s32.totalorder %v10413_v27, %v8519_v7 }
 0x644   : > { %v2442_v36 = vpop.permute.xlu1 %2441 }
 0x645   : > { %v2828_v43 = vsel %vm1924_vm4, %v2442_v36, 0.0 }
 0x646   : > { %v2976_v0 = vadd.f32 %v2975_v22, %v2828_v43 }
 0x648   : > { %v2977_v21 = vadd.f32 %v2976_v0, %v2829_v49  ;;  %v10425_v49 = vld [vmem:[#allocation176_spill] sm:$0xff] }
 0x649   : > { %vm1933_vm15 = vcmp.eq.s32.totalorder %v10425_v49, %v8519_v7 }
 0x64a   : > { %6318 = vset.pattern.permute.xlu2 %v7638_v5  ;;  %6317 = vset.pattern.permute.xlu1 %v7629_v2 }
 0x64c   : > { %v2479_v62 = vpop.permute.xlu2 %2478 }
 0x64d   : > { %v2834_v48 = vsel %vm1930_vm13, %v2479_v62, 0.0 }
 0x652   : > { %2569 = vperm.xlu2 %6318, %v10417_v20   ;;  %2563 = vperm.xlu1 %6317, %v10417_v20  }
 0x654   : > { %v2454_v58 = vpop.permute.xlu1 %2453 }
 0x655   : > { %v2830_v15 = vsel %vm1926_vm7, %v2454_v58, 0.0  ;;  %vm1938_vm7 = vcmp.eq.s32.totalorder %v10431_v53, %v8519_v7 }
 0x656   : > { %v2978_v6 = vadd.f32 %v2977_v21, %v2830_v15  ;;  %v10426_v21 = vld [vmem:[#allocation180_spill] sm:$0xff] }
 0x657   : > { %vm1934_vm1 = vcmp.eq.s32.totalorder %v10426_v21, %v8519_v7  ;;  %v10427_v15 = vld [vmem:[#allocation88_spill] sm:$0xff] }
 0x658   : > { %v2979_v44 = vadd.f32 %v2978_v6, %v2831_v35  ;;  %v2837_v47 = vsel %vm1933_vm15, %v10427_v15, 0.0  ;;  %v10436_v15 = vld [vmem:[#allocation187_spill] sm:$0xff] }
 0x65a   : > { %v2980_v1 = vrot.slane %v2979_v44, 4  ;;  %6320 = vset.pattern.permute.xlu2 %v7655_v9  ;;  %6319 = vset.pattern.permute.xlu1 %v7635_v4 }
 0x65c   : > { %v2981_v34 = vadd.f32 %v2980_v1, %v2979_v44  ;;  %v2491_v22 = vpop.permute.xlu2 %2490 }
 0x65d   : > { %v2836_v63 = vsel %vm1932_vm14, %v2491_v22, 0.0  ;;  %vm3065_vm14 = vcmask 1045509  }
 0x65e   : > { %v2982_v54 = vrot.slane %v2981_v34, 2 }
 0x660   : > { %v2983_v16 = vadd.f32 %v2982_v54, %v2981_v34  ;;  %v10428_v34 = vld [vmem:[#allocation179_spill] sm:$0xff] }
 0x661   : > { %vm1935_vm3 = vcmp.eq.s32.totalorder %v10428_v34, %v8519_v7  ;;  %v10429_v54 = vld [vmem:[#allocation183_spill] sm:$0xff] }
 0x662   : > { %v2984_v42 = vrot.slane %v2983_v16, 1  ;;  %2581 = vperm.xlu2 %6320, %v10417_v20   ;;  %2575 = vperm.xlu1 %6319, %v10417_v20   ;;  %vm1936_vm4 = vcmp.eq.s32.totalorder %v10429_v54, %v8519_v7 }
 0x664   : > { %v2985_v45 = vadd.f32 %v2984_v42, %v2983_v16  ;;  %v2473_v51 = vpop.permute.xlu1 %2472 }
 0x666   : > { %v8861_v50 = vsel %vm3063_vm9, %v2985_v45, %v8798_v59  ;;  %v2833_v59 = vsel %vm1929_vm11, %v2473_v51, 0.0  ;;  %vm1941_vm11 = vcmp.eq.s32.totalorder %v8461_v31, %v8519_v7 }
 0x667   : > { %v2986_v36 = vadd.f32 %v2833_v59, %v2832_v41  ;;  %v10430_v59 = vld [vmem:[#allocation182_spill] sm:$0xff] }
 0x668   : > { %vm1937_vm6 = vcmp.eq.s32.totalorder %v10430_v59, %v8519_v7  ;;  %v10439_v59 = vld [vmem:[#allocation190_spill] sm:$0xff] }
 0x669   : > { %v2987_v43 = vadd.f32 %v2986_v36, %v2834_v48  ;;  %v10432_v36 = vld [vmem:[#allocation185_spill] sm:$0xff]  ;;  %v2842_v48 = vsel %vm1938_vm7, %v10433_v37, 0.0  ;;  %vm1944_vm15 = vcmp.eq.s32.totalorder %v10439_v59, %v8519_v7 }
 0x66a   : > { %6322 = vset.pattern.permute.xlu2 %v7677_v14  ;;  %6321 = vset.pattern.permute.xlu1 %v7652_v8  ;;  %vm1939_vm8 = vcmp.eq.s32.totalorder %v10432_v36, %v8519_v7 }
 0x66c   : > { %v2509_v44 = vpop.permute.xlu2 %2508 }
 0x66d   : > { %v2839_v16 = vsel %vm1935_vm3, %v2509_v44, 0.0 }
 0x672   : > { %2599 = vperm.xlu2 %6322, %v10417_v20   ;;  %2593 = vperm.xlu1 %6321, %v10417_v20  }
 0x674   : > { %v2485_v27 = vpop.permute.xlu1 %2484 }
 0x675   : > { %v2835_v56 = vsel %vm1931_vm12, %v2485_v27, 0.0  ;;  %vm1942_vm12 = vcmp.eq.s32.totalorder %v10436_v15, %v8519_v7 }
 0x676   : > { %v2988_v0 = vadd.f32 %v2987_v43, %v2835_v56 }
 0x678   : > { %v2989_v17 = vadd.f32 %v2988_v0, %v2836_v63  ;;  %v10434_v0 = vld [vmem:[#allocation184_spill] sm:$0xff] }
 0x679   : > { %vm1940_vm10 = vcmp.eq.s32.totalorder %v10434_v0, %v8519_v7 }
 0x67a   : > { %6324 = vset.pattern.permute.xlu2 %v7763_v28  ;;  %6323 = vset.pattern.permute.xlu1 %v7674_v13  ;;  %v2990_v35 = vadd.f32 %v2989_v17, %v2837_v47  ;;  %v10437_v47 = vld [vmem:[#allocation186_spill] sm:$0xff] }
 0x67b   : > { %vm1943_vm13 = vcmp.eq.s32.totalorder %v10437_v47, %v8519_v7 }
 0x67c   : > { %v2521_v52 = vpop.permute.xlu2 %2520 }
 0x67d   : > { %v2841_v62 = vsel %vm1937_vm6, %v2521_v52, 0.0 }
 0x682   : > { %2611 = vperm.xlu2 %6324, %v10417_v20   ;;  %2605 = vperm.xlu1 %6323, %v10417_v20  }
 0x684   : > { %v2503_v58 = vpop.permute.xlu1 %2502 }
 0x685   : > { %v2838_v6 = vsel %vm1934_vm1, %v2503_v58, 0.0  ;;  %vm1946_vm1 = vcmp.eq.s32.totalorder %v8536_v30, %v8519_v7  ;;  %v10442_v30 = vld [vmem:[#allocation191_spill] sm:$0xff] }
 0x686   : > { %v2991_v1 = vadd.f32 %v2990_v35, %v2838_v6  ;;  %vm1948_vm6 = vcmp.eq.s32.totalorder %v10442_v30, %v8519_v7 }
 0x688   : > { %v2992_v45 = vadd.f32 %v2991_v1, %v2839_v16  ;;  %v10438_v1 = vld [vmem:[#allocation100_spill] sm:$0xff] }
 0x689   : > { %v2847_v31 = vsel %vm1943_vm13, %v10438_v1, 0.0 }
 0x68a   : > { %6326 = vset.pattern.permute.xlu2 %v7721_v24  ;;  %6325 = vset.pattern.permute.xlu1 %v7696_v18 }
 0x68c   : > { %v2539_v27 = vpop.permute.xlu2 %2538 }
 0x68d   : > { %v2844_v63 = vsel %vm1940_vm10, %v2539_v27, 0.0 }
 0x692   : > { %2629 = vperm.xlu2 %6326, %v10417_v20   ;;  %2623 = vperm.xlu1 %6325, %v10417_v20  }
 0x694   : > { %v2515_v42 = vpop.permute.xlu1 %2514 }
 0x695   : > { %v2840_v51 = vsel %vm1936_vm4, %v2515_v42, 0.0 }
 0x696   : > { %v2993_v39 = vadd.f32 %v2992_v45, %v2840_v51 }
 0x698   : > { %v2994_v41 = vadd.f32 %v2993_v39, %v2841_v62 }
 0x69a   : > { %6328 = vset.pattern.permute.xlu2 %v7778_v29  ;;  %6327 = vset.pattern.permute.xlu1 %v7718_v23  ;;  %v2995_v43 = vadd.f32 %v2994_v41, %v2842_v48  ;;  %v10440_v41 = vld [vmem:[#allocation189_spill] sm:$0xff] }
 0x69b   : > { %vm1945_vm3 = vcmp.eq.s32.totalorder %v10440_v41, %v8519_v7 }
 0x69c   : > { %v2551_v49 = vpop.permute.xlu2 %2550 }
 0x69d   : > { %v2846_v35 = vsel %vm1942_vm12, %v2551_v49, 0.0  ;;  %v10444_v49 = vld [vmem:[#allocation111_spill] sm:$0xff] }
 0x6a2   : > { %2641 = vperm.xlu2 %6328, %v10417_v20   ;;  %2635 = vperm.xlu1 %6327, %v10417_v20  }
 0x6a4   : > { %v2533_v46 = vpop.permute.xlu1 %2532 }
 0x6a5   : > { %v2843_v56 = vsel %vm1939_vm8, %v2533_v46, 0.0  ;;  %vm1951_vm8 = vcmp.eq.s32.totalorder %v8588_v60, %v8519_v7  ;;  %v10447_v60 = vld [vmem:[#allocation197_spill] sm:$0xff] }
 0x6a6   : > { %v2996_v22 = vadd.f32 %v2995_v43, %v2843_v56  ;;  %v10441_v56 = vld [vmem:[#allocation193_spill] sm:$0xff]  ;;  %vm1953_vm12 = vcmp.eq.s32.totalorder %v10447_v60, %v8519_v7  ;;  %v10457_v60 = vld [vmem:[#allocation204_spill] sm:$0xff] }
 0x6a7   : > { %vm1947_vm4 = vcmp.eq.s32.totalorder %v10441_v56, %v8519_v7 }
 0x6a8   : > { %v2997_v58 = vadd.f32 %v2996_v22, %v2844_v63  ;;  %v10443_v63 = vld [vmem:[#allocation195_spill] sm:$0xff] }
 0x6a9   : > { %vm1949_vm7 = vcmp.eq.s32.totalorder %v10443_v63, %v8519_v7  ;;  %v10454_v63 = vld [vmem:[#allocation143_spill] sm:$0xff] }
 0x6aa   : > { %6330 = vset.pattern.permute.xlu2 %v7629_v2  ;;  %6329 = vset.pattern.permute.xlu1 %v7730_v25 }
 0x6ac   : > { %v2570_v52 = vpop.permute.xlu2 %2569 }
 0x6ad   : > { %v2849_v46 = vsel %vm1945_vm3, %v2570_v52, 0.0 }
 0x6b2   : > { %2660 = vperm.xlu2 %6330, %v10435_v10   ;;  %2653 = vperm.xlu1 %6329, %v10417_v20  }
 0x6b4   : > { %v2545_v17 = vpop.permute.xlu1 %2544 }
 0x6b5   : > { %v2845_v21 = vsel %vm1941_vm11, %v2545_v17, 0.0  ;;  %v2852_v17 = vsel %vm1948_vm6, %v10444_v49, 0.0 }
 0x6b6   : > { %v2998_v6 = vadd.f32 %v2997_v58, %v2845_v21 }
 0x6b8   : > { %v2999_v44 = vadd.f32 %v2998_v6, %v2846_v35  ;;  %v10445_v35 = vld [vmem:[#allocation194_spill] sm:$0xff] }
 0x6b9   : > { %vm1950_vm10 = vcmp.eq.s32.totalorder %v10445_v35, %v8519_v7 }
 0x6ba   : > { %v3000_v34 = vadd.f32 %v2999_v44, %v2847_v31  ;;  %6332 = vset.pattern.permute.xlu2 %v7635_v4  ;;  %6331 = vset.pattern.permute.xlu1 %v7638_v5 }
 0x6bc   : > { %v3001_v20 = vrot.slane %v3000_v34, 4  ;;  %v2582_v37 = vpop.permute.xlu2 %2581 }
 0x6bd   : > { %v2851_v22 = vsel %vm1947_vm4, %v2582_v37, 0.0 }
 0x6be   : > { %v3002_v54 = vadd.f32 %v3001_v20, %v3000_v34 }
 0x6c0   : > { %v3003_v16 = vrot.slane %v3002_v54, 2 }
 0x6c2   : > { %v3004_v42 = vadd.f32 %v3003_v16, %v3002_v54  ;;  %2672 = vperm.xlu2 %6332, %v10435_v10   ;;  %2666 = vperm.xlu1 %6331, %v10435_v10   ;;  %v10446_v54 = vld [vmem:[#allocation198_spill] sm:$0xff] }
 0x6c3   : > { %vm1952_vm11 = vcmp.eq.s32.totalorder %v10446_v54, %v8519_v7 }
 0x6c4   : > { %v3005_v45 = vrot.slane %v3004_v42, 1 }
 0x6c6   : > { %v3006_v51 = vadd.f32 %v3005_v45, %v3004_v42 }
 0x6c8   : > { %v8925_v39 = vsel %vm3065_vm14, %v3006_v51, %v8861_v50  ;;  %v2564_v50 = vpop.permute.xlu1 %2563  ;;  %v10448_v51 = vld [vmem:[#allocation201_spill] sm:$0xff] }
 0x6c9   : > { %v2848_v53 = vsel %vm1944_vm15, %v2564_v50, 0.0  ;;  %vm1954_vm13 = vcmp.eq.s32.totalorder %v10448_v51, %v8519_v7  ;;  %v10449_v50 = vld [vmem:[#allocation124_spill] sm:$0xff]  ;;  %vm1956_vm15 = vcmp.eq.s32.totalorder %v8772_v32, %v8519_v7  ;;  %v10452_v32 = vld [vmem:[#allocation202_spill] sm:$0xff] }
 0x6ca   : > { %6334 = vset.pattern.permute.xlu2 %v7652_v8  ;;  %6333 = vset.pattern.permute.xlu1 %v7632_v3  ;;  %v3007_v27 = vadd.f32 %v2849_v46, %v2848_v53  ;;  %v2857_v52 = vsel %vm1953_vm12, %v10449_v50, 0.0  ;;  %vm1958_vm4 = vcmp.eq.s32.totalorder %v10452_v32, %v8519_v7  ;;  %v10463_v32 = vld [vmem:[#allocation208_spill] sm:$0xff] }
 0x6cb   : > { %v2862_v49 = vsel %vm1958_vm4, %v10454_v63, 0.0 }
 0x6cc   : > { %v2600_v21 = vpop.permute.xlu2 %2599 }
 0x6cd   : > { %v2854_v44 = vsel %vm1950_vm10, %v2600_v21, 0.0  ;;  %vm1960_vm10 = vcmp.eq.s32.totalorder %v10457_v60, %v8519_v7 }
 0x6d2   : > { %2690 = vperm.xlu2 %6334, %v10435_v10   ;;  %2684 = vperm.xlu1 %6333, %v10435_v10  }
 0x6d4   : > { %v2576_v62 = vpop.permute.xlu1 %2575 }
 0x6d5   : > { %v2850_v36 = vsel %vm1946_vm1, %v2576_v62, 0.0 }
 0x6d6   : > { %v3008_v48 = vadd.f32 %v3007_v27, %v2850_v36  ;;  %v10450_v36 = vld [vmem:[#allocation200_spill] sm:$0xff] }
 0x6d7   : > { %vm1955_vm1 = vcmp.eq.s32.totalorder %v10450_v36, %v8519_v7  ;;  %v10461_v36 = vld [vmem:[#allocation165_spill] sm:$0xff] }
 0x6d8   : > { %v3009_v0 = vadd.f32 %v3008_v48, %v2851_v22 }
 0x6da   : > { %6336 = vset.pattern.permute.xlu2 %v7674_v13  ;;  %6335 = vset.pattern.permute.xlu1 %v7677_v14  ;;  %v3010_v15 = vadd.f32 %v3009_v0, %v2852_v17  ;;  %v10453_v0 = vld [vmem:[#allocation160_spill] sm:$0xff]  ;;  %v10455_v17 = vld [vmem:[#allocation205_spill] sm:$0xff] }
 0x6db   : > { %vm1959_vm6 = vcmp.eq.s32.totalorder %v10455_v17, %v8519_v7 }
 0x6dc   : > { %v2612_v34 = vpop.permute.xlu2 %2611 }
 0x6dd   : > { %v2856_v42 = vsel %vm1952_vm11, %v2612_v34, 0.0 }
 0x6e2   : > { %2702 = vperm.xlu2 %6336, %v10435_v10   ;;  %2696 = vperm.xlu1 %6335, %v10435_v10  }
 0x6e4   : > { %v2594_v43 = vpop.permute.xlu1 %2593 }
 0x6e5   : > { %v2853_v58 = vsel %vm1949_vm7, %v2594_v43, 0.0  ;;  %v10451_v43 = vld [vmem:[#allocation203_spill] sm:$0xff]  ;;  %vm3067_vm7 = vcmask 1046534  }
 0x6e6   : > { %v3011_v47 = vadd.f32 %v3010_v15, %v2853_v58  ;;  %vm1957_vm3 = vcmp.eq.s32.totalorder %v10451_v43, %v8519_v7 }
 0x6e8   : > { %v3012_v31 = vadd.f32 %v3011_v47, %v2854_v44 }
 0x6ea   : > { %6338 = vset.pattern.permute.xlu2 %v7696_v18  ;;  %6337 = vset.pattern.permute.xlu1 %v7699_v19 }
 0x6ec   : > { %v2630_v62 = vpop.permute.xlu2 %2629 }
 0x6ed   : > { %v2859_v27 = vsel %vm1955_vm1, %v2630_v62, 0.0  ;;  %vm1965_vm1 = vcmp.eq.s32.totalorder %v10463_v32, %v8519_v7 }
 0x6f2   : > { %2720 = vperm.xlu2 %6338, %v10435_v10   ;;  %2714 = vperm.xlu1 %6337, %v10435_v10  }
 0x6f4   : > { %v2606_v6 = vpop.permute.xlu1 %2605 }
 0x6f5   : > { %v2855_v1 = vsel %vm1951_vm8, %v2606_v6, 0.0 }
 0x6f6   : > { %v3013_v20 = vadd.f32 %v3012_v31, %v2855_v1 }
 0x6f8   : > { %v3014_v45 = vadd.f32 %v3013_v20, %v2856_v42 }
 0x6fa   : > { %6340 = vset.pattern.permute.xlu2 %v7718_v23  ;;  %6339 = vset.pattern.permute.xlu1 %v7721_v24  ;;  %v3015_v53 = vadd.f32 %v3014_v45, %v2857_v52  ;;  %v10458_v52 = vld [vmem:[#allocation207_spill] sm:$0xff] }
 0x6fb   : > { %vm1962_vm11 = vcmp.eq.s32.totalorder %v10458_v52, %v8519_v7 }
 0x702   : > { %2732 = vperm.xlu2 %6340, %v10435_v10   ;;  %2726 = vperm.xlu1 %6339, %v10435_v10  }
 0x704   : > { %v2624_v16 = vpop.permute.xlu1 %2623 }
 0x705   : > { %v2858_v59 = vsel %vm1954_vm13, %v2624_v16, 0.0 }
 0x706   : > { %v3016_v41 = vadd.f32 %v3015_v53, %v2858_v59  ;;  %v10459_v53 = vld [vmem:[#allocation206_spill] sm:$0xff] }
 0x707   : > { %vm1963_vm12 = vcmp.eq.s32.totalorder %v10459_v53, %v8519_v7  ;;  %v10470_v53 = vld [vmem:[#allocation217_spill] sm:$0xff] }
 0x708   : > { %v3017_v48 = vadd.f32 %v3016_v41, %v2859_v27  ;;  %v2867_v27 = vsel %vm1963_vm12, %v10461_v36, 0.0 }
 0x70a   : > { %6342 = vset.pattern.permute.xlu2 %v7730_v25  ;;  %6341 = vset.pattern.permute.xlu1 %v7733_v26 }
 0x712   : > { %2750 = vperm.xlu2 %6342, %v10435_v10   ;;  %2744 = vperm.xlu1 %6341, %v10435_v10   ;;  %v2642_v10 = vpop.permute.xlu2 %2641 }
 0x713   : > { %v2861_v22 = vsel %vm1957_vm3, %v2642_v10, 0.0 }
 0x714   : > { %v2636_v46 = vpop.permute.xlu1 %2635 }
 0x715   : > { %v2860_v37 = vsel %vm1956_vm15, %v2636_v46, 0.0  ;;  %v10460_v46 = vld [vmem:[#allocation209_spill] sm:$0xff] }
 0x716   : > { %v3018_v56 = vadd.f32 %v3017_v48, %v2860_v37  ;;  %vm1964_vm13 = vcmp.eq.s32.totalorder %v10460_v46, %v8519_v7  ;;  %v10471_v46 = vld [vmem:[#allocation218_spill] sm:$0xff] }
 0x717   : > { %vm1973_vm12 = vcmp.eq.s32.totalorder %v10471_v46, %v8519_v7 }
 0x718   : > { %v3019_v30 = vadd.f32 %v3018_v56, %v2861_v22  ;;  %v10462_v56 = vld [vmem:[#allocation68_spill] sm:$0xff] }
 0x719   : > { %vm1966_vm15 = vcmp.eq.s32.totalorder %v10462_v56, %v8519_v7 }
 0x71a   : > { %6344 = vset.pattern.permute.xlu2 %v7638_v5  ;;  %6343 = vset.pattern.permute.xlu1 %v7629_v2  ;;  %v3020_v21 = vadd.f32 %v3019_v30, %v2862_v49  ;;  %v2661_v54 = vpop.permute.xlu2 %2660 }
 0x71b   : > { %v2864_v45 = vsel %vm1960_vm10, %v2661_v54, 0.0 }
 0x722   : > { %3087 = vperm.xlu2 %6344, %v10453_v0   ;;  %3081 = vperm.xlu1 %6343, %v10453_v0   ;;  %v2673_v51 = vpop.permute.xlu2 %2672 }
 0x723   : > { %v2866_v62 = vsel %vm1962_vm11, %v2673_v51, 0.0  ;;  %vm1972_vm11 = vcmp.eq.s32.totalorder %v10470_v53, %v8519_v7 }
 0x724   : > { %v2654_v58 = vpop.permute.xlu1 %2653 }
 0x725   : > { %v2863_v15 = vsel %vm1959_vm6, %v2654_v58, 0.0 }
 0x726   : > { %v3021_v47 = vadd.f32 %v3020_v21, %v2863_v15  ;;  %v10464_v21 = vld [vmem:[#allocation212_spill] sm:$0xff] }
 0x727   : > { %vm1967_vm3 = vcmp.eq.s32.totalorder %v10464_v21, %v8519_v7 }
 0x728   : > { %v3022_v6 = vrot.slane %v3021_v47, 4 }
 0x72a   : > { %v3023_v35 = vadd.f32 %v3022_v6, %v3021_v47  ;;  %6346 = vset.pattern.permute.xlu2 %v7632_v3  ;;  %6345 = vset.pattern.permute.xlu1 %v7655_v9  ;;  %v10465_v6 = vld [vmem:[#allocation211_spill] sm:$0xff] }
 0x72b   : > { %vm1968_vm4 = vcmp.eq.s32.totalorder %v10465_v6, %v8519_v7 }
 0x72c   : > { %v3024_v44 = vrot.slane %v3023_v35, 2  ;;  %v2691_v48 = vpop.permute.xlu2 %2690 }
 0x72d   : > { %v2869_v30 = vsel %vm1965_vm1, %v2691_v48, 0.0  ;;  %vm3069_vm1 = vcmask 1047559  }
 0x72e   : > { %v3025_v1 = vadd.f32 %v3024_v44, %v3023_v35  ;;  %v10466_v44 = vld [vmem:[#allocation215_spill] sm:$0xff] }
 0x72f   : > { %vm1969_vm6 = vcmp.eq.s32.totalorder %v10466_v44, %v8519_v7 }
 0x730   : > { %v3026_v31 = vrot.slane %v3025_v1, 1 }
 0x732   : > { %v3027_v34 = vadd.f32 %v3026_v31, %v3025_v1  ;;  %3105 = vperm.xlu2 %6346, %v10453_v0   ;;  %3099 = vperm.xlu1 %6345, %v10453_v0   ;;  %v10467_v1 = vld [vmem:[#allocation188_spill] sm:$0xff] }
 0x733   : > { %v2872_v31 = vsel %vm1968_vm4, %v10467_v1, 0.0 }
 0x734   : > { %v8992_v20 = vsel %vm3067_vm7, %v3027_v34, %v8925_v39  ;;  %v10456_v39 = vld [vmem:[#allocation58_spill] sm:$0xff]  ;;  %v2667_v16 = vpop.permute.xlu1 %2666 }
 0x735   : > { %vm1961_vm8 = vcmp.eq.s32.totalorder %v10456_v39, %v8519_v7 }
 0x736   : > { %v2865_v42 = vsel %vm1961_vm8, %v2667_v16, 0.0  ;;  %v10468_v16 = vld [vmem:[#allocation74_spill] sm:$0xff] }
 0x737   : > { %v3028_v50 = vadd.f32 %v2865_v42, %v2864_v45  ;;  %vm1971_vm8 = vcmp.eq.s32.totalorder %v10468_v16, %v8519_v7  ;;  %v10469_v45 = vld [vmem:[#allocation214_spill] sm:$0xff] }
 0x738   : > { %vm1970_vm10 = vcmp.eq.s32.totalorder %v10469_v45, %v8519_v7 }
 0x739   : > { %v3029_v41 = vadd.f32 %v3028_v50, %v2866_v62 }
 0x73a   : > { %6348 = vset.pattern.permute.xlu2 %v7677_v14  ;;  %6347 = vset.pattern.permute.xlu1 %v7652_v8 }
 0x73b   : > { %v3030_v10 = vadd.f32 %v3029_v41, %v2867_v27  ;;  %v10472_v27 = vld [vmem:[#allocation54_spill] sm:$0xff] }
 0x73c   : > { %v2703_v17 = vpop.permute.xlu2 %2702 }
 0x73d   : > { %v2871_v47 = vsel %vm1967_vm3, %v2703_v17, 0.0  ;;  %vm3854_vm3 = vcmp.eq.s32.totalorder %v8555_v55, %v8519_v7 }
 0x742   : > { %3117 = vperm.xlu2 %6348, %v10453_v0   ;;  %3111 = vperm.xlu1 %6347, %v10453_v0  }
 0x744   : > { %v2685_v59 = vpop.permute.xlu1 %2684 }
 0x745   : > { %v2868_v37 = vsel %vm1964_vm13, %v2685_v59, 0.0 }
 0x746   : > { %v3031_v43 = vadd.f32 %v3030_v10, %v2868_v37  ;;  %v10473_v37 = vld [vmem:[#allocation210_spill] sm:$0xff]  ;;  %v10474_v10 = vld [vmem:[#allocation220_spill] sm:$0xff] }
 0x747   : > { %v2877_v48 = vsel %vm1973_vm12, %v10473_v37, 0.0  ;;  %vm1974_vm13 = vcmp.eq.s32.totalorder %v10474_v10, %v8519_v7 }
 0x748   : > { %v3032_v49 = vadd.f32 %v3031_v43, %v2869_v30  ;;  %v10475_v30 = vld [vmem:[#allocation221_spill] sm:$0xff] }
 0x74a   : > { %6350 = vset.pattern.permute.xlu2 %v7699_v19  ;;  %6349 = vset.pattern.permute.xlu1 %v7763_v28 }
 0x74c   : > { %v2721_v54 = vpop.permute.xlu2 %2720 }
 0x74d   : > { %v2874_v51 = vsel %vm1970_vm10, %v2721_v54, 0.0  ;;  %v10479_v54 = vld [vmem:[#allocation163_spill] sm:$0xff] }
 0x752   : > { %3135 = vperm.xlu2 %6350, %v10453_v0   ;;  %3129 = vperm.xlu1 %6349, %v10453_v0  }
 0x754   : > { %v2697_v22 = vpop.permute.xlu1 %2696 }
 0x755   : > { %v2870_v63 = vsel %vm1966_vm15, %v2697_v22, 0.0  ;;  %vm1975_vm15 = vcmp.eq.s32.totalorder %v10475_v30, %v8519_v7 }
 0x756   : > { %v3033_v58 = vadd.f32 %v3032_v49, %v2870_v63 }
 0x758   : > { %v3034_v35 = vadd.f32 %v3033_v58, %v2871_v47 }
 0x75a   : > { %6352 = vset.pattern.permute.xlu2 %v7721_v24  ;;  %6351 = vset.pattern.permute.xlu1 %v7696_v18  ;;  %v3035_v39 = vadd.f32 %v3034_v35, %v2872_v31  ;;  %v2880_v35 = vld [vmem:[#allocation2] sm:$0xff]  ;;  %v10477_v31 = vld [vmem:[#allocation86_spill] sm:$0xff] }
 0x75c   : > { %v2733_v59 = vpop.permute.xlu2 %2732 }
 0x75d   : > { %v2876_v41 = vsel %vm1972_vm11, %v2733_v59, 0.0 }
 0x762   : > { %3147 = vperm.xlu2 %6352, %v10453_v0   ;;  %3141 = vperm.xlu1 %6351, %v10453_v0  }
 0x764   : > { %v2715_v15 = vpop.permute.xlu1 %2714 }
 0x765   : > { %v2873_v34 = vsel %vm1969_vm6, %v2715_v15, 0.0 }
 0x766   : > { %v3036_v42 = vadd.f32 %v3035_v39, %v2873_v34  ;;  %v10478_v34 = vld [vmem:[#allocation106_spill] sm:$0xff] }
 0x768   : > { %v3037_v52 = vadd.f32 %v3036_v42, %v2874_v51 }
 0x76a   : > { %6354 = vset.pattern.permute.xlu2 %v7733_v26  ;;  %6353 = vset.pattern.permute.xlu1 %v7778_v29 }
 0x76c   : > { %v2751_v56 = vpop.permute.xlu2 %2750 }
 0x76d   : > { %v2879_v49 = vsel %vm1975_vm15, %v2751_v56, 0.0 }
 0x772   : > { %3165 = vperm.xlu2 %6354, %v10453_v0   ;;  %3159 = vperm.xlu1 %6353, %v10453_v0  }
 0x774   : > { %v2727_v60 = vpop.permute.xlu1 %2726 }
 0x775   : > { %v2875_v50 = vsel %vm1971_vm8, %v2727_v60, 0.0 }
 0x776   : > { %v3038_v62 = vadd.f32 %v3037_v52, %v2875_v50 }
 0x778   : > { %v3039_v36 = vadd.f32 %v3038_v62, %v2876_v41 }
 0x77a   : > { %6356 = vset.pattern.permute.xlu2 %v7629_v2  ;;  %6355 = vset.pattern.permute.xlu1 %v7730_v25  ;;  %v3040_v22 = vadd.f32 %v3039_v36, %v2877_v48 }
 0x77c   : > { %v9159_v39 = vpop.permute.xlu2 %3087 }
 0x77d   : > { %vm3853_vm6 = vcmp.eq.s32.totalorder %v9159_v39, %v8519_v7 }
 0x782   : > { %3178 = vperm.xlu2 %6356, %v10472_v27   ;;  %3171 = vperm.xlu1 %6355, %v10453_v0  }
 0x784   : > { %v2745_v43 = vpop.permute.xlu1 %2744 }
 0x785   : > { %v2878_v32 = vsel %vm1974_vm13, %v2745_v43, 0.0  ;;  %vm3859_vm13 = vcmp.eq.s32.totalorder %v8598_v57, %v8519_v7  ;;  %v10554_v57 = vld [vmem:[#allocation131_spill] sm:$0xff] }
 0x786   : > { %v3041_v63 = vadd.f32 %v3040_v22, %v2878_v32  ;;  %v10480_v22 = vld [vmem:[#allocation55_spill] sm:$0xff] }
 0x788   : > { %v3042_v17 = vadd.f32 %v3041_v63, %v2879_v49 }
 0x78a   : > { %v3043_v58 = vrot.slane %v3042_v17, 4  ;;  %6358 = vset.pattern.permute.xlu2 %v7655_v9  ;;  %6357 = vset.pattern.permute.xlu1 %v7635_v4 }
 0x78c   : > { %v3044_v0 = vadd.f32 %v3043_v58, %v3042_v17  ;;  %v9165_v42 = vpop.permute.xlu2 %3105 }
 0x78d   : > { %vm3856_vm10 = vcmp.eq.s32.totalorder %v9165_v42, %v8519_v7 }
 0x78e   : > { %v3045_v21 = vrot.slane %v3044_v0, 2 }
 0x790   : > { %v3046_v15 = vadd.f32 %v3045_v21, %v3044_v0 }
 0x792   : > { %v3047_v47 = vrot.slane %v3046_v15, 1  ;;  %3196 = vperm.xlu2 %6358, %v10472_v27   ;;  %3190 = vperm.xlu1 %6357, %v10472_v27  }
 0x794   : > { %v3048_v6 = vadd.f32 %v3047_v47, %v3046_v15  ;;  %v9161_v16 = vpop.permute.xlu1 %3081 }
 0x795   : > { %vm3852_vm4 = vcmp.eq.s32.totalorder %v9161_v16, %v8519_v7 }
 0x796   : > { %v3070_v44 = vsel %vm3069_vm1, %v3048_v6, %v8992_v20  ;;  %v10476_v20 = vld [vmem:[#allocation62_spill] sm:$0xff] }
 0x797   : > { %v3072_v1 = vadd.f32 %v3070_v44, %v2880_v35 }
 0x799   : > { %3073 = vst [vmem:[#allocation2] sm:$0xff] %v3072_v1 }
 0x79a   : > { %6360 = vset.pattern.permute.xlu2 %v7652_v8  ;;  %6359 = vset.pattern.permute.xlu1 %v7632_v3 }
 0x79c   : > { %v9171_v45 = vpop.permute.xlu2 %3117 }
 0x79d   : > { %vm3858_vm12 = vcmp.eq.s32.totalorder %v9171_v45, %v8519_v7 }
 0x7a2   : > { %3208 = vperm.xlu2 %6360, %v10472_v27   ;;  %3202 = vperm.xlu1 %6359, %v10472_v27  }
 0x7a4   : > { %v9167_v60 = vpop.permute.xlu1 %3099 }
 0x7a5   : > { %vm3855_vm8 = vcmp.eq.s32.totalorder %v9167_v60, %v8519_v7 }
 0x7aa   : > { %6362 = vset.pattern.permute.xlu2 %v7763_v28  ;;  %6361 = vset.pattern.permute.xlu1 %v7674_v13 }
 0x7ac   : > { %v9177_v50 = vpop.permute.xlu2 %3135 }
 0x7b2   : > { %3226 = vperm.xlu2 %6362, %v10472_v27   ;;  %3220 = vperm.xlu1 %6361, %v10472_v27  }
 0x7b4   : > { %v9173_v51 = vpop.permute.xlu1 %3111 }
 0x7b5   : > { %vm3857_vm11 = vcmp.eq.s32.totalorder %v9173_v51, %v8519_v7 }
 0x7ba   : > { %6364 = vset.pattern.permute.xlu2 %v7696_v18  ;;  %6363 = vset.pattern.permute.xlu1 %v7699_v19 }
 0x7bc   : > { %v9183_v59 = vpop.permute.xlu2 %3147 }
 0x7c2   : > { %3238 = vperm.xlu2 %6364, %v10472_v27   ;;  %3232 = vperm.xlu1 %6363, %v10472_v27  }
 0x7c4   : > { %v9179_v52 = vpop.permute.xlu1 %3129 }
 0x7c5   : > { %vm3860_vm15 = vcmp.eq.s32.totalorder %v9179_v52, %v8519_v7 }
 0x7ca   : > { %6366 = vset.pattern.permute.xlu2 %v7778_v29  ;;  %6365 = vset.pattern.permute.xlu1 %v7718_v23 }
 0x7cc   : > { %v9189_v53 = vpop.permute.xlu2 %3165 }
 0x7d2   : > { %3256 = vperm.xlu2 %6366, %v10472_v27   ;;  %3250 = vperm.xlu1 %6365, %v10472_v27  }
 0x7d4   : > { %v9185_v62 = vpop.permute.xlu1 %3141 }
 0x7da   : > { %6368 = vset.pattern.permute.xlu2 %v7730_v25  ;;  %6367 = vset.pattern.permute.xlu1 %v7733_v26 }
 0x7dc   : > { %v9195_v46 = vpop.permute.xlu2 %3178 }
 0x7e2   : > { %3268 = vperm.xlu2 %6368, %v10472_v27   ;;  %3262 = vperm.xlu1 %6367, %v10472_v27  }
 0x7e4   : > { %v9191_v41 = vpop.permute.xlu1 %3159 }
 0x7ea   : > { %6370 = vset.pattern.permute.xlu2 %v7635_v4  ;;  %6369 = vset.pattern.permute.xlu1 %v7638_v5 }
 0x7ec   : > { %v9201_v27 = vpop.permute.xlu2 %3196 }
 0x7f2   : > { %3287 = vperm.xlu2 %6370, %v10476_v20   ;;  %3281 = vperm.xlu1 %6369, %v10476_v20  }
 0x7f4   : > { %v9197_v36 = vpop.permute.xlu1 %3171 }
 0x7fa   : > { %6372 = vset.pattern.permute.xlu2 %v7632_v3  ;;  %6371 = vset.pattern.permute.xlu1 %v7655_v9 }
 0x7fc   : > { %v9207_v48 = vpop.permute.xlu2 %3208 }
 0x802   : > { %3299 = vperm.xlu2 %6372, %v10476_v20   ;;  %3293 = vperm.xlu1 %6371, %v10476_v20  }
 0x804   : > { %v9203_v37 = vpop.permute.xlu1 %3190 }
 0x80a   : > { %6374 = vset.pattern.permute.xlu2 %v7674_v13  ;;  %6373 = vset.pattern.permute.xlu1 %v7677_v14 }
 0x80c   : > { %v9213_v56 = vpop.permute.xlu2 %3226 }
 0x812   : > { %3317 = vperm.xlu2 %6374, %v10476_v20   ;;  %3311 = vperm.xlu1 %6373, %v10476_v20  }
 0x814   : > { %v9209_v10 = vpop.permute.xlu1 %3202 }
 0x81a   : > { %6376 = vset.pattern.permute.xlu2 %v7699_v19  ;;  %6375 = vset.pattern.permute.xlu1 %v7763_v28 }
 0x81c   : > { %v9219_v32 = vpop.permute.xlu2 %3238 }
 0x822   : > { %3329 = vperm.xlu2 %6376, %v10476_v20   ;;  %3323 = vperm.xlu1 %6375, %v10476_v20  }
 0x824   : > { %v9215_v43 = vpop.permute.xlu1 %3220 }
 0x82a   : > { %6378 = vset.pattern.permute.xlu2 %v7718_v23  ;;  %6377 = vset.pattern.permute.xlu1 %v7721_v24 }
 0x82c   : > { %v9225_v63 = vpop.permute.xlu2 %3256 }
 0x832   : > { %3347 = vperm.xlu2 %6378, %v10476_v20   ;;  %3341 = vperm.xlu1 %6377, %v10476_v20  }
 0x834   : > { %v9221_v30 = vpop.permute.xlu1 %3232 }
 0x83a   : > { %6380 = vset.pattern.permute.xlu2 %v7733_v26  ;;  %6379 = vset.pattern.permute.xlu1 %v7778_v29 }
 0x83c   : > { %v9231_v17 = vpop.permute.xlu2 %3268 }
 0x842   : > { %3359 = vperm.xlu2 %6380, %v10476_v20   ;;  %3353 = vperm.xlu1 %6379, %v10476_v20  }
 0x844   : > { %v9227_v49 = vpop.permute.xlu1 %3250 }
 0x84a   : > { %6382 = vset.pattern.permute.xlu2 %v7638_v5  ;;  %6381 = vset.pattern.permute.xlu1 %v7629_v2 }
 0x84c   : > { %v9237_v0 = vpop.permute.xlu2 %3287 }
 0x852   : > { %3378 = vperm.xlu2 %6382, %v10477_v31   ;;  %3372 = vperm.xlu1 %6381, %v10477_v31  }
 0x854   : > { %v9233_v58 = vpop.permute.xlu1 %3262 }
 0x85a   : > { %6384 = vset.pattern.permute.xlu2 %v7655_v9  ;;  %6383 = vset.pattern.permute.xlu1 %v7635_v4 }
 0x85c   : > { %v9243_v15 = vpop.permute.xlu2 %3299 }
 0x862   : > { %3390 = vperm.xlu2 %6384, %v10477_v31   ;;  %3384 = vperm.xlu1 %6383, %v10477_v31  }
 0x864   : > { %v9239_v21 = vpop.permute.xlu1 %3281 }
 0x86a   : > { %6386 = vset.pattern.permute.xlu2 %v7677_v14  ;;  %6385 = vset.pattern.permute.xlu1 %v7652_v8 }
 0x86c   : > { %v9249_v6 = vpop.permute.xlu2 %3317 }
 0x872   : > { %3408 = vperm.xlu2 %6386, %v10477_v31   ;;  %3402 = vperm.xlu1 %6385, %v10477_v31  }
 0x874   : > { %v9245_v47 = vpop.permute.xlu1 %3293 }
 0x87a   : > { %6388 = vset.pattern.permute.xlu2 %v7763_v28  ;;  %6387 = vset.pattern.permute.xlu1 %v7674_v13 }
 0x87c   : > { %v9255_v44 = vpop.permute.xlu2 %3329 }
 0x87d   : > { %10481 = vst [vmem:[#allocation107_spill] sm:$0xff] %v9255_v44 }
 0x882   : > { %3420 = vperm.xlu2 %6388, %v10477_v31   ;;  %3414 = vperm.xlu1 %6387, %v10477_v31  }
 0x884   : > { %v9251_v35 = vpop.permute.xlu1 %3311 }
 0x88a   : > { %6390 = vset.pattern.permute.xlu2 %v7721_v24  ;;  %6389 = vset.pattern.permute.xlu1 %v7696_v18 }
 0x88c   : > { %v9261_v20 = vpop.permute.xlu2 %3347 }
 0x88d   : > { %10482 = vst [vmem:[#allocation115_spill] sm:$0xff] %v9261_v20  ;;  %v10496_v20 = vld [vmem:[#allocation63_spill] sm:$0xff] }
 0x892   : > { %3438 = vperm.xlu2 %6390, %v10477_v31   ;;  %3432 = vperm.xlu1 %6389, %v10477_v31  }
 0x894   : > { %v9257_v1 = vpop.permute.xlu1 %3323 }
 0x89a   : > { %6392 = vset.pattern.permute.xlu2 %v7778_v29  ;;  %6391 = vset.pattern.permute.xlu1 %v7718_v23 }
 0x8a2   : > { %3450 = vperm.xlu2 %6392, %v10477_v31   ;;  %3444 = vperm.xlu1 %6391, %v10477_v31  }
 0x8aa   : > { %6394 = vset.pattern.permute.xlu2 %v7629_v2  ;;  %6393 = vset.pattern.permute.xlu1 %v7730_v25 }
 0x8b2   : > { %3469 = vperm.xlu2 %6394, %v10478_v34   ;;  %3462 = vperm.xlu1 %6393, %v10477_v31   ;;  %v9263_v31 = vpop.permute.xlu1 %3341 }
 0x8b3   : > { %10483 = vst [vmem:[#allocation105_spill] sm:$0xff] %v9263_v31 }
 0x8ba   : > { %6396 = vset.pattern.permute.xlu2 %v7635_v4  ;;  %6395 = vset.pattern.permute.xlu1 %v7638_v5 }
 0x8c2   : > { %3481 = vperm.xlu2 %6396, %v10478_v34   ;;  %3475 = vperm.xlu1 %6395, %v10478_v34  }
 0x8ca   : > { %6398 = vset.pattern.permute.xlu2 %v7652_v8  ;;  %6397 = vset.pattern.permute.xlu1 %v7632_v3 }
 0x8d2   : > { %3499 = vperm.xlu2 %6398, %v10478_v34   ;;  %3493 = vperm.xlu1 %6397, %v10478_v34  }
 0x8da   : > { %6400 = vset.pattern.permute.xlu2 %v7674_v13  ;;  %6399 = vset.pattern.permute.xlu1 %v7677_v14 }
 0x8e2   : > { %3511 = vperm.xlu2 %6400, %v10478_v34   ;;  %3505 = vperm.xlu1 %6399, %v10478_v34  }
 0x8ea   : > { %6402 = vset.pattern.permute.xlu2 %v7696_v18  ;;  %6401 = vset.pattern.permute.xlu1 %v7699_v19 }
 0x8f2   : > { %3529 = vperm.xlu2 %6402, %v10478_v34   ;;  %3523 = vperm.xlu1 %6401, %v10478_v34  }
 0x8fa   : > { %6404 = vset.pattern.permute.xlu2 %v7718_v23  ;;  %6403 = vset.pattern.permute.xlu1 %v7721_v24 }
 0x902   : > { %3541 = vperm.xlu2 %6404, %v10478_v34   ;;  %3535 = vperm.xlu1 %6403, %v10478_v34  }
 0x90a   : > { %6406 = vset.pattern.permute.xlu2 %v7730_v25  ;;  %6405 = vset.pattern.permute.xlu1 %v7733_v26 }
 0x912   : > { %3559 = vperm.xlu2 %6406, %v10478_v34   ;;  %3553 = vperm.xlu1 %6405, %v10478_v34   ;;  %v9267_v34 = vpop.permute.xlu2 %3359 }
 0x913   : > { %10484 = vst [vmem:[#allocation114_spill] sm:$0xff] %v9267_v34 }
 0x91a   : > { %6408 = vset.pattern.permute.xlu2 %v7638_v5  ;;  %6407 = vset.pattern.permute.xlu1 %v7629_v2  ;;  %v9273_v61 = vpop.permute.xlu2 %3378 }
 0x91b   : > { %10486 = vst [vmem:[#allocation118_spill] sm:$0xff] %v9273_v61 }
 0x922   : > { %3572 = vperm.xlu2 %6408, %v10479_v54   ;;  %3566 = vperm.xlu1 %6407, %v10479_v54   ;;  %v9279_v12 = vpop.permute.xlu2 %3390 }
 0x923   : > { %10488 = vst [vmem:[#allocation117_spill] sm:$0xff] %v9279_v12 }
 0x92a   : > { %6410 = vset.pattern.permute.xlu2 %v7632_v3  ;;  %6409 = vset.pattern.permute.xlu1 %v7655_v9  ;;  %v9285_v34 = vpop.permute.xlu2 %3408 }
 0x92b   : > { %10490 = vst [vmem:[#allocation123_spill] sm:$0xff] %v9285_v34 }
 0x932   : > { %3590 = vperm.xlu2 %6410, %v10479_v54   ;;  %3584 = vperm.xlu1 %6409, %v10479_v54  }
 0x93a   : > { %6412 = vset.pattern.permute.xlu2 %v7677_v14  ;;  %6411 = vset.pattern.permute.xlu1 %v7652_v8 }
 0x942   : > { %3602 = vperm.xlu2 %6412, %v10479_v54   ;;  %3596 = vperm.xlu1 %6411, %v10479_v54  }
 0x94a   : > { %6414 = vset.pattern.permute.xlu2 %v7699_v19  ;;  %6413 = vset.pattern.permute.xlu1 %v7763_v28 }
 0x952   : > { %3620 = vperm.xlu2 %6414, %v10479_v54   ;;  %3614 = vperm.xlu1 %6413, %v10479_v54  }
 0x95a   : > { %6416 = vset.pattern.permute.xlu2 %v7721_v24  ;;  %6415 = vset.pattern.permute.xlu1 %v7696_v18 }
 0x962   : > { %3632 = vperm.xlu2 %6416, %v10479_v54   ;;  %3626 = vperm.xlu1 %6415, %v10479_v54  }
 0x96a   : > { %6418 = vset.pattern.permute.xlu2 %v7733_v26  ;;  %6417 = vset.pattern.permute.xlu1 %v7778_v29 }
 0x972   : > { %3650 = vperm.xlu2 %6418, %v10479_v54   ;;  %3644 = vperm.xlu1 %6417, %v10479_v54  }
 0x97a   : > { %6420 = vset.pattern.permute.xlu2 %v7629_v2  ;;  %6419 = vset.pattern.permute.xlu1 %v7730_v25 }
 0x982   : > { %3663 = vperm.xlu2 %6420, %v10480_v22   ;;  %3656 = vperm.xlu1 %6419, %v10479_v54   ;;  %v9269_v54 = vpop.permute.xlu1 %3353 }
 0x983   : > { %10485 = vst [vmem:[#allocation99_spill] sm:$0xff] %v9269_v54 }
 0x98a   : > { %6422 = vset.pattern.permute.xlu2 %v7655_v9  ;;  %6421 = vset.pattern.permute.xlu1 %v7635_v4  ;;  %v9275_v38 = vpop.permute.xlu1 %3372 }
 0x98b   : > { %10487 = vst [vmem:[#allocation57_spill] sm:$0xff] %v9275_v38  ;;  %v9291_v38 = vpop.permute.xlu2 %3420 }
 0x98c   : > { %10492 = vst [vmem:[#allocation67_spill] sm:$0xff] %v9291_v38 }
 0x992   : > { %3681 = vperm.xlu2 %6422, %v10480_v22   ;;  %3675 = vperm.xlu1 %6421, %v10480_v22   ;;  %v9281_v33 = vpop.permute.xlu1 %3384 }
 0x993   : > { %10489 = vst [vmem:[#allocation121_spill] sm:$0xff] %v9281_v33  ;;  %v9297_v12 = vpop.permute.xlu2 %3438 }
 0x994   : > { %10494 = vst [vmem:[#allocation126_spill] sm:$0xff] %v9297_v12 }
 0x99a   : > { %6424 = vset.pattern.permute.xlu2 %v7652_v8  ;;  %6423 = vset.pattern.permute.xlu1 %v7632_v3  ;;  %v9287_v54 = vpop.permute.xlu1 %3402 }
 0x99b   : > { %10491 = vst [vmem:[#allocation120_spill] sm:$0xff] %v9287_v54  ;;  %v9303_v34 = vpop.permute.xlu2 %3450 }
 0x99c   : > { %10497 = vst [vmem:[#allocation129_spill] sm:$0xff] %v9303_v34 }
 0x9a2   : > { %3693 = vperm.xlu2 %6424, %v10480_v22   ;;  %3687 = vperm.xlu1 %6423, %v10480_v22   ;;  %v9293_v61 = vpop.permute.xlu1 %3414 }
 0x9a3   : > { %10493 = vst [vmem:[#allocation122_spill] sm:$0xff] %v9293_v61  ;;  %v10521_v61 = vld [vmem:[#allocation87_spill] sm:$0xff] }
 0x9aa   : > { %6426 = vset.pattern.permute.xlu2 %v7763_v28  ;;  %6425 = vset.pattern.permute.xlu1 %v7674_v13  ;;  %v9299_v33 = vpop.permute.xlu1 %3432 }
 0x9ab   : > { %10495 = vst [vmem:[#allocation125_spill] sm:$0xff] %v9299_v33 }
 0x9b2   : > { %3711 = vperm.xlu2 %6426, %v10480_v22   ;;  %3705 = vperm.xlu1 %6425, %v10480_v22   ;;  %v9305_v54 = vpop.permute.xlu1 %3444 }
 0x9b3   : > { %10498 = vst [vmem:[#allocation73_spill] sm:$0xff] %v9305_v54 }
 0x9ba   : > { %6428 = vset.pattern.permute.xlu2 %v7696_v18  ;;  %6427 = vset.pattern.permute.xlu1 %v7699_v19  ;;  %v9311_v38 = vpop.permute.xlu1 %3462 }
 0x9bb   : > { %10500 = vst [vmem:[#allocation130_spill] sm:$0xff] %v9311_v38 }
 0x9c2   : > { %3723 = vperm.xlu2 %6428, %v10480_v22   ;;  %3717 = vperm.xlu1 %6427, %v10480_v22   ;;  %v9317_v33 = vpop.permute.xlu1 %3475 }
 0x9c3   : > { %10502 = vst [vmem:[#allocation133_spill] sm:$0xff] %v9317_v33 }
 0x9ca   : > { %6430 = vset.pattern.permute.xlu2 %v7778_v29  ;;  %6429 = vset.pattern.permute.xlu1 %v7718_v23  ;;  %v9323_v54 = vpop.permute.xlu1 %3493 }
 0x9cb   : > { %10504 = vst [vmem:[#allocation79_spill] sm:$0xff] %v9323_v54 }
 0x9d2   : > { %3741 = vperm.xlu2 %6430, %v10480_v22   ;;  %3735 = vperm.xlu1 %6429, %v10480_v22   ;;  %v9329_v38 = vpop.permute.xlu1 %3505 }
 0x9d3   : > { %10506 = vst [vmem:[#allocation139_spill] sm:$0xff] %v9329_v38 }
 0x9da   : > { %6432 = vset.pattern.permute.xlu2 %v7730_v25  ;;  %6431 = vset.pattern.permute.xlu1 %v7733_v26  ;;  %v9335_v33 = vpop.permute.xlu1 %3523 }
 0x9db   : > { %10508 = vst [vmem:[#allocation85_spill] sm:$0xff] %v9335_v33 }
 0x9e2   : > { %3753 = vperm.xlu2 %6432, %v10480_v22   ;;  %3747 = vperm.xlu1 %6431, %v10480_v22   ;;  %v9309_v22 = vpop.permute.xlu2 %3469  ;;  %v9341_v54 = vpop.permute.xlu1 %3535 }
 0x9e3   : > { %10499 = vst [vmem:[#allocation127_spill] sm:$0xff] %v9309_v22 }
 0x9e4   : > { %10510 = vst [vmem:[#allocation141_spill] sm:$0xff] %v9341_v54 }
 0x9ea   : > { %6434 = vset.pattern.permute.xlu2 %v7635_v4  ;;  %6433 = vset.pattern.permute.xlu1 %v7638_v5  ;;  %v9315_v12 = vpop.permute.xlu2 %3481  ;;  %v9347_v38 = vpop.permute.xlu1 %3553 }
 0x9eb   : > { %10501 = vst [vmem:[#allocation53_spill] sm:$0xff] %v9315_v12 }
 0x9ec   : > { %10512 = vst [vmem:[#allocation140_spill] sm:$0xff] %v9347_v38 }
 0x9f2   : > { %3772 = vperm.xlu2 %6434, %v10496_v20   ;;  %3766 = vperm.xlu1 %6433, %v10496_v20   ;;  %v9321_v34 = vpop.permute.xlu2 %3499  ;;  %v9353_v33 = vpop.permute.xlu1 %3566 }
 0x9f3   : > { %10503 = vst [vmem:[#allocation132_spill] sm:$0xff] %v9321_v34 }
 0x9f4   : > { %10514 = vst [vmem:[#allocation142_spill] sm:$0xff] %v9353_v33 }
 0x9fa   : > { %6436 = vset.pattern.permute.xlu2 %v7632_v3  ;;  %6435 = vset.pattern.permute.xlu1 %v7655_v9  ;;  %v9327_v22 = vpop.permute.xlu2 %3511  ;;  %v9359_v54 = vpop.permute.xlu1 %3584 }
 0x9fb   : > { %10505 = vst [vmem:[#allocation136_spill] sm:$0xff] %v9327_v22 }
 0x9fc   : > { %10516 = vst [vmem:[#allocation149_spill] sm:$0xff] %v9359_v54 }
 0xa02   : > { %3784 = vperm.xlu2 %6436, %v10496_v20   ;;  %3778 = vperm.xlu1 %6435, %v10496_v20   ;;  %v9333_v12 = vpop.permute.xlu2 %3529 }
 0xa03   : > { %10507 = vst [vmem:[#allocation135_spill] sm:$0xff] %v9333_v12 }
 0xa0a   : > { %6438 = vset.pattern.permute.xlu2 %v7674_v13  ;;  %6437 = vset.pattern.permute.xlu1 %v7677_v14  ;;  %v9339_v34 = vpop.permute.xlu2 %3541 }
 0xa0b   : > { %10509 = vst [vmem:[#allocation138_spill] sm:$0xff] %v9339_v34 }
 0xa12   : > { %3802 = vperm.xlu2 %6438, %v10496_v20   ;;  %3796 = vperm.xlu1 %6437, %v10496_v20   ;;  %v9345_v22 = vpop.permute.xlu2 %3559 }
 0xa13   : > { %10511 = vst [vmem:[#allocation144_spill] sm:$0xff] %v9345_v22  ;;  %v9365_v22 = vpop.permute.xlu1 %3596 }
 0xa14   : > { %10518 = vst [vmem:[#allocation98_spill] sm:$0xff] %v9365_v22  ;;  %v10546_v22 = vld [vmem:[#allocation109_spill] sm:$0xff] }
 0xa1a   : > { %6440 = vset.pattern.permute.xlu2 %v7699_v19  ;;  %6439 = vset.pattern.permute.xlu1 %v7763_v28  ;;  %v9351_v12 = vpop.permute.xlu2 %3572 }
 0xa1b   : > { %10513 = vst [vmem:[#allocation93_spill] sm:$0xff] %v9351_v12  ;;  %v9371_v12 = vpop.permute.xlu1 %3614 }
 0xa1c   : > { %10520 = vst [vmem:[#allocation60_spill] sm:$0xff] %v9371_v12 }
 0xa22   : > { %3814 = vperm.xlu2 %6440, %v10496_v20   ;;  %3808 = vperm.xlu1 %6439, %v10496_v20   ;;  %v9357_v34 = vpop.permute.xlu2 %3590 }
 0xa23   : > { %10515 = vst [vmem:[#allocation146_spill] sm:$0xff] %v9357_v34  ;;  %v9377_v54 = vpop.permute.xlu1 %3626 }
 0xa24   : > { %10523 = vst [vmem:[#allocation151_spill] sm:$0xff] %v9377_v54 }
 0xa2a   : > { %6442 = vset.pattern.permute.xlu2 %v7718_v23  ;;  %6441 = vset.pattern.permute.xlu1 %v7721_v24  ;;  %v9363_v38 = vpop.permute.xlu2 %3602 }
 0xa2b   : > { %10517 = vst [vmem:[#allocation145_spill] sm:$0xff] %v9363_v38  ;;  %v9383_v38 = vpop.permute.xlu1 %3644 }
 0xa2c   : > { %10525 = vst [vmem:[#allocation59_spill] sm:$0xff] %v9383_v38 }
 0xa32   : > { %3832 = vperm.xlu2 %6442, %v10496_v20   ;;  %3826 = vperm.xlu1 %6441, %v10496_v20   ;;  %v9369_v33 = vpop.permute.xlu2 %3620 }
 0xa33   : > { %10519 = vst [vmem:[#allocation148_spill] sm:$0xff] %v9369_v33  ;;  %v9389_v12 = vpop.permute.xlu1 %3656 }
 0xa34   : > { %10527 = vst [vmem:[#allocation154_spill] sm:$0xff] %v9389_v12 }
 0xa3a   : > { %6444 = vset.pattern.permute.xlu2 %v7733_v26  ;;  %6443 = vset.pattern.permute.xlu1 %v7778_v29  ;;  %v9375_v34 = vpop.permute.xlu2 %3632 }
 0xa3b   : > { %10522 = vst [vmem:[#allocation152_spill] sm:$0xff] %v9375_v34  ;;  %v9395_v54 = vpop.permute.xlu1 %3675 }
 0xa3c   : > { %10529 = vst [vmem:[#allocation156_spill] sm:$0xff] %v9395_v54 }
 0xa42   : > { %3844 = vperm.xlu2 %6444, %v10496_v20   ;;  %3838 = vperm.xlu1 %6443, %v10496_v20   ;;  %v9381_v20 = vpop.permute.xlu2 %3650 }
 0xa43   : > { %10524 = vst [vmem:[#allocation155_spill] sm:$0xff] %v9381_v20  ;;  %v9401_v38 = vpop.permute.xlu1 %3687 }
 0xa44   : > { %10531 = vst [vmem:[#allocation69_spill] sm:$0xff] %v9401_v38 }
 0xa4a   : > { %6446 = vset.pattern.permute.xlu2 %v7638_v5  ;;  %6445 = vset.pattern.permute.xlu1 %v7629_v2  ;;  %v9387_v33 = vpop.permute.xlu2 %3663 }
 0xa4b   : > { %10526 = vst [vmem:[#allocation108_spill] sm:$0xff] %v9387_v33  ;;  %v9407_v12 = vpop.permute.xlu1 %3705 }
 0xa4c   : > { %10533 = vst [vmem:[#allocation159_spill] sm:$0xff] %v9407_v12 }
 0xa52   : > { %3991 = vperm.xlu2 %6446, %v10521_v61   ;;  %3985 = vperm.xlu1 %6445, %v10521_v61   ;;  %v9393_v34 = vpop.permute.xlu2 %3681 }
 0xa53   : > { %10528 = vst [vmem:[#allocation158_spill] sm:$0xff] %v9393_v34  ;;  %v9413_v54 = vpop.permute.xlu1 %3717 }
 0xa54   : > { %10535 = vst [vmem:[#allocation162_spill] sm:$0xff] %v9413_v54 }
 0xa5a   : > { %6448 = vset.pattern.permute.xlu2 %v7655_v9  ;;  %6447 = vset.pattern.permute.xlu1 %v7635_v4  ;;  %v9399_v20 = vpop.permute.xlu2 %3693 }
 0xa5b   : > { %10530 = vst [vmem:[#allocation161_spill] sm:$0xff] %v9399_v20  ;;  %v9419_v38 = vpop.permute.xlu1 %3735 }
 0xa5c   : > { %10537 = vst [vmem:[#allocation75_spill] sm:$0xff] %v9419_v38 }
 0xa62   : > { %4003 = vperm.xlu2 %6448, %v10521_v61   ;;  %3997 = vperm.xlu1 %6447, %v10521_v61   ;;  %v9405_v33 = vpop.permute.xlu2 %3711 }
 0xa63   : > { %10532 = vst [vmem:[#allocation119_spill] sm:$0xff] %v9405_v33  ;;  %v9425_v12 = vpop.permute.xlu1 %3747 }
 0xa64   : > { %10539 = vst [vmem:[#allocation137_spill] sm:$0xff] %v9425_v12 }
 0xa6a   : > { %6450 = vset.pattern.permute.xlu2 %v7677_v14  ;;  %6449 = vset.pattern.permute.xlu1 %v7652_v8  ;;  %v9411_v34 = vpop.permute.xlu2 %3723 }
 0xa6b   : > { %10534 = vst [vmem:[#allocation164_spill] sm:$0xff] %v9411_v34  ;;  %v9431_v54 = vpop.permute.xlu1 %3766 }
 0xa6c   : > { %10541 = vst [vmem:[#allocation172_spill] sm:$0xff] %v9431_v54 }
 0xa72   : > { %4021 = vperm.xlu2 %6450, %v10521_v61   ;;  %4015 = vperm.xlu1 %6449, %v10521_v61   ;;  %v9417_v20 = vpop.permute.xlu2 %3741 }
 0xa73   : > { %10536 = vst [vmem:[#allocation168_spill] sm:$0xff] %v9417_v20 }
 0xa74   : > { %v9437_v38 = vpop.permute.xlu1 %3778 }
 0xa75   : > { %10543 = vst [vmem:[#allocation175_spill] sm:$0xff] %v9437_v38 }
 0xa7a   : > { %6452 = vset.pattern.permute.xlu2 %v7763_v28  ;;  %6451 = vset.pattern.permute.xlu1 %v7674_v13  ;;  %v9423_v33 = vpop.permute.xlu2 %3753 }
 0xa7b   : > { %10538 = vst [vmem:[#allocation166_spill] sm:$0xff] %v9423_v33 }
 0xa82   : > { %4033 = vperm.xlu2 %6452, %v10521_v61   ;;  %4027 = vperm.xlu1 %6451, %v10521_v61   ;;  %v9429_v34 = vpop.permute.xlu2 %3772 }
 0xa83   : > { %10540 = vst [vmem:[#allocation84_spill] sm:$0xff] %v9429_v34 }
 0xa84   : > { %v9443_v12 = vpop.permute.xlu1 %3796 }
 0xa85   : > { %10545 = vst [vmem:[#allocation157_spill] sm:$0xff] %v9443_v12 }
 0xa8a   : > { %6454 = vset.pattern.permute.xlu2 %v7721_v24  ;;  %6453 = vset.pattern.permute.xlu1 %v7696_v18  ;;  %v9435_v20 = vpop.permute.xlu2 %3784 }
 0xa8b   : > { %10542 = vst [vmem:[#allocation170_spill] sm:$0xff] %v9435_v20 }
 0xa92   : > { %4051 = vperm.xlu2 %6454, %v10521_v61   ;;  %4045 = vperm.xlu1 %6453, %v10521_v61   ;;  %v9441_v33 = vpop.permute.xlu2 %3802 }
 0xa93   : > { %10544 = vst [vmem:[#allocation80_spill] sm:$0xff] %v9441_v33 }
 0xa94   : > { %v9449_v54 = vpop.permute.xlu1 %3808 }
 0xa95   : > { %10548 = vst [vmem:[#allocation178_spill] sm:$0xff] %v9449_v54 }
 0xa9a   : > { %6456 = vset.pattern.permute.xlu2 %v7778_v29  ;;  %6455 = vset.pattern.permute.xlu1 %v7718_v23  ;;  %v9447_v34 = vpop.permute.xlu2 %3814 }
 0xa9b   : > { %10547 = vst [vmem:[#allocation174_spill] sm:$0xff] %v9447_v34 }
 0xaa2   : > { %4063 = vperm.xlu2 %6456, %v10521_v61   ;;  %4057 = vperm.xlu1 %6455, %v10521_v61   ;;  %v9455_v38 = vpop.permute.xlu2 %3832 }
 0xaa3   : > { %10550 = vst [vmem:[#allocation180_spill] sm:$0xff] %v9455_v38 }
 0xaa4   : > { %v9453_v20 = vpop.permute.xlu1 %3826 }
 0xaa5   : > { %10549 = vst [vmem:[#allocation176_spill] sm:$0xff] %v9453_v20 }
 0xaaa   : > { %6458 = vset.pattern.permute.xlu2 %v7629_v2  ;;  %6457 = vset.pattern.permute.xlu1 %v7730_v25  ;;  %v9461_v12 = vpop.permute.xlu2 %3844 }
 0xaab   : > { %10552 = vst [vmem:[#allocation179_spill] sm:$0xff] %v9461_v12 }
 0xab2   : > { %4082 = vperm.xlu2 %6458, %v10546_v22   ;;  %4075 = vperm.xlu1 %6457, %v10521_v61   ;;  %v3992_v20 = vpop.permute.xlu2 %3991 }
 0xab3   : > { %v4757_v12 = vsel %vm3853_vm6, %v3992_v20, 0.0  ;;  %vm3863_vm6 = vcmp.eq.s32.totalorder %v9183_v59, %v8519_v7 }
 0xab4   : > { %v9459_v33 = vpop.permute.xlu1 %3838 }
 0xab5   : > { %10551 = vst [vmem:[#allocation88_spill] sm:$0xff] %v9459_v33 }
 0xaba   : > { %6460 = vset.pattern.permute.xlu2 %v7635_v4  ;;  %6459 = vset.pattern.permute.xlu1 %v7638_v5 }
 0xabc   : > { %v4004_v31 = vpop.permute.xlu2 %4003 }
 0xabd   : > { %v4759_v55 = vsel %vm3855_vm8, %v4004_v31, 0.0 }
 0xac2   : > { %4094 = vperm.xlu2 %6460, %v10546_v22   ;;  %4088 = vperm.xlu1 %6459, %v10546_v22  }
 0xac4   : > { %v3986_v61 = vpop.permute.xlu1 %3985 }
 0xac5   : > { %v4756_v33 = vsel %vm3852_vm4, %v3986_v61, 0.0  ;;  %vm3862_vm4 = vcmp.eq.s32.totalorder %v9185_v62, %v8519_v7 }
 0xac6   : > { %v4885_v54 = vadd.f32 %v4757_v12, %v4756_v33 }
 0xaca   : > { %6462 = vset.pattern.permute.xlu2 %v7652_v8  ;;  %6461 = vset.pattern.permute.xlu1 %v7632_v3 }
 0xacc   : > { %v4022_v12 = vpop.permute.xlu2 %4021 }
 0xacd   : > { %v4762_v31 = vsel %vm3858_vm12, %v4022_v12, 0.0  ;;  %vm3867_vm12 = vcmp.eq.s32.totalorder %v9197_v36, %v8519_v7  ;;  %v10557_v36 = vld [vmem:[#allocation61_spill] sm:$0xff] }
 0xad2   : > { %4112 = vperm.xlu2 %6462, %v10546_v22   ;;  %4106 = vperm.xlu1 %6461, %v10546_v22  }
 0xad4   : > { %v3998_v38 = vpop.permute.xlu1 %3997 }
 0xad5   : > { %v4758_v34 = vsel %vm3854_vm3, %v3998_v38, 0.0  ;;  %v10553_v38 = vld [vmem:[#allocation113_spill] sm:$0xff]  ;;  %vm3861_vm3 = vcmp.eq.s32.totalorder %v9177_v50, %v8519_v7  ;;  %v3154_v50 = vpop.permute.xlu0 %3153 }
 0xad6   : > { %v4886_v44 = vadd.f32 %v4885_v54, %v4758_v34  ;;  %v4760_v33 = vsel %vm3856_vm10, %v10553_v38, 0.0  ;;  %vm3864_vm8 = vcmp.eq.s32.totalorder %v3154_v50, %v8519_v7  ;;  %vm3865_vm10 = vcmp.eq.s32.totalorder %v9191_v41, %v8519_v7 }
 0xad8   : > { %v4887_v16 = vadd.f32 %v4886_v44, %v4759_v55 }
 0xada   : > { %6464 = vset.pattern.permute.xlu2 %v7674_v13  ;;  %6463 = vset.pattern.permute.xlu1 %v7677_v14  ;;  %v4888_v34 = vadd.f32 %v4887_v16, %v4760_v33  ;;  %v4765_v16 = vsel %vm3861_vm3, %v10554_v57, 0.0  ;;  %vm3870_vm3 = vcmp.eq.s32.totalorder %v9203_v37, %v8519_v7 }
 0xadc   : > { %v4034_v51 = vpop.permute.xlu2 %4033 }
 0xadd   : > { %v4764_v61 = vsel %vm3860_vm15, %v4034_v51, 0.0  ;;  %vm3869_vm15 = vcmp.eq.s32.totalorder %v10557_v36, %v8519_v7 }
 0xae2   : > { %4124 = vperm.xlu2 %6464, %v10546_v22   ;;  %4118 = vperm.xlu1 %6463, %v10546_v22  }
 0xae4   : > { %v4016_v39 = vpop.permute.xlu1 %4015 }
 0xae5   : > { %v4761_v54 = vsel %vm3857_vm11, %v4016_v39, 0.0  ;;  %vm3866_vm11 = vcmp.eq.s32.totalorder %v9189_v53, %v8519_v7 }
 0xae6   : > { %v4889_v60 = vadd.f32 %v4888_v34, %v4761_v54 }
 0xae8   : > { %v4890_v42 = vadd.f32 %v4889_v60, %v4762_v31 }
 0xaea   : > { %6466 = vset.pattern.permute.xlu2 %v7696_v18  ;;  %6465 = vset.pattern.permute.xlu1 %v7699_v19 }
 0xaec   : > { %v4052_v38 = vpop.permute.xlu2 %4051 }
 0xaed   : > { %v4767_v34 = vsel %vm3863_vm6, %v4052_v38, 0.0  ;;  %vm3872_vm6 = vcmp.eq.s32.totalorder %v9209_v10, %v8519_v7  ;;  %v10559_v10 = vld [vmem:[#allocation70_spill] sm:$0xff] }
 0xaf2   : > { %4142 = vperm.xlu2 %6466, %v10546_v22   ;;  %4136 = vperm.xlu1 %6465, %v10546_v22  }
 0xaf4   : > { %v4028_v44 = vpop.permute.xlu1 %4027 }
 0xaf5   : > { %v4763_v20 = vsel %vm3859_vm13, %v4028_v44, 0.0  ;;  %v10555_v44 = vld [vmem:[#allocation167_spill] sm:$0xff]  ;;  %vm3868_vm13 = vcmp.eq.s32.totalorder %v9195_v46, %v8519_v7  ;;  %v10558_v46 = vld [vmem:[#allocation173_spill] sm:$0xff] }
 0xaf6   : > { %v4891_v45 = vadd.f32 %v4890_v42, %v4763_v20 }
 0xaf8   : > { %v4892_v55 = vadd.f32 %v4891_v45, %v4764_v61 }
 0xafa   : > { %6468 = vset.pattern.permute.xlu2 %v7718_v23  ;;  %6467 = vset.pattern.permute.xlu1 %v7721_v24  ;;  %v4893_v33 = vadd.f32 %v4892_v55, %v4765_v16 }
 0xafc   : > { %v4064_v62 = vpop.permute.xlu2 %4063 }
 0xafd   : > { %v4769_v42 = vsel %vm3865_vm10, %v4064_v62, 0.0  ;;  %vm3874_vm10 = vcmp.eq.s32.totalorder %v10559_v10, %v8519_v7 }
 0xb02   : > { %4154 = vperm.xlu2 %6468, %v10546_v22   ;;  %4148 = vperm.xlu1 %6467, %v10546_v22  }
 0xb04   : > { %v4046_v52 = vpop.permute.xlu1 %4045 }
 0xb05   : > { %v4766_v12 = vsel %vm3862_vm4, %v4046_v52, 0.0  ;;  %vm3871_vm4 = vcmp.eq.s32.totalorder %v9201_v27, %v8519_v7 }
 0xb06   : > { %v4894_v39 = vadd.f32 %v4893_v33, %v4766_v12 }
 0xb08   : > { %v4895_v54 = vadd.f32 %v4894_v39, %v4767_v34  ;;  %v4775_v34 = vsel %vm3871_vm4, %v10558_v46, 0.0  ;;  %vm3880_vm4 = vcmp.eq.s32.totalorder %v9227_v49, %v8519_v7 }
 0xb0a   : > { %6470 = vset.pattern.permute.xlu2 %v7730_v25  ;;  %6469 = vset.pattern.permute.xlu1 %v7733_v26 }
 0xb0c   : > { %v4083_v57 = vpop.permute.xlu2 %4082 }
 0xb0d   : > { %v4772_v38 = vsel %vm3868_vm13, %v4083_v57, 0.0  ;;  %vm3877_vm13 = vcmp.eq.s32.totalorder %v9221_v30, %v8519_v7  ;;  %v10561_v30 = vld [vmem:[#allocation76_spill] sm:$0xff] }
 0xb12   : > { %4172 = vperm.xlu2 %6470, %v10546_v22   ;;  %4166 = vperm.xlu1 %6469, %v10546_v22   ;;  %v10556_v22 = vld [vmem:[#allocation150_spill] sm:$0xff] }
 0xb13   : > { %v4770_v20 = vsel %vm3866_vm11, %v10556_v22, 0.0  ;;  %vm3875_vm11 = vcmp.eq.s32.totalorder %v9215_v43, %v8519_v7 }
 0xb14   : > { %v4058_v60 = vpop.permute.xlu1 %4057 }
 0xb15   : > { %v4768_v31 = vsel %vm3864_vm8, %v4058_v60, 0.0  ;;  %vm3873_vm8 = vcmp.eq.s32.totalorder %v9207_v48, %v8519_v7 }
 0xb16   : > { %v4896_v59 = vadd.f32 %v4895_v54, %v4768_v31 }
 0xb18   : > { %v4897_v51 = vadd.f32 %v4896_v59, %v4769_v42 }
 0xb1a   : > { %6472 = vset.pattern.permute.xlu2 %v7638_v5  ;;  %6471 = vset.pattern.permute.xlu1 %v7629_v2  ;;  %v4898_v45 = vadd.f32 %v4897_v51, %v4770_v20 }
 0xb1c   : > { %v4095_v53 = vpop.permute.xlu2 %4094 }
 0xb1d   : > { %v4774_v12 = vsel %vm3870_vm3, %v4095_v53, 0.0  ;;  %vm3879_vm3 = vcmp.eq.s32.totalorder %v10561_v30, %v8519_v7 }
 0xb22   : > { %4185 = vperm.xlu2 %6472, %v10555_v44   ;;  %4179 = vperm.xlu1 %6471, %v10555_v44  }
 0xb24   : > { %v4076_v41 = vpop.permute.xlu1 %4075 }
 0xb25   : > { %v4771_v61 = vsel %vm3867_vm12, %v4076_v41, 0.0  ;;  %vm3876_vm12 = vcmp.eq.s32.totalorder %v9213_v56, %v8519_v7  ;;  %v10560_v41 = vld [vmem:[#allocation196_spill] sm:$0xff] }
 0xb26   : > { %v9521_v55 = vadd.f32 %v4898_v45, %v4771_v61  ;;  %v4780_v45 = vsel %vm3876_vm12, %v10560_v41, 0.0 }
 0xb28   : > { %v4900_v46 = vrot.slane %v9521_v55, 4 }
 0xb2a   : > { %6474 = vset.pattern.permute.xlu2 %v7632_v3  ;;  %6473 = vset.pattern.permute.xlu1 %v7655_v9  ;;  %v4901_v49 = vadd.f32 %v4900_v46, %v9521_v55 }
 0xb2c   : > { %v4113_v54 = vpop.permute.xlu2 %4112 }
 0xb2d   : > { %v4777_v31 = vsel %vm3873_vm8, %v4113_v54, 0.0  ;;  %v10563_v54 = vld [vmem:[#allocation216_spill] sm:$0xff]  ;;  %vm3882_vm8 = vcmp.eq.s32.totalorder %v9233_v58, %v8519_v7 }
 0xb32   : > { %4203 = vperm.xlu2 %6474, %v10555_v44   ;;  %4197 = vperm.xlu1 %6473, %v10555_v44  }
 0xb34   : > { %v4089_v16 = vpop.permute.xlu1 %4088 }
 0xb35   : > { %v4773_v52 = vsel %vm3869_vm15, %v4089_v16, 0.0  ;;  %vm3878_vm15 = vcmp.eq.s32.totalorder %v9219_v32, %v8519_v7 }
 0xb36   : > { %v4906_v33 = vadd.f32 %v4773_v52, %v4772_v38 }
 0xb38   : > { %v4907_v39 = vadd.f32 %v4906_v33, %v4774_v12 }
 0xb3a   : > { %6476 = vset.pattern.permute.xlu2 %v7677_v14  ;;  %6475 = vset.pattern.permute.xlu1 %v7652_v8  ;;  %v4908_v50 = vadd.f32 %v4907_v39, %v4775_v34  ;;  %v10562_v34 = vld [vmem:[#allocation56_spill] sm:$0xff] }
 0xb3c   : > { %v4125_v27 = vpop.permute.xlu2 %4124 }
 0xb3d   : > { %v4779_v22 = vsel %vm3875_vm11, %v4125_v27, 0.0  ;;  %v4902_v27 = vrot.slane %v4901_v49, 2  ;;  %vm3885_vm11 = vcmp.eq.s32.totalorder %v9239_v21, %v8519_v7 }
 0xb42   : > { %4215 = vperm.xlu2 %6476, %v10555_v44   ;;  %4209 = vperm.xlu1 %6475, %v10555_v44  }
 0xb44   : > { %v4107_v37 = vpop.permute.xlu1 %4106 }
 0xb45   : > { %v4776_v62 = vsel %vm3872_vm6, %v4107_v37, 0.0  ;;  %vm3881_vm6 = vcmp.eq.s32.totalorder %v9225_v63, %v8519_v7 }
 0xb46   : > { %v4909_v60 = vadd.f32 %v4908_v50, %v4776_v62  ;;  %v4785_v37 = vsel %vm3881_vm6, %v10563_v54, 0.0  ;;  %vm3891_vm6 = vcmp.eq.s32.totalorder %v9249_v6, %v8519_v7 }
 0xb47   : > { %v4795_v54 = vsel %vm3891_vm6, %v8621_v40, 0.0 }
 0xb48   : > { %v4910_v59 = vadd.f32 %v4909_v60, %v4777_v31 }
 0xb4a   : > { %6478 = vset.pattern.permute.xlu2 %v7699_v19  ;;  %6477 = vset.pattern.permute.xlu1 %v7763_v28 }
 0xb4c   : > { %v4143_v61 = vpop.permute.xlu2 %4142 }
 0xb4d   : > { %v4782_v36 = vsel %vm3878_vm15, %v4143_v61, 0.0  ;;  %v10564_v61 = vld [vmem:[#allocation81_spill] sm:$0xff]  ;;  %vm3887_vm15 = vcmp.eq.s32.totalorder %v9245_v47, %v8519_v7  ;;  %v10565_v47 = vld [vmem:[#allocation90_spill] sm:$0xff] }
 0xb4e   : > { %vm3884_vm12 = vcmp.eq.s32.totalorder %v10564_v61, %v8519_v7  ;;  %v10571_v61 = vld [vmem:[#allocation114_spill] sm:$0xff] }
 0xb52   : > { %4233 = vperm.xlu2 %6478, %v10555_v44   ;;  %4227 = vperm.xlu1 %6477, %v10555_v44  }
 0xb54   : > { %v4119_v42 = vpop.permute.xlu1 %4118 }
 0xb55   : > { %v4778_v51 = vsel %vm3874_vm10, %v4119_v42, 0.0  ;;  %vm3883_vm10 = vcmp.eq.s32.totalorder %v9231_v17, %v8519_v7 }
 0xb56   : > { %v4911_v48 = vadd.f32 %v4910_v59, %v4778_v51 }
 0xb58   : > { %v4912_v20 = vadd.f32 %v4911_v48, %v4779_v22 }
 0xb5a   : > { %6480 = vset.pattern.permute.xlu2 %v7721_v24  ;;  %6479 = vset.pattern.permute.xlu1 %v7696_v18  ;;  %v4913_v57 = vadd.f32 %v4912_v20, %v4780_v45 }
 0xb5c   : > { %v4155_v56 = vpop.permute.xlu2 %4154 }
 0xb5d   : > { %v4784_v12 = vsel %vm3880_vm4, %v4155_v56, 0.0  ;;  %vm3890_vm4 = vcmp.eq.s32.totalorder %v9251_v35, %v8519_v7 }
 0xb62   : > { %4245 = vperm.xlu2 %6480, %v10555_v44   ;;  %4239 = vperm.xlu1 %6479, %v10555_v44  }
 0xb64   : > { %v4137_v43 = vpop.permute.xlu1 %4136 }
 0xb65   : > { %v4781_v53 = vsel %vm3877_vm13, %v4137_v43, 0.0  ;;  %vm3886_vm13 = vcmp.eq.s32.totalorder %v9237_v0, %v8519_v7 }
 0xb66   : > { %v4914_v16 = vadd.f32 %v4913_v57, %v4781_v53  ;;  %v4790_v21 = vsel %vm3886_vm13, %v8576_v11, 0.0 }
 0xb68   : > { %v4915_v38 = vadd.f32 %v4914_v16, %v4782_v36 }
 0xb6a   : > { %6482 = vset.pattern.permute.xlu2 %v7733_v26  ;;  %6481 = vset.pattern.permute.xlu1 %v7778_v29 }
 0xb6c   : > { %v4173_v50 = vpop.permute.xlu2 %4172 }
 0xb6d   : > { %v4787_v59 = vsel %vm3883_vm10, %v4173_v50, 0.0 }
 0xb72   : > { %4263 = vperm.xlu2 %6482, %v10555_v44   ;;  %4257 = vperm.xlu1 %6481, %v10555_v44  }
 0xb74   : > { %v4149_v52 = vpop.permute.xlu1 %4148 }
 0xb75   : > { %v4783_v33 = vsel %vm3879_vm3, %v4149_v52, 0.0  ;;  %vm3889_vm3 = vcmp.eq.s32.totalorder %v10565_v47, %v8519_v7  ;;  %v10575_v47 = vld [vmem:[#allocation57_spill] sm:$0xff] }
 0xb76   : > { %v4916_v32 = vadd.f32 %v4915_v38, %v4783_v33  ;;  %vm3900_vm6 = vcmp.eq.s32.totalorder %v10575_v47, %v8519_v7  ;;  %v10588_v47 = vld [vmem:[#allocation78_spill] sm:$0xff] }
 0xb78   : > { %v4917_v39 = vadd.f32 %v4916_v32, %v4784_v12 }
 0xb7a   : > { %6484 = vset.pattern.permute.xlu2 %v7629_v2  ;;  %6483 = vset.pattern.permute.xlu1 %v7730_v25  ;;  %v4918_v60 = vadd.f32 %v4917_v39, %v4785_v37 }
 0xb7c   : > { %v4186_v22 = vpop.permute.xlu2 %4185 }
 0xb7d   : > { %v4789_v43 = vsel %vm3885_vm11, %v4186_v22, 0.0 }
 0xb82   : > { %4276 = vperm.xlu2 %6484, %v10562_v34   ;;  %4269 = vperm.xlu1 %6483, %v10555_v44   ;;  %v4903_v44 = vadd.f32 %v4902_v27, %v4901_v49  ;;  %v9631_v27 = vpop.permute.xlu0 %3638 }
 0xb84   : > { %v4167_v62 = vpop.permute.xlu1 %4166  ;;  %v4904_v48 = vrot.slane %v4903_v44, 1 }
 0xb85   : > { %v4786_v31 = vsel %vm3882_vm8, %v4167_v62, 0.0  ;;  %vm3892_vm8 = vcmp.eq.s32.totalorder %v9257_v1, %v8519_v7  ;;  %v10566_v62 = vld [vmem:[#allocation107_spill] sm:$0xff] }
 0xb86   : > { %v4919_v63 = vadd.f32 %v4918_v60, %v4786_v31  ;;  %v4905_v17 = vadd.f32 %v4904_v48, %v4903_v44  ;;  %vm3893_vm10 = vcmp.eq.s32.totalorder %v10566_v62, %v8519_v7  ;;  %v10567_v1 = vld [vmem:[#allocation95_spill] sm:$0xff] }
 0xb87   : > { %vm3894_vm11 = vcmp.eq.s32.totalorder %v10567_v1, %v8519_v7 }
 0xb88   : > { %v4920_v42 = vadd.f32 %v4919_v63, %v4787_v59 }
 0xb8a   : > { %v4921_v10 = vrot.slane %v4920_v42, 4  ;;  %6487 = vset.pattern.permute.xlu2 %v7655_v9  ;;  %6486 = vset.pattern.permute.xlu1 %v7635_v4  ;;  %v4252_v48 = vpop.permute.xlu0 %4251 }
 0xb8c   : > { %v4922_v55 = vadd.f32 %v4921_v10, %v4920_v42  ;;  %v4204_v36 = vpop.permute.xlu2 %4203  ;;  %v10568_v42 = vld [vmem:[#allocation105_spill] sm:$0xff] }
 0xb8e   : > { %v4923_v51 = vrot.slane %v4922_v55, 2 }
 0xb90   : > { %v4924_v58 = vadd.f32 %v4923_v51, %v4922_v55  ;;  %v10569_v51 = vld [vmem:[#allocation115_spill] sm:$0xff] }
 0xb91   : > { %vm3896_vm13 = vcmp.eq.s32.totalorder %v10569_v51, %v8519_v7 }
 0xb92   : > { %v4925_v20 = vrot.slane %v4924_v58, 1  ;;  %4294 = vperm.xlu2 %6487, %v10562_v34   ;;  %4288 = vperm.xlu1 %6486, %v10562_v34  }
 0xb94   : > { %v4926_v41 = vadd.f32 %v4925_v20, %v4924_v58  ;;  %v4180_v45 = vpop.permute.xlu1 %4179  ;;  %v4800_v58 = vsel %vm3896_vm13, %v4252_v48, 0.0  ;;  %v10570_v20 = vld [vmem:[#allocation99_spill] sm:$0xff] }
 0xb95   : > { %v4788_v57 = vsel %vm3884_vm12, %v4180_v45, 0.0  ;;  %vm3895_vm12 = vcmp.eq.s32.totalorder %v10568_v42, %v8519_v7  ;;  %v10581_v48 = vld [vmem:[#allocation123_spill] sm:$0xff] }
 0xb96   : > { %v9593_v53 = vsel %vm3057_vm0, %v4926_v41, %v4905_v17  ;;  %v4927_v16 = vadd.f32 %v4789_v43, %v4788_v57  ;;  %vm3888_vm0 = vcmp.eq.s32.totalorder %v9243_v15, %v8519_v7 }
 0xb97   : > { %v4792_v33 = vsel %vm3888_vm0, %v4204_v36, 0.0  ;;  %vm3898_vm0 = vcmp.eq.s32.totalorder %v10571_v61, %v8519_v7  ;;  %v10573_v36 = vld [vmem:[#allocation101_spill] sm:$0xff] }
 0xb98   : > { %v4928_v56 = vadd.f32 %v4927_v16, %v4790_v21  ;;  %v10572_v21 = vld [vmem:[#allocation65_spill] sm:$0xff] }
 0xb9a   : > { %6489 = vset.pattern.permute.xlu2 %v7652_v8  ;;  %6488 = vset.pattern.permute.xlu1 %v7632_v3 }
 0xb9c   : > { %v4216_v11 = vpop.permute.xlu2 %4215 }
 0xb9d   : > { %v4794_v39 = vsel %vm3890_vm4, %v4216_v11, 0.0 }
 0xba2   : > { %4306 = vperm.xlu2 %6489, %v10562_v34   ;;  %4300 = vperm.xlu1 %6488, %v10562_v34  }
 0xba4   : > { %v4198_v38 = vpop.permute.xlu1 %4197 }
 0xba5   : > { %v4791_v52 = vsel %vm3887_vm15, %v4198_v38, 0.0  ;;  %vm3897_vm15 = vcmp.eq.s32.totalorder %v10570_v20, %v8519_v7 }
 0xba6   : > { %v4929_v30 = vadd.f32 %v4928_v56, %v4791_v52 }
 0xba8   : > { %v4930_v32 = vadd.f32 %v4929_v30, %v4792_v33 }
 0xbaa   : > { %6492 = vset.pattern.permute.xlu2 %v7763_v28  ;;  %6491 = vset.pattern.permute.xlu1 %v7674_v13 }
 0xbac   : > { %v4234_v37 = vpop.permute.xlu2 %4233 }
 0xbad   : > { %v4797_v31 = vsel %vm3893_vm10, %v4234_v37, 0.0 }
 0xbb2   : > { %4324 = vperm.xlu2 %6492, %v10562_v34   ;;  %4318 = vperm.xlu1 %6491, %v10562_v34  }
 0xbb4   : > { %v4210_v0 = vpop.permute.xlu1 %4209 }
 0xbb5   : > { %v4793_v12 = vsel %vm3889_vm3, %v4210_v0, 0.0  ;;  %vm3899_vm3 = vcmp.eq.s32.totalorder %v10573_v36, %v8519_v7  ;;  %v10574_v0 = vld [vmem:[#allocation118_spill] sm:$0xff] }
 0xbb6   : > { %v4931_v15 = vadd.f32 %v4930_v32, %v4793_v12  ;;  %vm3901_vm4 = vcmp.eq.s32.totalorder %v10574_v0, %v8519_v7  ;;  %v10587_v0 = vld [vmem:[#allocation126_spill] sm:$0xff] }
 0xbb8   : > { %v4932_v46 = vadd.f32 %v4931_v15, %v4794_v39 }
 0xbba   : > { %6494 = vset.pattern.permute.xlu2 %v7696_v18  ;;  %6493 = vset.pattern.permute.xlu1 %v7699_v19  ;;  %v4933_v49 = vadd.f32 %v4932_v46, %v4795_v54  ;;  %v10576_v46 = vld [vmem:[#allocation66_spill] sm:$0xff] }
 0xbbb   : > { %v4805_v54 = vsel %vm3901_vm4, %v10576_v46, 0.0  ;;  %vm3911_vm4 = vcmp.eq.s32.totalorder %v10587_v0, %v8519_v7 }
 0xbbc   : > { %v4246_v40 = vpop.permute.xlu2 %4245 }
 0xbbd   : > { %v4799_v44 = vsel %vm3895_vm12, %v4246_v40, 0.0  ;;  %vm3906_vm12 = vcmp.eq.s32.totalorder %v10581_v48, %v8519_v7  ;;  %v10594_v48 = vld [vmem:[#allocation127_spill] sm:$0xff] }
 0xbc2   : > { %4336 = vperm.xlu2 %6494, %v10562_v34   ;;  %4330 = vperm.xlu1 %6493, %v10562_v34  }
 0xbc4   : > { %v4228_v35 = vpop.permute.xlu1 %4227 }
 0xbc5   : > { %v4796_v50 = vsel %vm3892_vm8, %v4228_v35, 0.0 }
 0xbc6   : > { %v4934_v60 = vadd.f32 %v4933_v49, %v4796_v50  ;;  %v10577_v50 = vld [vmem:[#allocation121_spill] sm:$0xff] }
 0xbc7   : > { %vm3902_vm8 = vcmp.eq.s32.totalorder %v10577_v50, %v8519_v7 }
 0xbc8   : > { %v4935_v63 = vadd.f32 %v4934_v60, %v4797_v31  ;;  %v10578_v31 = vld [vmem:[#allocation117_spill] sm:$0xff] }
 0xbc9   : > { %vm3903_vm10 = vcmp.eq.s32.totalorder %v10578_v31, %v8519_v7  ;;  %v10592_v31 = vld [vmem:[#allocation147_spill] sm:$0xff] }
 0xbca   : > { %6497 = vset.pattern.permute.xlu2 %v7778_v29  ;;  %6496 = vset.pattern.permute.xlu1 %v7718_v23 }
 0xbcc   : > { %v4264_v22 = vpop.permute.xlu2 %4263 }
 0xbcd   : > { %v4802_v57 = vsel %vm3898_vm0, %v4264_v22, 0.0 }
 0xbd2   : > { %4354 = vperm.xlu2 %6497, %v10562_v34   ;;  %4348 = vperm.xlu1 %6496, %v10562_v34  }
 0xbd4   : > { %v4240_v6 = vpop.permute.xlu1 %4239 }
 0xbd5   : > { %v4798_v59 = vsel %vm3894_vm11, %v4240_v6, 0.0 }
 0xbd6   : > { %v4936_v10 = vadd.f32 %v4935_v63, %v4798_v59  ;;  %v10579_v59 = vld [vmem:[#allocation112_spill] sm:$0xff] }
 0xbd8   : > { %v4937_v55 = vadd.f32 %v4936_v10, %v4799_v44  ;;  %v10580_v10 = vld [vmem:[#allocation120_spill] sm:$0xff] }
 0xbd9   : > { %vm3905_vm11 = vcmp.eq.s32.totalorder %v10580_v10, %v8519_v7 }
 0xbda   : > { %6499 = vset.pattern.permute.xlu2 %v7730_v25  ;;  %6498 = vset.pattern.permute.xlu1 %v7733_v26  ;;  %v4938_v41 = vadd.f32 %v4937_v55, %v4800_v58  ;;  %v10582_v58 = vld [vmem:[#allocation72_spill] sm:$0xff] }
 0xbdb   : > { %v4810_v22 = vsel %vm3906_vm12, %v10582_v58, 0.0 }
 0xbdc   : > { %v4277_v33 = vpop.permute.xlu2 %4276 }
 0xbdd   : > { %v4804_v15 = vsel %vm3900_vm6, %v4277_v33, 0.0 }
 0xbde   : > { %v4948_v37 = vadd.f32 %v4805_v54, %v4804_v15 }
 0xbe2   : > { %4366 = vperm.xlu2 %6499, %v10562_v34   ;;  %4360 = vperm.xlu1 %6498, %v10562_v34  }
 0xbe4   : > { %v4258_v17 = vpop.permute.xlu1 %4257 }
 0xbe5   : > { %v4801_v45 = vsel %vm3897_vm15, %v4258_v17, 0.0  ;;  %v10583_v17 = vld [vmem:[#allocation122_spill] sm:$0xff] }
 0xbe6   : > { %v4939_v43 = vadd.f32 %v4938_v41, %v4801_v45  ;;  %vm3907_vm13 = vcmp.eq.s32.totalorder %v10583_v17, %v8519_v7  ;;  %v10595_v17 = vld [vmem:[#allocation133_spill] sm:$0xff] }
 0xbe7   : > { %vm3917_vm12 = vcmp.eq.s32.totalorder %v10595_v17, %v8519_v7 }
 0xbe8   : > { %v4940_v16 = vadd.f32 %v4939_v43, %v4802_v57  ;;  %v10584_v43 = vld [vmem:[#allocation67_spill] sm:$0xff] }
 0xbe9   : > { %vm3908_vm15 = vcmp.eq.s32.totalorder %v10584_v43, %v8519_v7 }
 0xbea   : > { %6502 = vset.pattern.permute.xlu2 %v7635_v4  ;;  %6501 = vset.pattern.permute.xlu1 %v7638_v5 }
 0xbec   : > { %v4295_v35 = vpop.permute.xlu2 %4294 }
 0xbed   : > { %v4807_v40 = vsel %vm3903_vm10, %v4295_v35, 0.0  ;;  %v10590_v35 = vld [vmem:[#allocation129_spill] sm:$0xff]  ;;  %vm3914_vm10 = vcmp.eq.s32.totalorder %v10592_v31, %v8519_v7 }
 0xbf2   : > { %4385 = vperm.xlu2 %6502, %v10572_v21   ;;  %4379 = vperm.xlu1 %6501, %v10572_v21  }
 0xbf4   : > { %v4270_v34 = vpop.permute.xlu1 %4269 }
 0xbf5   : > { %v4803_v38 = vsel %vm3899_vm3, %v4270_v34, 0.0 }
 0xbf6   : > { %v4941_v56 = vadd.f32 %v4940_v16, %v4803_v38 }
 0xbf8   : > { %v4942_v52 = vrot.slane %v4941_v56, 4 }
 0xbfa   : > { %v4943_v30 = vadd.f32 %v4942_v52, %v4941_v56  ;;  %6504 = vset.pattern.permute.xlu2 %v7632_v3  ;;  %6503 = vset.pattern.permute.xlu1 %v7655_v9  ;;  %v10585_v56 = vld [vmem:[#allocation128_spill] sm:$0xff] }
 0xbfb   : > { %vm3909_vm0 = vcmp.eq.s32.totalorder %v10585_v56, %v8519_v7  ;;  %v10598_v56 = vld [vmem:[#allocation169_spill] sm:$0xff] }
 0xbfc   : > { %v4944_v32 = vrot.slane %v4943_v30, 2 }
 0xbfe   : > { %v4945_v11 = vadd.f32 %v4944_v32, %v4943_v30  ;;  %v10586_v30 = vld [vmem:[#allocation125_spill] sm:$0xff] }
 0xbff   : > { %vm3910_vm3 = vcmp.eq.s32.totalorder %v10586_v30, %v8519_v7 }
 0xc00   : > { %v4946_v12 = vrot.slane %v4945_v11, 1 }
 0xc02   : > { %v4947_v39 = vadd.f32 %v4946_v12, %v4945_v11  ;;  %4397 = vperm.xlu2 %6504, %v10572_v21   ;;  %4391 = vperm.xlu1 %6503, %v10572_v21   ;;  %v4815_v12 = vsel %vm3911_vm4, %v10588_v47, 0.0  ;;  %v10600_v47 = vld [vmem:[#allocation132_spill] sm:$0xff] }
 0xc04   : > { %v9662_v49 = vsel %vm3059_vm2, %v4947_v39, %v9593_v53  ;;  %v4289_v62 = vpop.permute.xlu1 %4288  ;;  %v4307_v53 = vpop.permute.xlu2 %4306  ;;  %vm3904_vm2 = vcmp.eq.s32.totalorder %v10579_v59, %v8519_v7  ;;  %v10589_v39 = vld [vmem:[#allocation73_spill] sm:$0xff] }
 0xc05   : > { %v4806_v60 = vsel %vm3902_vm8, %v4289_v62, 0.0  ;;  %v4809_v55 = vsel %vm3905_vm11, %v4307_v53, 0.0  ;;  %vm3912_vm6 = vcmp.eq.s32.totalorder %v10589_v39, %v8519_v7  ;;  %vm3913_vm8 = vcmp.eq.s32.totalorder %v10590_v35, %v8519_v7  ;;  %v10593_v53 = vld [vmem:[#allocation130_spill] sm:$0xff] }
 0xc06   : > { %v4949_v63 = vadd.f32 %v4948_v37, %v4806_v60  ;;  %vm3916_vm11 = vcmp.eq.s32.totalorder %v10594_v48, %v8519_v7 }
 0xc08   : > { %v4950_v6 = vadd.f32 %v4949_v63, %v4807_v40 }
 0xc0a   : > { %6507 = vset.pattern.permute.xlu2 %v7674_v13  ;;  %6506 = vset.pattern.permute.xlu1 %v7677_v14 }
 0xc0c   : > { %v4325_v20 = vpop.permute.xlu2 %4324 }
 0xc0d   : > { %v4812_v16 = vsel %vm3908_vm15, %v4325_v20, 0.0  ;;  %vm3919_vm15 = vcmp.eq.s32.totalorder %v10598_v56, %v8519_v7 }
 0xc12   : > { %4415 = vperm.xlu2 %6507, %v10572_v21   ;;  %4409 = vperm.xlu1 %6506, %v10572_v21  }
 0xc14   : > { %v4301_v1 = vpop.permute.xlu1 %4300 }
 0xc15   : > { %v4808_v42 = vsel %vm3904_vm2, %v4301_v1, 0.0  ;;  %vm3915_vm2 = vcmp.eq.s32.totalorder %v10593_v53, %v8519_v7 }
 0xc16   : > { %v4951_v44 = vadd.f32 %v4950_v6, %v4808_v42 }
 0xc18   : > { %v4952_v51 = vadd.f32 %v4951_v44, %v4809_v55 }
 0xc1a   : > { %6509 = vset.pattern.permute.xlu2 %v7699_v19  ;;  %6508 = vset.pattern.permute.xlu1 %v7763_v28  ;;  %v4953_v45 = vadd.f32 %v4952_v51, %v4810_v22 }
 0xc1c   : > { %v4337_v36 = vpop.permute.xlu2 %4336 }
 0xc1d   : > { %v4814_v32 = vsel %vm3910_vm3, %v4337_v36, 0.0 }
 0xc22   : > { %4427 = vperm.xlu2 %6509, %v10572_v21   ;;  %4421 = vperm.xlu1 %6508, %v10572_v21  }
 0xc24   : > { %v4319_v41 = vpop.permute.xlu1 %4318 }
 0xc25   : > { %v4811_v61 = vsel %vm3907_vm13, %v4319_v41, 0.0 }
 0xc26   : > { %v4954_v57 = vadd.f32 %v4953_v45, %v4811_v61  ;;  %v10596_v45 = vld [vmem:[#allocation83_spill] sm:$0xff] }
 0xc27   : > { %v4820_v61 = vsel %vm3916_vm11, %v10596_v45, 0.0 }
 0xc28   : > { %v4955_v34 = vadd.f32 %v4954_v57, %v4812_v16  ;;  %v10597_v57 = vld [vmem:[#allocation53_spill] sm:$0xff] }
 0xc29   : > { %vm3918_vm13 = vcmp.eq.s32.totalorder %v10597_v57, %v8519_v7  ;;  %v10610_v57 = vld [vmem:[#allocation213_spill] sm:$0xff] }
 0xc2a   : > { %6512 = vset.pattern.permute.xlu2 %v7718_v23  ;;  %6511 = vset.pattern.permute.xlu1 %v7721_v24 }
 0xc2c   : > { %v4355_v15 = vpop.permute.xlu2 %4354 }
 0xc2d   : > { %v4817_v62 = vsel %vm3913_vm8, %v4355_v15, 0.0 }
 0xc32   : > { %4445 = vperm.xlu2 %6512, %v10572_v21   ;;  %4439 = vperm.xlu1 %6511, %v10572_v21  }
 0xc34   : > { %v4331_v38 = vpop.permute.xlu1 %4330 }
 0xc35   : > { %v4813_v52 = vsel %vm3909_vm0, %v4331_v38, 0.0  ;;  %vm3921_vm0 = vcmp.eq.s32.totalorder %v10600_v47, %v8519_v7 }
 0xc36   : > { %v4956_v33 = vadd.f32 %v4955_v34, %v4813_v52 }
 0xc38   : > { %v4957_v11 = vadd.f32 %v4956_v33, %v4814_v32 }
 0xc3a   : > { %6514 = vset.pattern.permute.xlu2 %v7733_v26  ;;  %6513 = vset.pattern.permute.xlu1 %v7778_v29  ;;  %v4958_v54 = vadd.f32 %v4957_v11, %v4815_v12  ;;  %v10601_v12 = vld [vmem:[#allocation92_spill] sm:$0xff] }
 0xc3b   : > { %v4825_v15 = vsel %vm3921_vm0, %v10601_v12, 0.0 }
 0xc3c   : > { %v4367_v63 = vpop.permute.xlu2 %4366 }
 0xc3d   : > { %v4819_v59 = vsel %vm3915_vm2, %v4367_v63, 0.0  ;;  %v10604_v63 = vld [vmem:[#allocation192_spill] sm:$0xff] }
 0xc42   : > { %4457 = vperm.xlu2 %6514, %v10572_v21   ;;  %4451 = vperm.xlu1 %6513, %v10572_v21   ;;  %v10591_v21 = vld [vmem:[#allocation89_spill] sm:$0xff] }
 0xc44   : > { %v4349_v46 = vpop.permute.xlu1 %4348 }
 0xc45   : > { %v4816_v37 = vsel %vm3912_vm6, %v4349_v46, 0.0  ;;  %v10602_v46 = vld [vmem:[#allocation139_spill] sm:$0xff]  ;;  %vm3924_vm6 = vcmp.eq.s32.totalorder %v10604_v63, %v8519_v7 }
 0xc46   : > { %v4959_v50 = vadd.f32 %v4958_v54, %v4816_v37  ;;  %vm3922_vm3 = vcmp.eq.s32.totalorder %v10602_v46, %v8519_v7 }
 0xc48   : > { %v4960_v60 = vadd.f32 %v4959_v50, %v4817_v62  ;;  %v10603_v50 = vld [vmem:[#allocation136_spill] sm:$0xff] }
 0xc49   : > { %vm3923_vm4 = vcmp.eq.s32.totalorder %v10603_v50, %v8519_v7 }
 0xc4a   : > { %6517 = vset.pattern.permute.xlu2 %v7638_v5  ;;  %6516 = vset.pattern.permute.xlu1 %v7629_v2 }
 0xc4c   : > { %v4386_v22 = vpop.permute.xlu2 %4385 }
 0xc4d   : > { %v4822_v36 = vsel %vm3918_vm13, %v4386_v22, 0.0 }
 0xc52   : > { %4476 = vperm.xlu2 %6517, %v10591_v21   ;;  %4470 = vperm.xlu1 %6516, %v10591_v21  }
 0xc54   : > { %v4361_v40 = vpop.permute.xlu1 %4360 }
 0xc55   : > { %v4818_v6 = vsel %vm3914_vm10, %v4361_v40, 0.0 }
 0xc56   : > { %v4961_v1 = vadd.f32 %v4960_v60, %v4818_v6 }
 0xc58   : > { %v4962_v42 = vadd.f32 %v4961_v1, %v4819_v59  ;;  %v10605_v1 = vld [vmem:[#allocation85_spill] sm:$0xff] }
 0xc59   : > { %vm3925_vm8 = vcmp.eq.s32.totalorder %v10605_v1, %v8519_v7 }
 0xc5a   : > { %v4963_v10 = vrot.slane %v4962_v42, 4  ;;  %6519 = vset.pattern.permute.xlu2 %v7655_v9  ;;  %6518 = vset.pattern.permute.xlu1 %v7635_v4 }
 0xc5c   : > { %v4964_v44 = vadd.f32 %v4963_v10, %v4962_v42  ;;  %v4398_v52 = vpop.permute.xlu2 %4397 }
 0xc5e   : > { %v4965_v55 = vrot.slane %v4964_v44, 2 }
 0xc60   : > { %v4966_v51 = vadd.f32 %v4965_v55, %v4964_v44  ;;  %v10606_v44 = vld [vmem:[#allocation135_spill] sm:$0xff]  ;;  %v10607_v55 = vld [vmem:[#allocation97_spill] sm:$0xff] }
 0xc61   : > { %vm3926_vm10 = vcmp.eq.s32.totalorder %v10606_v44, %v8519_v7  ;;  %v10619_v44 = vld [vmem:[#allocation146_spill] sm:$0xff] }
 0xc62   : > { %v4967_v58 = vrot.slane %v4966_v51, 1  ;;  %4488 = vperm.xlu2 %6519, %v10591_v21   ;;  %4482 = vperm.xlu1 %6518, %v10591_v21  }
 0xc64   : > { %v4968_v20 = vadd.f32 %v4967_v58, %v4966_v51  ;;  %v4380_v41 = vpop.permute.xlu1 %4379  ;;  %v4830_v51 = vsel %vm3926_vm10, %v10607_v55, 0.0  ;;  %v10608_v58 = vld [vmem:[#allocation141_spill] sm:$0xff]  ;;  %v10620_v55 = vld [vmem:[#allocation116_spill] sm:$0xff] }
 0xc65   : > { %v4821_v43 = vsel %vm3917_vm12, %v4380_v41, 0.0  ;;  %vm3927_vm2 = vcmp.eq.s32.totalorder %v10608_v58, %v8519_v7  ;;  %v10609_v41 = vld [vmem:[#allocation138_spill] sm:$0xff]  ;;  %vm3929_vm12 = vcmp.eq.s32.totalorder %v10610_v57, %v8519_v7 }
 0xc66   : > { %v9727_v16 = vsel %vm3061_vm5, %v4968_v20, %v9662_v49  ;;  %v4969_v34 = vadd.f32 %v4821_v43, %v4820_v61  ;;  %v10599_v49 = vld [vmem:[#allocation79_spill] sm:$0xff]  ;;  %vm3928_vm11 = vcmp.eq.s32.totalorder %v10609_v41, %v8519_v7  ;;  %v10621_v58 = vld [vmem:[#allocation98_spill] sm:$0xff] }
 0xc67   : > { %vm3920_vm5 = vcmp.eq.s32.totalorder %v10599_v49, %v8519_v7 }
 0xc68   : > { %v4970_v38 = vadd.f32 %v4969_v34, %v4822_v36  ;;  %v4824_v11 = vsel %vm3920_vm5, %v4398_v52, 0.0  ;;  %v10611_v34 = vld [vmem:[#allocation110_spill] sm:$0xff]  ;;  %v10612_v52 = vld [vmem:[#allocation144_spill] sm:$0xff] }
 0xc69   : > { %vm3931_vm13 = vcmp.eq.s32.totalorder %v10612_v52, %v8519_v7 }
 0xc6a   : > { %6522 = vset.pattern.permute.xlu2 %v7677_v14  ;;  %6521 = vset.pattern.permute.xlu1 %v7652_v8 }
 0xc6c   : > { %v4416_v39 = vpop.permute.xlu2 %4415 }
 0xc6d   : > { %v4827_v60 = vsel %vm3923_vm4, %v4416_v39, 0.0 }
 0xc72   : > { %4506 = vperm.xlu2 %6522, %v10591_v21   ;;  %4500 = vperm.xlu1 %6521, %v10591_v21  }
 0xc74   : > { %v4392_v30 = vpop.permute.xlu1 %4391 }
 0xc75   : > { %v4823_v33 = vsel %vm3919_vm15, %v4392_v30, 0.0  ;;  %v10613_v30 = vld [vmem:[#allocation140_spill] sm:$0xff] }
 0xc76   : > { %v4971_v32 = vadd.f32 %v4970_v38, %v4823_v33  ;;  %vm3930_vm15 = vcmp.eq.s32.totalorder %v10613_v30, %v8519_v7 }
 0xc78   : > { %v4972_v0 = vadd.f32 %v4971_v32, %v4824_v11  ;;  %v10614_v11 = vld [vmem:[#allocation103_spill] sm:$0xff] }
 0xc7a   : > { %6524 = vset.pattern.permute.xlu2 %v7763_v28  ;;  %6523 = vset.pattern.permute.xlu1 %v7674_v13  ;;  %v4973_v37 = vadd.f32 %v4972_v0, %v4825_v15  ;;  %v4835_v0 = vsel %vm3931_vm13, %v10614_v11, 0.0 }
 0xc7c   : > { %v4428_v40 = vpop.permute.xlu2 %4427 }
 0xc7d   : > { %v4829_v42 = vsel %vm3925_vm8, %v4428_v40, 0.0  ;;  %v10617_v40 = vld [vmem:[#allocation222_spill] sm:$0xff] }
 0xc82   : > { %4518 = vperm.xlu2 %6524, %v10591_v21   ;;  %4512 = vperm.xlu1 %6523, %v10591_v21  }
 0xc84   : > { %v4410_v54 = vpop.permute.xlu1 %4409 }
 0xc85   : > { %v4826_v35 = vsel %vm3922_vm3, %v4410_v54, 0.0  ;;  %v10615_v54 = vld [vmem:[#allocation93_spill] sm:$0xff]  ;;  %vm3934_vm3 = vcmp.eq.s32.totalorder %v10617_v40, %v8519_v7  ;;  %v10630_v40 = vld [vmem:[#allocation155_spill] sm:$0xff] }
 0xc86   : > { %v4974_v62 = vadd.f32 %v4973_v37, %v4826_v35  ;;  %vm3933_vm5 = vcmp.eq.s32.totalorder %v10615_v54, %v8519_v7  ;;  %v10616_v35 = vld [vmem:[#allocation142_spill] sm:$0xff] }
 0xc87   : > { %vm3932_vm0 = vcmp.eq.s32.totalorder %v10616_v35, %v8519_v7 }
 0xc88   : > { %v4975_v31 = vadd.f32 %v4974_v62, %v4827_v60 }
 0xc8a   : > { %6527 = vset.pattern.permute.xlu2 %v7721_v24  ;;  %6526 = vset.pattern.permute.xlu1 %v7696_v18 }
 0xc8c   : > { %v4446_v48 = vpop.permute.xlu2 %4445 }
 0xc8d   : > { %v4832_v61 = vsel %vm3928_vm11, %v4446_v48, 0.0 }
 0xc92   : > { %4536 = vperm.xlu2 %6527, %v10591_v21   ;;  %4530 = vperm.xlu1 %6526, %v10591_v21  }
 0xc94   : > { %v4422_v6 = vpop.permute.xlu1 %4421 }
 0xc95   : > { %v4828_v53 = vsel %vm3924_vm6, %v4422_v6, 0.0  ;;  %vm3937_vm6 = vcmp.eq.s32.totalorder %v10621_v58, %v8519_v7  ;;  %v10634_v58 = vld [vmem:[#allocation108_spill] sm:$0xff] }
 0xc96   : > { %v4976_v59 = vadd.f32 %v4975_v31, %v4828_v53 }
 0xc98   : > { %v4977_v10 = vadd.f32 %v4976_v59, %v4829_v42  ;;  %v10618_v59 = vld [vmem:[#allocation149_spill] sm:$0xff] }
 0xc99   : > { %vm3935_vm4 = vcmp.eq.s32.totalorder %v10618_v59, %v8519_v7 }
 0xc9a   : > { %6529 = vset.pattern.permute.xlu2 %v7778_v29  ;;  %6528 = vset.pattern.permute.xlu1 %v7718_v23  ;;  %v4978_v20 = vadd.f32 %v4977_v10, %v4830_v51 }
 0xc9c   : > { %v4458_v36 = vpop.permute.xlu2 %4457 }
 0xc9d   : > { %v4834_v49 = vsel %vm3930_vm15, %v4458_v36, 0.0  ;;  %vm3944_vm15 = vcmp.eq.s32.totalorder %v9631_v27, %v8519_v7  ;;  %v10631_v27 = vld [vmem:[#allocation171_spill] sm:$0xff] }
 0xca2   : > { %4548 = vperm.xlu2 %6529, %v10591_v21   ;;  %4542 = vperm.xlu1 %6528, %v10591_v21  }
 0xca4   : > { %v4440_v22 = vpop.permute.xlu1 %4439 }
 0xca5   : > { %v4831_v17 = vsel %vm3927_vm2, %v4440_v22, 0.0 }
 0xca6   : > { %v4979_v45 = vadd.f32 %v4978_v20, %v4831_v17 }
 0xca8   : > { %v4980_v43 = vadd.f32 %v4979_v45, %v4832_v61 }
 0xcaa   : > { %6532 = vset.pattern.permute.xlu2 %v7629_v2  ;;  %6531 = vset.pattern.permute.xlu1 %v7730_v25 }
 0xcac   : > { %v4477_v39 = vpop.permute.xlu2 %4476 }
 0xcb2   : > { %4567 = vperm.xlu2 %6532, %v10611_v34   ;;  %4560 = vperm.xlu1 %6531, %v10591_v21  }
 0xcb4   : > { %v4452_v38 = vpop.permute.xlu1 %4451 }
 0xcb5   : > { %v4833_v56 = vsel %vm3929_vm12, %v4452_v38, 0.0 }
 0xcb6   : > { %v4981_v33 = vadd.f32 %v4980_v43, %v4833_v56  ;;  %v10623_v43 = vld [vmem:[#allocation224_spill] sm:$0xff] }
 0xcb7   : > { %vm3939_vm10 = vcmp.eq.s32.totalorder %v10623_v43, %v8519_v7  ;;  %v10624_v56 = vld [vmem:[#allocation60_spill] sm:$0xff]  ;;  %v10637_v43 = vld [vmem:[#allocation158_spill] sm:$0xff] }
 0xcb8   : > { %v4982_v32 = vadd.f32 %v4981_v33, %v4834_v49  ;;  %vm3940_vm2 = vcmp.eq.s32.totalorder %v10624_v56, %v8519_v7  ;;  %v10625_v49 = vld [vmem:[#allocation148_spill] sm:$0xff] }
 0xcb9   : > { %vm3941_vm11 = vcmp.eq.s32.totalorder %v10625_v49, %v8519_v7  ;;  %v10640_v49 = vld [vmem:[#allocation161_spill] sm:$0xff] }
 0xcba   : > { %v4983_v47 = vadd.f32 %v4982_v32, %v4835_v0  ;;  %6534 = vset.pattern.permute.xlu2 %v7635_v4  ;;  %6533 = vset.pattern.permute.xlu1 %v7638_v5  ;;  %v4837_v4 = vsel %vm3933_vm5, %v4477_v39, 0.0  ;;  %v10626_v32 = vld [vmem:[#allocation134_spill] sm:$0xff] }
 0xcbb   : > { %v4845_v11 = vsel %vm3941_vm11, %v10626_v32, 0.0 }
 0xcbc   : > { %v4984_v21 = vrot.slane %v4983_v47, 4  ;;  %v4489_v6 = vpop.permute.xlu2 %4488 }
 0xcbe   : > { %v4985_v12 = vadd.f32 %v4984_v21, %v4983_v47  ;;  %v10627_v47 = vld [vmem:[#allocation151_spill] sm:$0xff] }
 0xcbf   : > { %vm3942_vm12 = vcmp.eq.s32.totalorder %v10627_v47, %v8519_v7 }
 0xcc0   : > { %v4986_v15 = vrot.slane %v4985_v12, 2 }
 0xcc2   : > { %v4987_v46 = vadd.f32 %v4986_v15, %v4985_v12  ;;  %4579 = vperm.xlu2 %6534, %v10611_v34   ;;  %4573 = vperm.xlu1 %6533, %v10611_v34  }
 0xcc4   : > { %v4988_v37 = vrot.slane %v4987_v46, 1  ;;  %v4471_v50 = vpop.permute.xlu1 %4470 }
 0xcc5   : > { %v4836_v62 = vsel %vm3932_vm0, %v4471_v50, 0.0  ;;  %vm3946_vm0 = vcmp.eq.s32.totalorder %v10630_v40, %v8519_v7 }
 0xcc6   : > { %v4989_v60 = vadd.f32 %v4988_v37, %v4987_v46  ;;  %v4990_v31 = vadd.f32 %v4837_v4, %v4836_v62  ;;  %v10629_v4 = vld [vmem:[#allocation59_spill] sm:$0xff] }
 0xcc7   : > { %vm3945_vm5 = vcmp.eq.s32.totalorder %v10629_v4, %v8519_v7  ;;  %v10647_v4 = vld [vmem:[#allocation77_spill] sm:$0xff] }
 0xcc8   : > { %v9788_v63 = vsel %vm3063_vm9, %v4989_v60, %v9727_v16  ;;  %v4839_v16 = vsel %vm3935_vm4, %v4489_v6, 0.0  ;;  %vm3936_vm9 = vcmp.eq.s32.totalorder %v10619_v44, %v8519_v7  ;;  %vm3948_vm4 = vcmp.eq.s32.totalorder %v10634_v58, %v8519_v7 }
 0xcc9   : > { %v4840_v51 = vsel %vm3936_vm9, %v10620_v55, 0.0 }
 0xcca   : > { %6537 = vset.pattern.permute.xlu2 %v7652_v8  ;;  %6536 = vset.pattern.permute.xlu1 %v7632_v3 }
 0xccc   : > { %v4507_v48 = vpop.permute.xlu2 %4506 }
 0xcd2   : > { %4597 = vperm.xlu2 %6537, %v10611_v34   ;;  %4591 = vperm.xlu1 %6536, %v10611_v34  }
 0xcd4   : > { %v4483_v53 = vpop.permute.xlu1 %4482 }
 0xcd5   : > { %v4838_v1 = vsel %vm3934_vm3, %v4483_v53, 0.0  ;;  %v10633_v53 = vld [vmem:[#allocation154_spill] sm:$0xff] }
 0xcd6   : > { %v4991_v42 = vadd.f32 %v4990_v31, %v4838_v1  ;;  %vm3947_vm3 = vcmp.eq.s32.totalorder %v10633_v53, %v8519_v7 }
 0xcd8   : > { %v4992_v10 = vadd.f32 %v4991_v42, %v4839_v16 }
 0xcda   : > { %6539 = vset.pattern.permute.xlu2 %v7674_v13  ;;  %6538 = vset.pattern.permute.xlu1 %v7677_v14  ;;  %v4993_v20 = vadd.f32 %v4992_v10, %v4840_v51  ;;  %v10622_v13 = vld [vmem:[#allocation145_spill] sm:$0xff] }
 0xcdb   : > { %vm3938_vm8 = vcmp.eq.s32.totalorder %v10622_v13, %v8519_v7 }
 0xcdc   : > { %v4842_v45 = vsel %vm3938_vm8, %v4507_v48, 0.0  ;;  %v4519_v57 = vpop.permute.xlu2 %4518 }
 0xcdd   : > { %v4844_v30 = vsel %vm3940_vm2, %v4519_v57, 0.0  ;;  %v10638_v57 = vld [vmem:[#allocation177_spill] sm:$0xff] }
 0xce2   : > { %4609 = vperm.xlu2 %6539, %v10611_v34   ;;  %4603 = vperm.xlu1 %6538, %v10611_v34  }
 0xce4   : > { %v4501_v22 = vpop.permute.xlu1 %4500 }
 0xce5   : > { %v4841_v17 = vsel %vm3937_vm6, %v4501_v22, 0.0 }
 0xce6   : > { %v4994_v41 = vadd.f32 %v4993_v20, %v4841_v17 }
 0xce8   : > { %v4995_v61 = vadd.f32 %v4994_v41, %v4842_v45  ;;  %v10636_v45 = vld [vmem:[#allocation156_spill] sm:$0xff] }
 0xce9   : > { %vm3950_vm6 = vcmp.eq.s32.totalorder %v10636_v45, %v8519_v7 }
 0xcea   : > { %6542 = vset.pattern.permute.xlu2 %v7696_v18  ;;  %6541 = vset.pattern.permute.xlu1 %v7699_v19 }
 0xcec   : > { %v4537_v0 = vpop.permute.xlu2 %4536 }
 0xcf2   : > { %4627 = vperm.xlu2 %6542, %v10611_v34   ;;  %4621 = vperm.xlu1 %6541, %v10611_v34  }
 0xcf4   : > { %v4513_v36 = vpop.permute.xlu1 %4512 }
 0xcf5   : > { %v4843_v38 = vsel %vm3939_vm10, %v4513_v36, 0.0  ;;  %vm3953_vm10 = vcmp.eq.s32.totalorder %v10640_v49, %v8519_v7 }
 0xcf6   : > { %v4996_v52 = vadd.f32 %v4995_v61, %v4843_v38  ;;  %v10639_v38 = vld [vmem:[#allocation69_spill] sm:$0xff] }
 0xcf7   : > { %vm3952_vm8 = vcmp.eq.s32.totalorder %v10639_v38, %v8519_v7 }
 0xcf8   : > { %v4997_v33 = vadd.f32 %v4996_v52, %v4844_v30 }
 0xcfa   : > { %6544 = vset.pattern.permute.xlu2 %v7718_v23  ;;  %6543 = vset.pattern.permute.xlu1 %v7721_v24  ;;  %v4998_v12 = vadd.f32 %v4997_v33, %v4845_v11  ;;  %v10628_v23 = vld [vmem:[#allocation152_spill] sm:$0xff] }
 0xcfb   : > { %vm3943_vm13 = vcmp.eq.s32.totalorder %v10628_v23, %v8519_v7  ;;  %v10644_v23 = vld [vmem:[#allocation162_spill] sm:$0xff] }
 0xcfc   : > { %v4847_v46 = vsel %vm3943_vm13, %v4537_v0, 0.0  ;;  %v4549_v37 = vpop.permute.xlu2 %4548  ;;  %v10642_v0 = vld [vmem:[#allocation159_spill] sm:$0xff]  ;;  %vm3957_vm13 = vcmp.eq.s32.totalorder %v10644_v23, %v8519_v7 }
 0xcfd   : > { %v4849_v60 = vsel %vm3945_vm5, %v4549_v37, 0.0  ;;  %vm3955_vm11 = vcmp.eq.s32.totalorder %v10642_v0, %v8519_v7  ;;  %vm3959_vm5 = vcmp.eq.s32.totalorder %v10647_v4, %v8519_v7 }
 0xd02   : > { %4639 = vperm.xlu2 %6544, %v10611_v34   ;;  %4633 = vperm.xlu1 %6543, %v10611_v34  }
 0xd04   : > { %v4531_v21 = vpop.permute.xlu1 %4530 }
 0xd05   : > { %v4846_v15 = vsel %vm3942_vm12, %v4531_v21, 0.0 }
 0xd06   : > { %v4999_v39 = vadd.f32 %v4998_v12, %v4846_v15  ;;  %v10643_v12 = vld [vmem:[#allocation119_spill] sm:$0xff] }
 0xd07   : > { %vm3956_vm12 = vcmp.eq.s32.totalorder %v10643_v12, %v8519_v7  ;;  %v10660_v12 = vld [vmem:[#allocation157_spill] sm:$0xff] }
 0xd08   : > { %v5000_v54 = vadd.f32 %v4999_v39, %v4847_v46 }
 0xd0a   : > { %6547 = vset.pattern.permute.xlu2 %v7730_v25  ;;  %6546 = vset.pattern.permute.xlu1 %v7733_v26 }
 0xd0c   : > { %v4568_v51 = vpop.permute.xlu2 %4567 }
 0xd12   : > { %4657 = vperm.xlu2 %6547, %v10611_v34   ;;  %4651 = vperm.xlu1 %6546, %v10611_v34   ;;  %v10632_v34 = vld [vmem:[#allocation153_spill] sm:$0xff] }
 0xd13   : > { %v4850_v6 = vsel %vm3946_vm0, %v10632_v34, 0.0 }
 0xd14   : > { %v4543_v35 = vpop.permute.xlu1 %4542 }
 0xd15   : > { %v4848_v50 = vsel %vm3944_vm15, %v4543_v35, 0.0 }
 0xd16   : > { %v5001_v62 = vadd.f32 %v5000_v54, %v4848_v50  ;;  %v10646_v50 = vld [vmem:[#allocation164_spill] sm:$0xff] }
 0xd17   : > { %vm3958_vm15 = vcmp.eq.s32.totalorder %v10646_v50, %v8519_v7 }
 0xd18   : > { %v5002_v31 = vadd.f32 %v5001_v62, %v4849_v60 }
 0xd1a   : > { %6549 = vset.pattern.permute.xlu2 %v7638_v5  ;;  %6548 = vset.pattern.permute.xlu1 %v7629_v2  ;;  %v5003_v59 = vadd.f32 %v5002_v31, %v4850_v6  ;;  %v10648_v6 = vld [vmem:[#allocation75_spill] sm:$0xff] }
 0xd1b   : > { %vm3960_vm0 = vcmp.eq.s32.totalorder %v10648_v6, %v8519_v7 }
 0xd1c   : > { %v4580_v41 = vpop.permute.xlu2 %4579 }
 0xd1d   : > { %v4854_v61 = vsel %vm3950_vm6, %v4580_v41, 0.0 }
 0xd22   : > { %4670 = vperm.xlu2 %6549, %v10631_v27   ;;  %4664 = vperm.xlu1 %6548, %v10631_v27  }
 0xd24   : > { %v4561_v1 = vpop.permute.xlu1 %4560 }
 0xd25   : > { %v4851_v42 = vsel %vm3947_vm3, %v4561_v1, 0.0  ;;  %v10649_v1 = vld [vmem:[#allocation168_spill] sm:$0xff] }
 0xd26   : > { %v5004_v16 = vadd.f32 %v5003_v59, %v4851_v42  ;;  %vm3961_vm3 = vcmp.eq.s32.totalorder %v10649_v1, %v8519_v7  ;;  %v10650_v42 = vld [vmem:[#allocation219_spill] sm:$0xff] }
 0xd28   : > { %v5005_v10 = vrot.slane %v5004_v16, 4 }
 0xd2a   : > { %v5006_v5 = vadd.f32 %v5005_v10, %v5004_v16  ;;  %6552 = vset.pattern.permute.xlu2 %v7632_v3  ;;  %6551 = vset.pattern.permute.xlu1 %v7655_v9  ;;  %v10635_v3 = vld [vmem:[#allocation64_spill] sm:$0xff]  ;;  %v4852_v9 = vsel %vm3948_vm4, %v4568_v51, 0.0  ;;  %v4865_v16 = vsel %vm3961_vm3, %v10650_v42, 0.0 }
 0xd2b   : > { %vm3949_vm9 = vcmp.eq.s32.totalorder %v10635_v3, %v8519_v7 }
 0xd2c   : > { %v5007_v2 = vrot.slane %v5006_v5, 2  ;;  %v4598_v30 = vpop.permute.xlu2 %4597 }
 0xd2e   : > { %v5008_v44 = vadd.f32 %v5007_v2, %v5006_v5  ;;  %v10651_v5 = vld [vmem:[#allocation137_spill] sm:$0xff] }
 0xd2f   : > { %vm3962_vm4 = vcmp.eq.s32.totalorder %v10651_v5, %v8519_v7 }
 0xd30   : > { %v5009_v55 = vrot.slane %v5008_v44, 1 }
 0xd32   : > { %v5010_v48 = vadd.f32 %v5009_v55, %v5008_v44  ;;  %4688 = vperm.xlu2 %6552, %v10631_v27   ;;  %4682 = vperm.xlu1 %6551, %v10631_v27   ;;  %v10652_v55 = vld [vmem:[#allocation166_spill] sm:$0xff] }
 0xd34   : > { %v9853_v22 = vsel %vm3065_vm14, %v5010_v48, %v9788_v63  ;;  %v4574_v20 = vpop.permute.xlu1 %4573  ;;  %vm3951_vm14 = vcmp.eq.s32.totalorder %v10637_v43, %v8519_v7  ;;  %v10653_v43 = vld [vmem:[#allocation82_spill] sm:$0xff] }
 0xd35   : > { %v4853_v17 = vsel %vm3949_vm9, %v4574_v20, 0.0  ;;  %v4855_v36 = vsel %vm3951_vm14, %v10638_v57, 0.0  ;;  %vm3963_vm9 = vcmp.eq.s32.totalorder %v10652_v55, %v8519_v7  ;;  %vm3964_vm6 = vcmp.eq.s32.totalorder %v10653_v43, %v8519_v7  ;;  %v10654_v57 = vld [vmem:[#allocation172_spill] sm:$0xff] }
 0xd36   : > { %v5011_v13 = vadd.f32 %v4853_v17, %v4852_v9  ;;  %vm3965_vm14 = vcmp.eq.s32.totalorder %v10654_v57, %v8519_v7 }
 0xd38   : > { %v5012_v63 = vadd.f32 %v5011_v13, %v4854_v61 }
 0xd3a   : > { %6554 = vset.pattern.permute.xlu2 %v7677_v14  ;;  %6553 = vset.pattern.permute.xlu1 %v7652_v8  ;;  %v5013_v8 = vadd.f32 %v5012_v63, %v4855_v36 }
 0xd42   : > { %4700 = vperm.xlu2 %6554, %v10631_v27   ;;  %4694 = vperm.xlu1 %6553, %v10631_v27  }
 0xd44   : > { %v4592_v14 = vpop.permute.xlu1 %4591 }
 0xd45   : > { %v4856_v56 = vsel %vm3952_vm8, %v4592_v14, 0.0  ;;  %v10655_v14 = vld [vmem:[#allocation84_spill] sm:$0xff] }
 0xd46   : > { %v5014_v52 = vadd.f32 %v5013_v8, %v4856_v56  ;;  %vm3966_vm8 = vcmp.eq.s32.totalorder %v10655_v14, %v8519_v7  ;;  %v10656_v56 = vld [vmem:[#allocation175_spill] sm:$0xff] }
 0xd4a   : > { %6557 = vset.pattern.permute.xlu2 %v7699_v19  ;;  %6556 = vset.pattern.permute.xlu1 %v7763_v28  ;;  %v10641_v19 = vld [vmem:[#allocation71_spill] sm:$0xff]  ;;  %v4857_v28 = vsel %vm3953_vm10, %v4598_v30, 0.0  ;;  %vm3967_vm10 = vcmp.eq.s32.totalorder %v10656_v56, %v8519_v7 }
 0xd4b   : > { %vm3954_vm2 = vcmp.eq.s32.totalorder %v10641_v19, %v8519_v7  ;;  %v5015_v11 = vadd.f32 %v5014_v52, %v4857_v28 }
 0xd52   : > { %4718 = vperm.xlu2 %6557, %v10631_v27   ;;  %4712 = vperm.xlu1 %6556, %v10631_v27  }
 0xd54   : > { %v4604_v33 = vpop.permute.xlu1 %4603 }
 0xd55   : > { %v4858_v32 = vsel %vm3954_vm2, %v4604_v33, 0.0 }
 0xd5a   : > { %6559 = vset.pattern.permute.xlu2 %v7721_v24  ;;  %6558 = vset.pattern.permute.xlu1 %v7696_v18  ;;  %v4610_v18 = vpop.permute.xlu2 %4609  ;;  %v5016_v24 = vadd.f32 %v5015_v11, %v4858_v32  ;;  %v10658_v32 = vld [vmem:[#allocation170_spill] sm:$0xff]  ;;  %v10659_v11 = vld [vmem:[#allocation91_spill] sm:$0xff] }
 0xd5b   : > { %v4859_v21 = vsel %vm3955_vm11, %v4610_v18, 0.0  ;;  %vm3969_vm2 = vcmp.eq.s32.totalorder %v10659_v11, %v8519_v7  ;;  %vm3970_vm11 = vcmp.eq.s32.totalorder %v10660_v12, %v8519_v7 }
 0xd5c   : > { %v5017_v15 = vadd.f32 %v5016_v24, %v4859_v21 }
 0xd62   : > { %4730 = vperm.xlu2 %6559, %v10631_v27   ;;  %4724 = vperm.xlu1 %6558, %v10631_v27   ;;  %v4628_v46 = vpop.permute.xlu2 %4627 }
 0xd63   : > { %v4862_v62 = vsel %vm3958_vm15, %v4628_v46, 0.0  ;;  %v10663_v46 = vld [vmem:[#allocation225_spill] sm:$0xff] }
 0xd64   : > { %v4622_v47 = vpop.permute.xlu1 %4621 }
 0xd65   : > { %v4861_v39 = vsel %vm3957_vm13, %v4622_v47, 0.0 }
 0xd6a   : > { %6561 = vset.pattern.permute.xlu2 %v7733_v26  ;;  %6560 = vset.pattern.permute.xlu1 %v7778_v29  ;;  %v10645_v26 = vld [vmem:[#allocation199_spill] sm:$0xff]  ;;  %v4640_v40 = vpop.permute.xlu2 %4639 }
 0xd6b   : > { %v4860_v29 = vsel %vm3956_vm12, %v10645_v26, 0.0  ;;  %v4864_v53 = vsel %vm3960_vm0, %v4640_v40, 0.0  ;;  %v10661_v26 = vld [vmem:[#allocation80_spill] sm:$0xff] }
 0xd6c   : > { %v5018_v54 = vadd.f32 %v5017_v15, %v4860_v29  ;;  %vm3971_vm12 = vcmp.eq.s32.totalorder %v10661_v26, %v8519_v7 }
 0xd6e   : > { %v5019_v37 = vadd.f32 %v5018_v54, %v4861_v39  ;;  %v10662_v39 = vld [vmem:[#allocation178_spill] sm:$0xff]  ;;  %v4875_v54 = vsel %vm3971_vm12, %v10663_v46, 0.0 }
 0xd6f   : > { %vm3972_vm13 = vcmp.eq.s32.totalorder %v10662_v39, %v8519_v7 }
 0xd70   : > { %v5020_v31 = vadd.f32 %v5019_v37, %v4862_v62 }
 0xd72   : > { %4748 = vperm.xlu2 %6561, %v10631_v27   ;;  %4742 = vperm.xlu1 %6560, %v10631_v27   ;;  %v4658_v10 = vpop.permute.xlu2 %4657 }
 0xd73   : > { %v4867_v48 = vsel %vm3963_vm9, %v4658_v10, 0.0  ;;  %v4737_v10 = vpop.permute.xlu0 %4736 }
 0xd74   : > { %v4634_v35 = vpop.permute.xlu1 %4633 }
 0xd75   : > { %v4863_v60 = vsel %vm3959_vm5, %v4634_v35, 0.0 }
 0xd76   : > { %v5021_v34 = vadd.f32 %v5020_v31, %v4863_v60  ;;  %v10664_v60 = vld [vmem:[#allocation174_spill] sm:$0xff]  ;;  %v10665_v31 = vld [vmem:[#allocation96_spill] sm:$0xff] }
 0xd77   : > { %vm3973_vm15 = vcmp.eq.s32.totalorder %v10664_v60, %v8519_v7  ;;  %vm3974_vm5 = vcmp.eq.s32.totalorder %v10665_v31, %v8519_v7 }
 0xd78   : > { %v5022_v59 = vadd.f32 %v5021_v34, %v4864_v53 }
 0xd7a   : > { %6562 = vset.pattern.permute.xlu1 %v7730_v25  ;;  %v5023_v25 = vadd.f32 %v5022_v59, %v4865_v16  ;;  %v10666_v59 = vld [vmem:[#allocation176_spill] sm:$0xff] }
 0xd7b   : > { %vm3975_vm0 = vcmp.eq.s32.totalorder %v10666_v59, %v8519_v7  ;;  %v10667_v16 = vld [vmem:[#allocation180_spill] sm:$0xff] }
 0xd7c   : > { %v4671_v61 = vpop.permute.xlu2 %4670  ;;  %vm3976_vm3 = vcmp.eq.s32.totalorder %v10667_v16, %v8519_v7 }
 0xd7d   : > { %v4869_v38 = vsel %vm3965_vm14, %v4671_v61, 0.0 }
 0xd82   : > { %4754 = vperm.xlu1 %6562, %v10631_v27  }
 0xd84   : > { %v4652_v2 = vpop.permute.xlu1 %4651 }
 0xd85   : > { %v4866_v44 = vsel %vm3962_vm4, %v4652_v2, 0.0 }
 0xd86   : > { %v5024_v51 = vadd.f32 %v5023_v25, %v4866_v44  ;;  %v10668_v25 = vld [vmem:[#allocation88_spill] sm:$0xff]  ;;  %v4880_v44 = vsel %vm3976_vm3, %v4737_v10, 0.0 }
 0xd87   : > { %vm3977_vm4 = vcmp.eq.s32.totalorder %v10668_v25, %v8519_v7 }
 0xd88   : > { %v5025_v58 = vadd.f32 %v5024_v51, %v4867_v48 }
 0xd8a   : > { %v5026_v20 = vrot.slane %v5025_v58, 4 }
 0xd8c   : > { %v5027_v3 = vadd.f32 %v5026_v20, %v5025_v58  ;;  %v4689_v33 = vpop.permute.xlu2 %4688  ;;  %v10669_v20 = vld [vmem:[#allocation179_spill] sm:$0xff] }
 0xd8d   : > { %vm3978_vm9 = vcmp.eq.s32.totalorder %v10669_v20, %v8519_v7 }
 0xd8e   : > { %v5028_v9 = vrot.slane %v5027_v3, 2 }
 0xd90   : > { %v5029_v17 = vadd.f32 %v5028_v9, %v5027_v3 }
 0xd92   : > { %v5030_v27 = vrot.slane %v5029_v17, 1 }
 0xd94   : > { %v5031_v13 = vadd.f32 %v5030_v27, %v5029_v17  ;;  %v4665_v45 = vpop.permute.xlu1 %4664  ;;  %v10670_v17 = vld [vmem:[#allocation102_spill] sm:$0xff] }
 0xd95   : > { %v4868_v63 = vsel %vm3964_vm6, %v4665_v45, 0.0  ;;  %vm3979_vm6 = vcmp.eq.s32.totalorder %v10670_v17, %v8519_v7 }
 0xd96   : > { %v9908_v41 = vsel %vm3067_vm7, %v5031_v13, %v9853_v22  ;;  %v5032_v8 = vadd.f32 %v4869_v38, %v4868_v63  ;;  %v10657_v22 = vld [vmem:[#allocation223_spill] sm:$0xff]  ;;  %vm3968_vm7 = vcmp.eq.s32.totalorder %v10658_v32, %v8519_v7  ;;  %v4884_v38 = vld [vmem:[#allocation3] sm:$0xff] }
 0xd97   : > { %v4870_v52 = vsel %vm3966_vm8, %v10657_v22, 0.0  ;;  %v4872_v18 = vsel %vm3968_vm7, %v4689_v33, 0.0 }
 0xd98   : > { %v5033_v49 = vadd.f32 %v5032_v8, %v4870_v52 }
 0xd9c   : > { %v4701_v47 = vpop.permute.xlu2 %4700 }
 0xd9d   : > { %v4874_v23 = vsel %vm3970_vm11, %v4701_v47, 0.0 }
 0xda4   : > { %v4683_v36 = vpop.permute.xlu1 %4682 }
 0xda5   : > { %v4871_v30 = vsel %vm3967_vm10, %v4683_v36, 0.0 }
 0xda6   : > { %v5034_v19 = vadd.f32 %v5033_v49, %v4871_v30 }
 0xda8   : > { %v5035_v0 = vadd.f32 %v5034_v19, %v4872_v18 }
 0xdac   : > { %v4719_v35 = vpop.permute.xlu2 %4718 }
 0xdad   : > { %v4877_v40 = vsel %vm3973_vm15, %v4719_v35, 0.0 }
 0xdb4   : > { %v4695_v28 = vpop.permute.xlu1 %4694 }
 0xdb5   : > { %v4873_v24 = vsel %vm3969_vm2, %v4695_v28, 0.0 }
 0xdb6   : > { %v5036_v21 = vadd.f32 %v5035_v0, %v4873_v24 }
 0xdb8   : > { %v5037_v29 = vadd.f32 %v5036_v21, %v4874_v23 }
 0xdba   : > { %v5038_v50 = vadd.f32 %v5037_v29, %v4875_v54 }
 0xdbc   : > { %v4731_v53 = vpop.permute.xlu2 %4730 }
 0xdbd   : > { %v4879_v42 = vsel %vm3975_vm0, %v4731_v53, 0.0 }
 0xdc4   : > { %v4713_v15 = vpop.permute.xlu1 %4712 }
 0xdc5   : > { %v4876_v37 = vsel %vm3972_vm13, %v4713_v15, 0.0 }
 0xdc6   : > { %v5039_v4 = vadd.f32 %v5038_v50, %v4876_v37 }
 0xdc8   : > { %v5040_v6 = vadd.f32 %v5039_v4, %v4877_v40 }
 0xdcc   : > { %v4749_v48 = vpop.permute.xlu2 %4748 }
 0xdcd   : > { %v4882_v3 = vsel %vm3978_vm9, %v4749_v48, 0.0 }
 0xdd4   : > { %v4725_v62 = vpop.permute.xlu1 %4724 }
 0xdd5   : > { %v4878_v34 = vsel %vm3974_vm5, %v4725_v62, 0.0 }
 0xdd6   : > { %v5041_v1 = vadd.f32 %v5040_v6, %v4878_v34 }
 0xdd8   : > { %v5042_v5 = vadd.f32 %v5041_v1, %v4879_v42 }
 0xdda   : > { %v5043_v51 = vadd.f32 %v5042_v5, %v4880_v44 }
 0xde4   : > { %v4743_v2 = vpop.permute.xlu1 %4742 }
 0xde5   : > { %v4881_v55 = vsel %vm3977_vm4, %v4743_v2, 0.0 }
 0xde6   : > { %v5044_v58 = vadd.f32 %v5043_v51, %v4881_v55 }
 0xde8   : > { %v5045_v27 = vadd.f32 %v5044_v58, %v4882_v3 }
 0xdf4   : > { %v4755_v9 = vpop.permute.xlu1 %4754 }
 0xdf5   : > { %v4883_v13 = vsel %vm3979_vm6, %v4755_v9, 0.0 }
 0xdf6   : > { %v5046_v45 = vadd.f32 %v5045_v27, %v4883_v13 }
 0xdf8   : > { %v5047_v61 = vrot.slane %v5046_v45, 4 }
 0xdfa   : > { %v5048_v43 = vadd.f32 %v5047_v61, %v5046_v45 }
 0xdfc   : > { %v5049_v63 = vrot.slane %v5048_v43, 2 }
 0xdfe   : > { %v5050_v57 = vadd.f32 %v5049_v63, %v5048_v43 }
 0xe00   : > { %v5051_v36 = vrot.slane %v5050_v57, 1 }
 0xe02   : > { %v5052_v14 = vadd.f32 %v5051_v36, %v5050_v57 }
 0xe03   : > { %5074 = sbr.rel (%p5836_p13) target bundleno = 4034 (0xfc2), region = 168 }
 0xe04   : > { %v5067_v8 = vsel %vm3069_vm1, %v5052_v14, %v9908_v41 }
 0xe05   : > { %v5069_v56 = vadd.f32 %v5067_v8, %v4884_v38 }
 0xe07   : > { %5070 = vst [vmem:[#allocation3] sm:$0xff] %v5069_v56 }
 0xe08   : > { %v5911_v22 = vld [vmem:[#allocation13 + $0x38] sm:$0xff]   ;;  %v5910_v52 = vld [vmem:[#allocation13 + $0x30] sm:$0xff]   ;;  %v5909_v18 = vld [vmem:[#allocation13 + $0x28] sm:$0xff]   ;;  %v7161_v35 = vmov 0  }
 0xe09   : > { %v5918_v7 = vld [vmem:[#allocation15 + $0x38] sm:$0xff]   ;;  %v5872_v30 = vunpack.c.h.bf16 %v5911_v22  ;;  %v5871_v49 = vunpack.c.l.bf16 %v5911_v22  ;;  %v5917_v28 = vld [vmem:[#allocation15 + $0x30] sm:$0xff]   ;;  %v5868_v32 = vunpack.c.h.bf16 %v5910_v52  ;;  %v5916_v24 = vld [vmem:[#allocation15 + $0x28] sm:$0xff]   ;;  %v5867_v41 = vunpack.c.l.bf16 %v5910_v52  ;;  %6564 = vset.pattern.permute.xlu0 %v7161_v35 }
 0xe0a   : > { %v5904_v33 = vunpack.c.h.bf16 %v5918_v7  ;;  %v5903_v19 = vunpack.c.l.bf16 %v5918_v7  ;;  %v5900_v11 = vunpack.c.h.bf16 %v5917_v28  ;;  %v5899_v0 = vunpack.c.l.bf16 %v5917_v28  ;;  %v5210_v47 = vld [vmem:[#allocation16 + $0x78] sm:$0xff]  ;;  %v5209_v23 = vld [vmem:[#allocation16 + $0x70] sm:$0xff]  ;;  %v5908_v26 = vld [vmem:[#allocation13 + $0x20] sm:$0xff]  }
 0xe0b   : > { %5140 = vmatpush.msra.mxu0 %v5872_v30  ;;  %v5864_v21 = vunpack.c.h.bf16 %v5909_v18  ;;  %v5896_v12 = vunpack.c.h.bf16 %v5916_v24  ;;  %v5251_v15 = vld [vmem:[#allocation18 + $0x78] sm:$0xff]  ;;  %v5915_v29 = vld [vmem:[#allocation15 + $0x20] sm:$0xff]   ;;  %5215 = vmatpush.msra.mxu2 %v5210_v47  ;;  %v5863_v39 = vunpack.c.l.bf16 %v5909_v18  ;;  %v5895_v46 = vunpack.c.l.bf16 %v5916_v24  ;;  %v5250_v37 = vld [vmem:[#allocation18 + $0x70] sm:$0xff] }
 0xe0c   : > { %5168 = vmatpush.msra.mxu1 %v5904_v33  ;;  %5256 = vmatpush.msra.mxu3 %v5251_v15  ;;  %v5160_v54 = vld [vmem:[%s7616_s16] sm:$0xff]  ;;  %v5860_v50 = vunpack.c.h.bf16 %v5908_v26  ;;  %v5892_v4 = vunpack.c.h.bf16 %v5915_v29  ;;  %v5208_v62 = vld [vmem:[#allocation16 + $0x68] sm:$0xff]  ;;  %v5907_v31 = vld [vmem:[#allocation13 + $0x18] sm:$0xff]   ;;  %v5859_v34 = vunpack.c.l.bf16 %v5908_v26  ;;  %v5891_v6 = vunpack.c.l.bf16 %v5915_v29 }
 0xe0d   : > { %5141 = vmatpush.msra.mxu0 %v5871_v49  ;;  %5216 = vmatpush.msra.mxu2 %v5209_v23  ;;  %v5249_v60 = vld [vmem:[#allocation18 + $0x68] sm:$0xff]  ;;  %v5914_v40 = vld [vmem:[#allocation15 + $0x18] sm:$0xff]   ;;  %v5207_v53 = vld [vmem:[#allocation16 + $0x60] sm:$0xff]  ;;  %v5856_v59 = vunpack.c.h.bf16 %v5907_v31  ;;  %v5855_v25 = vunpack.c.l.bf16 %v5907_v31 }
 0xe0e   : > { %5169 = vmatpush.msra.mxu1 %v5903_v19  ;;  %5163 = vperm.xlu0 %6564, %v5160_v54   ;;  %v5248_v1 = vld [vmem:[#allocation18 + $0x60] sm:$0xff]  ;;  %v5888_v42 = vunpack.c.h.bf16 %v5914_v40  ;;  %v5206_v16 = vld [vmem:[#allocation16 + $0x58] sm:$0xff]  ;;  %v5906_v5 = vld [vmem:[#allocation13 + $0x10] sm:$0xff]   ;;  %v5887_v44 = vunpack.c.l.bf16 %v5914_v40 }
 0xe0f   : > { %5142 = vmatpush.msra.mxu0 %v5868_v32  ;;  %5257 = vmatpush.msra.mxu3 %v5250_v37  ;;  %v5247_v10 = vld [vmem:[#allocation18 + $0x58] sm:$0xff]  ;;  %v5913_v2 = vld [vmem:[#allocation15 + $0x10] sm:$0xff]   ;;  %v5188_v55 = vld [vmem:[%s7621_s27] sm:$0xff]  ;;  %v5852_v20 = vunpack.c.h.bf16 %v5906_v5  ;;  %v5851_v27 = vunpack.c.l.bf16 %v5906_v5 }
 0xe10   : > { %5170 = vmatpush.msra.mxu1 %v5900_v11  ;;  %5217 = vmatpush.msra.mxu2 %v5208_v62  ;;  %v5205_v51 = vld [vmem:[#allocation16 + $0x50] sm:$0xff]  ;;  %v5905_v48 = vld [vmem:[#allocation13 + $0x8] sm:$0xff]   ;;  %v5884_v3 = vunpack.c.h.bf16 %v5913_v2  ;;  %v5883_v13 = vunpack.c.l.bf16 %v5913_v2  ;;  %v5203_v61 = vld [vmem:[#allocation16 + $0x40] sm:$0xff] }
 0xe11   : > { %5143 = vmatpush.msra.mxu0 %v5867_v41  ;;  %5258 = vmatpush.msra.mxu3 %v5249_v60  ;;  %v5246_v58 = vld [vmem:[#allocation18 + $0x50] sm:$0xff]  ;;  %v5204_v9 = vld [vmem:[#allocation16 + $0x48] sm:$0xff]  ;;  %v5848_v43 = vunpack.c.h.bf16 %v5905_v48  ;;  %v5244_v57 = vld [vmem:[#allocation18 + $0x40] sm:$0xff]  ;;  %v5847_v8 = vunpack.c.l.bf16 %v5905_v48 }
 0xe12   : > { %5171 = vmatpush.msra.mxu1 %v5899_v0  ;;  %5218 = vmatpush.msra.mxu2 %v5207_v53  ;;  %v5912_v17 = vld [vmem:[#allocation15 + $0x8] sm:$0xff]   ;;  %v5202_v36 = vld [vmem:[#allocation16 + $0x38] sm:$0xff]  ;;  %v5842_v38 = vld [vmem:[#allocation13] sm:$0xff]  }
 0xe13   : > { %5144 = vmatpush.msra.mxu0 %v5864_v21  ;;  %5259 = vmatpush.msra.mxu3 %v5248_v1  ;;  %v5245_v45 = vld [vmem:[#allocation18 + $0x48] sm:$0xff]  ;;  %v5880_v63 = vunpack.c.h.bf16 %v5912_v17  ;;  %v5874_v14 = vld [vmem:[#allocation15] sm:$0xff]   ;;  %v5879_v56 = vunpack.c.l.bf16 %v5912_v17  ;;  %v5243_v22 = vld [vmem:[#allocation18 + $0x38] sm:$0xff]  ;;  %v5844_v52 = vunpack.c.h.bf16 %v5842_v38  ;;  %v5843_v19 = vunpack.c.l.bf16 %v5842_v38 }
 0xe14   : > { %5172 = vmatpush.msra.mxu1 %v5896_v12  ;;  %5219 = vmatpush.msra.mxu2 %v5206_v16  ;;  %v5201_v7 = vld [vmem:[#allocation16 + $0x30] sm:$0xff]  ;;  %v5876_v30 = vunpack.c.h.bf16 %v5874_v14  ;;  %v5200_v49 = vld [vmem:[#allocation16 + $0x28] sm:$0xff]  ;;  %v5875_v28 = vunpack.c.l.bf16 %v5874_v14  ;;  %v5139_v11 = vld [vmem:[#allocation2] sm:$0xff] }
 0xe15   : > { %5145 = vmatpush.msra.mxu0 %v5863_v39  ;;  %5260 = vmatpush.msra.mxu3 %v5247_v10  ;;  %v5242_v33 = vld [vmem:[#allocation18 + $0x30] sm:$0xff]  ;;  %v5241_v32 = vld [vmem:[#allocation18 + $0x28] sm:$0xff]  ;;  %v5310_v24 = vld [vmem:[#allocation21 + $0x78] sm:$0xff] }
 0xe16   : > { %5173 = vmatpush.msra.mxu1 %v5895_v46  ;;  %5191 = vperm.xlu0 %6564, %v5188_v55   ;;  %v5167_v18 = vld [vmem:[#allocation3] sm:$0xff]  ;;  %v5293_v41 = vld [vmem:[#allocation19 + $0x78] sm:$0xff]  ;;  %v5309_v0 = vld [vmem:[#allocation21 + $0x70] sm:$0xff] }
 0xe17   : > { %5146 = vmatpush.msra.mxu0 %v5860_v50  ;;  %5220 = vmatpush.msra.mxu2 %v5205_v51  ;;  %v5292_v47 = vld [vmem:[#allocation19 + $0x70] sm:$0xff]  ;;  %v5308_v21 = vld [vmem:[#allocation21 + $0x68] sm:$0xff]  ;;  %v5307_v15 = vld [vmem:[#allocation21 + $0x60] sm:$0xff] }
 0xe18   : > { %5174 = vmatpush.msra.mxu1 %v5892_v4  ;;  %5261 = vmatpush.msra.mxu3 %v5246_v58  ;;  %v5291_v12 = vld [vmem:[#allocation19 + $0x68] sm:$0xff]  ;;  %v5290_v23 = vld [vmem:[#allocation19 + $0x60] sm:$0xff]  ;;  %v5306_v26 = vld [vmem:[#allocation21 + $0x58] sm:$0xff] }
 0xe19   : > { %5147 = vmatpush.msra.mxu0 %v5859_v34  ;;  %5221 = vmatpush.msra.mxu2 %v5204_v9  ;;  %v5289_v29 = vld [vmem:[#allocation19 + $0x58] sm:$0xff]  ;;  %v5305_v39 = vld [vmem:[#allocation21 + $0x50] sm:$0xff]  ;;  %v5304_v54 = vld [vmem:[#allocation21 + $0x48] sm:$0xff] }
 0xe1a   : > { %5175 = vmatpush.msra.mxu1 %v5891_v6  ;;  %5262 = vmatpush.msra.mxu3 %v5245_v45  ;;  %v5288_v46 = vld [vmem:[#allocation19 + $0x50] sm:$0xff]  ;;  %v5287_v37 = vld [vmem:[#allocation19 + $0x48] sm:$0xff]  ;;  %v5303_v35 = vld [vmem:[#allocation21 + $0x40] sm:$0xff] }
 0xe1b   : > { %5148 = vmatpush.msra.mxu0 %v5856_v59  ;;  %5222 = vmatpush.msra.mxu2 %v5203_v61  ;;  %v5286_v50 = vld [vmem:[#allocation19 + $0x40] sm:$0xff]  ;;  %v5302_v4 = vld [vmem:[#allocation21 + $0x38] sm:$0xff]  ;;  %v5301_v40 = vld [vmem:[#allocation21 + $0x30] sm:$0xff] }
 0xe1c   : > { %5176 = vmatpush.msra.mxu1 %v5888_v42  ;;  %5263 = vmatpush.msra.mxu3 %v5244_v57  ;;  %v5285_v62 = vld [vmem:[#allocation19 + $0x38] sm:$0xff]  ;;  %v5199_v60 = vld [vmem:[#allocation16 + $0x20] sm:$0xff]  ;;  %v5284_v34 = vld [vmem:[#allocation19 + $0x30] sm:$0xff] }
 0xe1d   : > { %5149 = vmatpush.msra.mxu0 %v5855_v25  ;;  %5223 = vmatpush.msra.mxu2 %v5202_v36  ;;  %v5240_v31 = vld [vmem:[#allocation18 + $0x20] sm:$0xff]  ;;  %v5198_v6 = vld [vmem:[#allocation16 + $0x18] sm:$0xff]  ;;  %v5300_v1 = vld [vmem:[#allocation21 + $0x28] sm:$0xff] }
 0xe1e   : > { %5177 = vmatpush.msra.mxu1 %v5887_v44  ;;  %5264 = vmatpush.msra.mxu3 %v5243_v22  ;;  %v5239_v53 = vld [vmem:[#allocation18 + $0x18] sm:$0xff]  ;;  %v5283_v59 = vld [vmem:[#allocation19 + $0x28] sm:$0xff]  ;;  %v5197_v42 = vld [vmem:[#allocation16 + $0x10] sm:$0xff] }
 0xe1f   : > { %5150 = vmatpush.msra.mxu0 %v5852_v20  ;;  %5224 = vmatpush.msra.mxu2 %v5201_v7  ;;  %v5238_v16 = vld [vmem:[#allocation18 + $0x10] sm:$0xff]  ;;  %v5299_v10 = vld [vmem:[#allocation21 + $0x20] sm:$0xff]  ;;  %v5196_v2 = vld [vmem:[#allocation16 + $0x8] sm:$0xff] }
 0xe20   : > { %5178 = vmatpush.msra.mxu1 %v5884_v3  ;;  %5265 = vmatpush.msra.mxu3 %v5242_v33  ;;  %v5282_v5 = vld [vmem:[#allocation19 + $0x20] sm:$0xff]  ;;  %v5237_v25 = vld [vmem:[#allocation18 + $0x8] sm:$0xff]  ;;  %v5298_v44 = vld [vmem:[#allocation21 + $0x18] sm:$0xff] }
 0xe21   : > { %5151 = vmatpush.msra.mxu0 %v5851_v27  ;;  %5225 = vmatpush.msra.mxu2 %v5200_v49  ;;  %v5281_v55 = vld [vmem:[#allocation19 + $0x18] sm:$0xff]  ;;  %v5195_v51 = vld [vmem:[#allocation16] sm:$0xff]  ;;  %v5297_v58 = vld [vmem:[#allocation21 + $0x10] sm:$0xff] }
 0xe22   : > { %5179 = vmatpush.msra.mxu1 %v5883_v13  ;;  %5266 = vmatpush.msra.mxu3 %v5241_v32  ;;  %v5236_v48 = vld [vmem:[#allocation18] sm:$0xff]  ;;  %v5280_v20 = vld [vmem:[#allocation19 + $0x10] sm:$0xff]  ;;  %v5296_v3 = vld [vmem:[#allocation21 + $0x8] sm:$0xff] }
 0xe23   : > { %5152 = vmatpush.msra.mxu0 %v5848_v43  ;;  %5226 = vmatpush.msra.mxu2 %v5199_v60  ;;  %v5279_v9 = vld [vmem:[#allocation19 + $0x8] sm:$0xff]  ;;  %v5295_v17 = vld [vmem:[#allocation21] sm:$0xff]  ;;  %v5294_v13 = vld [vmem:[%s10672_s29] sm:$0xff] }
 0xe24   : > { %5180 = vmatpush.msra.mxu1 %v5880_v63  ;;  %5267 = vmatpush.msra.mxu3 %v5240_v31  ;;  %v5278_v27 = vld [vmem:[#allocation19] sm:$0xff]  ;;  %v5388_v61 = vld [vmem:[#allocation24 + $0x78] sm:$0xff]  ;;  %v5387_v57 = vld [vmem:[#allocation24 + $0x70] sm:$0xff] }
 0xe25   : > { %5153 = vmatpush.msra.mxu0 %v5847_v8  ;;  %5227 = vmatpush.msra.mxu2 %v5198_v6  ;;  %v5277_v45 = vld [vmem:[%s10673_s1] sm:$0xff]  ;;  %v5372_v43 = vld [vmem:[#allocation22 + $0x78] sm:$0xff]  ;;  %v5371_v36 = vld [vmem:[#allocation22 + $0x70] sm:$0xff] }
 0xe26   : > { %5181 = vmatpush.msra.mxu1 %v5879_v56  ;;  %5268 = vmatpush.msra.mxu3 %v5239_v53  ;;  %v5444_v63 = vld [vmem:[#allocation25 + $0x78] sm:$0xff]  ;;  %v5443_v38 = vld [vmem:[#allocation25 + $0x70] sm:$0xff]  ;;  %v5386_v14 = vld [vmem:[#allocation24 + $0x68] sm:$0xff] }
 0xe27   : > { %5154 = vmatpush.msra.mxu0 %v5844_v52  ;;  %5228 = vmatpush.msra.mxu2 %v5197_v42  ;;  %v5370_v8 = vld [vmem:[#allocation22 + $0x68] sm:$0xff]  ;;  %v5385_v22 = vld [vmem:[#allocation24 + $0x60] sm:$0xff]  ;;  %v5368_v33 = vld [vmem:[#allocation22 + $0x58] sm:$0xff] }
 0xe28   : > { %5182 = vmatpush.msra.mxu1 %v5876_v30  ;;  %5269 = vmatpush.msra.mxu3 %v5238_v16  ;;  %v5442_v56 = vld [vmem:[#allocation25 + $0x68] sm:$0xff]  ;;  %v5369_v7 = vld [vmem:[#allocation22 + $0x60] sm:$0xff]  ;;  %v5384_v30 = vld [vmem:[#allocation24 + $0x58] sm:$0xff] }
 0xe29   : > { %5155 = vmatpush.msra.mxu0 %v5843_v19  ;;  %5229 = vmatpush.msra.mxu2 %v5196_v2  ;;  %v5441_v52 = vld [vmem:[#allocation25 + $0x60] sm:$0xff]  ;;  %v5440_v49 = vld [vmem:[#allocation25 + $0x58] sm:$0xff]  ;;  %v5383_v19 = vld [vmem:[#allocation24 + $0x50] sm:$0xff] }
 0xe2a   : > { %5183 = vmatpush.msra.mxu1 %v5875_v28  ;;  %5156 = vmatmul.f32.vlgmr.msra.gmra.mxu0 %v5139_v11  ;;  %v5367_v28 = vld [vmem:[#allocation22 + $0x50] sm:$0xff]  ;;  %v5382_v11 = vld [vmem:[#allocation24 + $0x48] sm:$0xff]  ;;  %v6565_v31 = vld [vmem:[%s10674_s25] ss:$0 sm:$0xff] }
 0xe2b   : > { %5184 = vmatmul.f32.vlgmr.msra.gmra.mxu1 %v5167_v18  ;;  %5311 = vmatpush.msrb.mxu0 %v5310_v24  ;;  %v5439_v32 = vld [vmem:[#allocation25 + $0x50] sm:$0xff]  ;;  %v5366_v18 = vld [vmem:[#allocation22 + $0x48] sm:$0xff]  ;;  %v5377_v53 = vld [vmem:[#allocation24 + $0x20] sm:$0xff] }
 0xe2c   : > { %5331 = vmatpush.msrb.mxu1 %v5293_v41  ;;  %5270 = vmatpush.msra.mxu3 %v5237_v25  ;;  %v5438_v24 = vld [vmem:[#allocation25 + $0x48] sm:$0xff]  ;;  %v5381_v41 = vld [vmem:[#allocation24 + $0x40] sm:$0xff]  ;;  %v5376_v16 = vld [vmem:[#allocation24 + $0x18] sm:$0xff] }
 0xe2d   : > { %5312 = vmatpush.msrb.mxu0 %v5309_v0  ;;  %5230 = vmatpush.msra.mxu2 %v5195_v51  ;;  %v5365_v0 = vld [vmem:[#allocation22 + $0x40] sm:$0xff]  ;;  %v5434_v60 = vld [vmem:[#allocation25 + $0x28] sm:$0xff]  ;;  %v5375_v2 = vld [vmem:[#allocation24 + $0x10] sm:$0xff] }
 0xe2e   : > { %5332 = vmatpush.msrb.mxu1 %v5292_v47  ;;  %5271 = vmatpush.msra.mxu3 %v5236_v48  ;;  %v5359_v25 = vld [vmem:[#allocation22 + $0x10] sm:$0xff]  ;;  %v5358_v51 = vld [vmem:[#allocation22 + $0x8] sm:$0xff] }
 0xe2f   : > { %5313 = vmatpush.msrb.mxu0 %v5308_v21  ;;  %5389 = vmatpush.msrb.mxu2 %v5388_v61  ;;  %v5437_v21 = vld [vmem:[#allocation25 + $0x40] sm:$0xff]  ;;  %v5430_v48 = vld [vmem:[#allocation25 + $0x8] sm:$0xff] }
 0xe30   : > { %5333 = vmatpush.msrb.mxu1 %v5291_v12  ;;  %5409 = vmatpush.msrb.mxu3 %v5372_v43  ;;  %v5380_v12 = vld [vmem:[#allocation24 + $0x38] sm:$0xff] }
 0xe31   : > { %5314 = vmatpush.msrb.mxu0 %v5307_v15  ;;  %5390 = vmatpush.msrb.mxu2 %v5387_v57  ;;  %v5364_v15 = vld [vmem:[#allocation22 + $0x38] sm:$0xff] }
 0xe32   : > { %5334 = vmatpush.msrb.mxu1 %v5290_v23  ;;  %5410 = vmatpush.msrb.mxu3 %v5371_v36  ;;  %v5436_v23 = vld [vmem:[#allocation25 + $0x38] sm:$0xff] }
 0xe33   : > { %5315 = vmatpush.msrb.mxu0 %v5306_v26  ;;  %5391 = vmatpush.msrb.mxu2 %v5386_v14  ;;  %v5379_v26 = vld [vmem:[#allocation24 + $0x30] sm:$0xff] }
 0xe34   : > { %5335 = vmatpush.msrb.mxu1 %v5289_v29  ;;  %5411 = vmatpush.msrb.mxu3 %v5370_v8  ;;  %v5363_v29 = vld [vmem:[#allocation22 + $0x30] sm:$0xff]  ;;  %v6568_v8 = vld [vmem:[%s10677_s10] ss:$0 sm:$0xff] }
 0xe35   : > { %5316 = vmatpush.msrb.mxu0 %v5305_v39  ;;  %5392 = vmatpush.msrb.mxu2 %v5385_v22  ;;  %v5435_v39 = vld [vmem:[#allocation25 + $0x30] sm:$0xff] }
 0xe36   : > { %5336 = vmatpush.msrb.mxu1 %v5288_v46  ;;  %5412 = vmatpush.msrb.mxu3 %v5369_v7 }
 0xe37   : > { %5317 = vmatpush.msrb.mxu0 %v5304_v54  ;;  %5393 = vmatpush.msrb.mxu2 %v5384_v30 }
 0xe38   : > { %5337 = vmatpush.msrb.mxu1 %v5287_v37  ;;  %5413 = vmatpush.msrb.mxu3 %v5368_v33 }
 0xe39   : > { %5318 = vmatpush.msrb.mxu0 %v5303_v35  ;;  %5394 = vmatpush.msrb.mxu2 %v5383_v19 }
 0xe3a   : > { %5338 = vmatpush.msrb.mxu1 %v5286_v50  ;;  %5414 = vmatpush.msrb.mxu3 %v5367_v28 }
 0xe3b   : > { %5319 = vmatpush.msrb.mxu0 %v5302_v4  ;;  %5395 = vmatpush.msrb.mxu2 %v5382_v11  ;;  %v5378_v4 = vld [vmem:[#allocation24 + $0x28] sm:$0xff] }
 0xe3c   : > { %5339 = vmatpush.msrb.mxu1 %v5285_v62  ;;  %5415 = vmatpush.msrb.mxu3 %v5366_v18  ;;  %v5362_v62 = vld [vmem:[#allocation22 + $0x28] sm:$0xff] }
 0xe3d   : > { %5320 = vmatpush.msrb.mxu0 %v5301_v40  ;;  %5396 = vmatpush.msrb.mxu2 %v5381_v41 }
 0xe3e   : > { %5340 = vmatpush.msrb.mxu1 %v5284_v34  ;;  %5416 = vmatpush.msrb.mxu3 %v5365_v0 }
 0xe3f   : > { %5321 = vmatpush.msrb.mxu0 %v5300_v1  ;;  %5397 = vmatpush.msrb.mxu2 %v5380_v12  ;;  %v5361_v1 = vld [vmem:[#allocation22 + $0x20] sm:$0xff] }
 0xe40   : > { %5341 = vmatpush.msrb.mxu1 %v5283_v59  ;;  %5417 = vmatpush.msrb.mxu3 %v5364_v15  ;;  %v5433_v59 = vld [vmem:[#allocation25 + $0x20] sm:$0xff] }
 0xe41   : > { %5322 = vmatpush.msrb.mxu0 %v5299_v10  ;;  %5398 = vmatpush.msrb.mxu2 %v5379_v26  ;;  %v5360_v10 = vld [vmem:[#allocation22 + $0x18] sm:$0xff] }
 0xe42   : > { %5342 = vmatpush.msrb.mxu1 %v5282_v5  ;;  %5418 = vmatpush.msrb.mxu3 %v5363_v29  ;;  %v5432_v5 = vld [vmem:[#allocation25 + $0x18] sm:$0xff] }
 0xe43   : > { %5323 = vmatpush.msrb.mxu0 %v5298_v44  ;;  %5399 = vmatpush.msrb.mxu2 %v5378_v4  ;;  %v5431_v44 = vld [vmem:[#allocation25 + $0x10] sm:$0xff] }
 0xe44   : > { %5343 = vmatpush.msrb.mxu1 %v5281_v55  ;;  %5419 = vmatpush.msrb.mxu3 %v5362_v62  ;;  %v5374_v55 = vld [vmem:[#allocation24 + $0x8] sm:$0xff] }
 0xe45   : > { %5324 = vmatpush.msrb.mxu0 %v5297_v58  ;;  %5400 = vmatpush.msrb.mxu2 %v5377_v53  ;;  %v5373_v58 = vld [vmem:[#allocation24] sm:$0xff] }
 0xe46   : > { %5344 = vmatpush.msrb.mxu1 %v5280_v20  ;;  %5420 = vmatpush.msrb.mxu3 %v5361_v1  ;;  %v5357_v20 = vld [vmem:[#allocation22] sm:$0xff] }
 0xe47   : > { %5325 = vmatpush.msrb.mxu0 %v5296_v3  ;;  %5401 = vmatpush.msrb.mxu2 %v5376_v16  ;;  %v5429_v3 = vld [vmem:[#allocation25] sm:$0xff] }
 0xe48   : > { %5345 = vmatpush.msrb.mxu1 %v5279_v9  ;;  %5421 = vmatpush.msrb.mxu3 %v5360_v10 }
 0xe49   : > { %5326 = vmatpush.msrb.mxu0 %v5295_v17  ;;  %5402 = vmatpush.msrb.mxu2 %v5375_v2  ;;  %v6566_v17 = vld [vmem:[%s10675_s14] ss:$0 sm:$0xff] }
 0xe4a   : > { %5346 = vmatpush.msrb.mxu1 %v5278_v27  ;;  %5327 = vmatmul.f32.vlgmr.msrb.gmra.mxu0 %v5294_v13  ;;  %v6567_v27 = vld [vmem:[%s10676_s7] ss:$0 sm:$0xff] }
 0xe4b   : > { %5347 = vmatmul.f32.vlgmr.msrb.gmra.mxu1 %v5277_v45  ;;  %5445 = vmatpush.msra.mxu0 %v5444_v63 }
 0xe4c   : > { %5422 = vmatpush.msrb.mxu3 %v5359_v25  ;;  %5403 = vmatpush.msrb.mxu2 %v5374_v55 }
 0xe4d   : > { %5446 = vmatpush.msra.mxu0 %v5443_v38 }
 0xe4e   : > { %5423 = vmatpush.msrb.mxu3 %v5358_v51  ;;  %5404 = vmatpush.msrb.mxu2 %v5373_v58 }
 0xe4f   : > { %5447 = vmatpush.msra.mxu0 %v5442_v56 }
 0xe50   : > { %5424 = vmatpush.msrb.mxu3 %v5357_v20 }
 0xe51   : > { %5448 = vmatpush.msra.mxu0 %v5441_v52 }
 0xe53   : > { %5449 = vmatpush.msra.mxu0 %v5440_v49 }
 0xe55   : > { %5450 = vmatpush.msra.mxu0 %v5439_v32 }
 0xe57   : > { %5451 = vmatpush.msra.mxu0 %v5438_v24 }
 0xe59   : > { %5452 = vmatpush.msra.mxu0 %v5437_v21 }
 0xe5b   : > { %5453 = vmatpush.msra.mxu0 %v5436_v23 }
 0xe5d   : > { %5454 = vmatpush.msra.mxu0 %v5435_v39 }
 0xe5f   : > { %5455 = vmatpush.msra.mxu0 %v5434_v60 }
 0xe61   : > { %5456 = vmatpush.msra.mxu0 %v5433_v59 }
 0xe63   : > { %5457 = vmatpush.msra.mxu0 %v5432_v5 }
 0xe65   : > { %5458 = vmatpush.msra.mxu0 %v5431_v44 }
 0xe67   : > { %5459 = vmatpush.msra.mxu0 %v5430_v48 }
 0xe69   : > { %5460 = vmatpush.msra.mxu0 %v5429_v3 }
 0xe80   : > { %v5164_v47 = vpop.permute.xlu0 %5163 }
 0xe88   : > { %v5192_v46 = vpop.permute.xlu0 %5191 }
 0xea7   : > { %v5157_v54 = vpop.f32.mrf.mxu0 }
 0xea8   : > { %v5185_v37 = vpop.f32.mrf.mxu1  ;;  %v5166_v35 = vmul.f32 %v5164_v47, %v5157_v54 }
 0xea9   : > { %v5194_v50 = vmul.f32 %v5192_v46, %v5185_v37 }
 0xeaa   : > { %5231 = vmatmul.f32.vlgmr.msra.gmra.mxu2 %v5166_v35 }
 0xeab   : > { %5272 = vmatmul.f32.vlgmr.msra.gmra.mxu3 %v5194_v50 }
 0xec7   : > { %v5328_v40 = vpop.f32.mrf.mxu0 }
 0xec8   : > { %v5348_v34 = vpop.f32.mrf.mxu1 }
 0xec9   : > { %v5349_v6 = vadd.f32 %v5348_v34, %v5328_v40 }
 0xecb   : > { %v5355_v42 = vadd.f32 %v6565_v31, %v5349_v6 }
 0xecd   : > { %6569 = vtanh.f32 %v5355_v42 }
 0xed3   : > { %v6570_v9 = vpop.eup %6569 }
 0xed4   : > { %5405 = vmatmul.f32.vlgmr.msrb.gmra.mxu2 %v6570_v9 }
 0xf2d   : > { %v5232_v13 = vpop.f32.mrf.mxu2 }
 0xf2e   : > { %v5273_v45 = vpop.f32.mrf.mxu3  ;;  %v5233_v61 = vadd.f32 %v6566_v17, %v5232_v13 }
 0xf2f   : > { %v5274_v43 = vadd.f32 %v6567_v27, %v5273_v45 }
 0xf30   : > { %6571 = vtanh.f32 %v5233_v61 }
 0xf31   : > { %6573 = vtanh.f32 %v5274_v43 }
 0xf36   : > { %v6572_v63 = vpop.eup %6571 }
 0xf37   : > { %v6574_v57 = vpop.eup %6573  ;;  %5425 = vmatmul.f32.vlgmr.msrb.gmra.mxu3 %v6572_v63 }
 0xf38   : > { %5461 = vmatmul.f32.vlgmr.msra.gmra.mxu0 %v6574_v57 }
 0xf57   : > { %v5406_v36 = vpop.f32.mrf.mxu2 }
 0xfb5   : > { %v5462_v56 = vpop.f32.mrf.mxu0 }
 0xfba   : > { %v5426_v38 = vpop.f32.mrf.mxu3 }
 0xfbb   : > { %v5427_v14 = vadd.f32 %v5426_v38, %v5406_v36 }
 0xfbd   : > { %v5465_v22 = vadd.f32 %v5462_v56, %v5427_v14 }
 0xfbf   : > { %v5470_v7 = vadd.f32 %v6568_v8, %v5465_v22 }
 0xfc1   : > { %5471 = vst [vmem:[%s1045_s24] sm:$0xff] %v5470_v7 }
 0xfc2 PF: > { %s10678_s16 = sld [smem:[#allocation41_spill]]  ;;  %s5485_s29 = sshll.u32 %s1045_s24, 4  ;;  %s5486_s29 = int_to_ptr.vmem [resolvable:$true] %s5485_s29 }
 0xfc3   : > { %s10679_s0 = sld [smem:[#allocation38_spill]] }
 0xfc4   : > { %s10681_s2 = sld [smem:[#allocation244_spill]] }
 0xfc8   : > { %s5838_s4 = sshll.u32 %s10678_s16, 3 }
 0xfc9   : > { %s10683_s6 = sand.u32 1, %s10679_s0  }
 0xfca   : > { %s10682_s8 = smov %s10681_s2  ;;  %s5483_s20 = scalar_lea.hbm %s10681_s2, %s5838_s4 }
 0xfcb   : > { %s5487_s1 = sshll.u32 %s5483_s20, 4  ;;  %s5473_s21 = scalar_lea.sflag [#allocation6], %s10683_s6  ;;  %s5488_s1 = int_to_ptr.hbm [resolvable:$true] %s5487_s1 }
 0xfcc   : > { %s7009_s25 = sshra.s32 %s5488_s1, 4  ;;  %s7015_s9 = scalar_lea.hbm %s10682_s8, 16  ;;  %s7010_s25 = int_to_ptr.hbm [resolvable:$true] %s7009_s25 }
 0xfcd   : > { %s7011_s22 = scalar_lea.hbm %s7010_s25, 8  ;;  %p7016_p10 = scmp.lt.s32.totalorder %s7010_s25, %s10682_s8 }
 0xfce   : > { %p7012_p4 = scmp.ne.s32.totalorder %s7010_s25, %s7011_s22  ;;  %p7017_p11 = scmp.lt.s32.totalorder %s7015_s9, %s7011_s22 }
 0xfd0   : > { %p7013_p7 = pnand %p7012_p4, %p7463_p12  ;;  %p7018_p2 = por %p7017_p11, %p7016_p10 }
 0xfd2   : > { %p7014_p9 = pneg %p7013_p7 }
 0xfd4   : > { %p7019_p8 = pnand %p7018_p2, %p7014_p9 }
 0xfd6   : > { %7022 = shalt.err (!%p7019_p8)
}
 0xfd7   : > { %5965 = dma.vmem_to_hbm [thread:$0]  (%p7463_p12), %s5486_s29, 128, %s5488_s1, %s5473_s21  }
 0xfd8 PF: > { %s10684_s11 = sld [smem:[#allocation37_spill]]  ;;  %p6034_p6 = scmp.ge.s32.totalorder %s7145_s5, 2 }
 0xfda   : > { %p6012_p3 = pnand %p6034_p6, %p7467_p0 }
 0xfdc   : > { %p6013_p5 = pneg %p6012_p3 }
 0xfde   : > { %s5499_s19 = sand.u32 1, %s10684_s11  }
 0xfdf   : > { %s5500_s17 = scalar_lea.sflag [#allocation6], %s5499_s19 }
 0xfe0   : > { %7100 = dma.done.wait (%p6013_p5), %s5500_s17, 128  }
 0xfe1   : > { %7102 = vsyncadd (%p6013_p5), %s5500_s17, 4294967168  ;;  %s48_s5 = sadd.s32 1, %s7145_s5   ;;  %s10686_s2 = sld [smem:[#allocation38_spill]] }
 0xfe2   : > { %p45_p1 = scmp.ge.s32.totalorder %s48_s5, 6   ;;  %s10687_s25 = sld [smem:[#allocation39_spill]] }
 0xfe3   : > { %s10688_s26 = sld [smem:[#allocation49_spill]]  ;;  %s10694_s27 = smov %s7121_s3 }
 0xfe4   : > { %s10689_s10 = sld [smem:[#allocation48_spill]]  ;;  %s10695_s3 = smov %s7125_s28 }
 0xfe5   : > { %s10690_s29 = sld [smem:[#allocation42_spill]] }
 0xfe6   : > { %s10691_s0 = sld [smem:[#allocation43_spill]]  ;;  %47 = sbr.rel (!%p45_p1) target bundleno = 38 (0x26), region = 250 }
 0xfe7   : > { %s10692_s4 = sld [smem:[#allocation46_spill]] }
 0xfe8   : > { %s10693_s30 = sld [smem:[#allocation47_spill]] }
 0xfea   : > { %s10696_s28 = smov %s10689_s10 }
 0xfeb   :  { %5506 = vsyncpa [#allocation5], 1 }
 0xfec   :  { %5508 = vsyncpa [#allocation5 + $0x1], 1 }
 0xfed   :  { %5509 = vsyncpa [#allocation8], 1 }
 0xfee   :  { %5511 = vsyncpa [#allocation8 + $0x1], 1 }
 0xfef   :  { %5512 = vsyncpa [#allocation11], 1 }
 0xff0   :  { %5514 = vsyncpa [#allocation11 + $0x1], 1 }
 0xff1   :  { %5515 = vsyncpa [#allocation14], 1 }
 0xff2   :  { %5516 = vsyncpa [#allocation17], 1 }
 0xff3   :  { %5517 = vsyncpa [#allocation20], 1 }
 0xff4   :  { %5518 = vsyncpa [#allocation23], 1 }
 0xff5   :  { %5519 = vsyncpa [#allocation26], 1 }
 0xff6   :  { %5520 = vsyncpa [#allocation6], 1 }
 0xff7   :  { %5522 = vsyncpa [#allocation6 + $0x1], 1 }

</bundles_post_ra>
